<compile_context>
chip_gen: v7x
topology: tpu7x:2x2x1
jax: 0.10.0
libtpu: 0.0.40
codegen_flags: <defaults>
</compile_context>

<pallas_src>
import functools

import jax
import jax.numpy as jnp
from jax.experimental import pallas as pl
from jax.experimental.pallas import tpu as pltpu


_VMEM_LIMIT = 48 * 1024 * 1024  # fits v7x's 64 MiB physical, raises v5e/v6e scoped default


def _cp(dims):
    return pltpu.CompilerParams(dimension_semantics=dims,
                                vmem_limit_bytes=_VMEM_LIMIT)


def _row_tile(m, target=256):
    """Largest sublane-friendly row tile <= target that divides m (else full m)."""
    for t in (256, 128, 64, 32, 16, 8):
        if t <= target and m % t == 0:
            return t
    return m


def _lane_tile(n, target=512):
    """Largest 128-multiple lane tile <= target that divides n (else full n)."""
    for t in (512, 256, 128):
        if t <= target and n % t == 0:
            return t
    return n


# --------------------------------------------------------------------------
# Pallas kernels
# --------------------------------------------------------------------------

def _ln_linear_kernel(x_ref, g_ref, b_ref, w_ref, bias_ref, o_ref, ln_scr, *,
                      eps, act):
    """out[i, j] = act(LN(x[i]) @ W[:, j] + bias[j]); LN computed once per row tile."""
    @pl.when(pl.program_id(1) == 0)
    def _():
        x = x_ref[...].astype(jnp.float32)
        mu = jnp.mean(x, axis=-1, keepdims=True)
        var = jnp.mean(jnp.square(x - mu), axis=-1, keepdims=True)
        ln_scr[...] = ((x - mu) * jax.lax.rsqrt(var + eps)) * g_ref[...] + b_ref[...]

    acc = jnp.dot(ln_scr[...].astype(jnp.bfloat16), w_ref[...],
                  preferred_element_type=jnp.float32)
    acc = acc + bias_ref[...]
    if act == "relu":
        acc = jnp.maximum(acc, 0.0)
    o_ref[...] = acc.astype(o_ref.dtype)


def ln_linear(x2d, gamma, beta, w, bias, *, act="none", out_dtype=jnp.float32,
              eps=1e-5, tm_target=256, tn_target=512):
    M, H = x2d.shape
    N = w.shape[1]
    tm = _row_tile(M, tm_target)
    tn = _lane_tile(N, tn_target)
    kernel = functools.partial(_ln_linear_kernel, eps=eps, act=act)
    return pl.pallas_call(
        kernel,
        out_shape=jax.ShapeDtypeStruct((M, N), out_dtype),
        grid=(M // tm, N // tn),
        in_specs=[
            pl.BlockSpec((tm, H), lambda i, j: (i, 0)),
            pl.BlockSpec((1, H), lambda i, j: (0, 0)),
            pl.BlockSpec((1, H), lambda i, j: (0, 0)),
            pl.BlockSpec((H, tn), lambda i, j: (0, j)),
            pl.BlockSpec((1, tn), lambda i, j: (0, j)),
        ],
        out_specs=pl.BlockSpec((tm, tn), lambda i, j: (i, j)),
        scratch_shapes=[pltpu.VMEM((tm, H), jnp.float32)],
        compiler_params=_cp(("parallel", "arbitrary")),
    )(x2d, gamma.reshape(1, H), beta.reshape(1, H), w, bias.reshape(1, N))


def _linear_kernel(x_ref, w_ref, bias_ref, o_ref, *, act):
    acc = jnp.dot(x_ref[...].astype(jnp.bfloat16), w_ref[...],
                  preferred_element_type=jnp.float32)
    acc = acc + bias_ref[...]
    if act == "relu":
        acc = jnp.maximum(acc, 0.0)
    o_ref[...] = acc.astype(o_ref.dtype)


def linear(x2d, w, bias, *, act="none", out_dtype=jnp.float32,
           tm_target=256, tn_target=512):
    M, K = x2d.shape
    N = w.shape[1]
    tm = _row_tile(M, tm_target)
    tn = _lane_tile(N, tn_target)
    return pl.pallas_call(
        functools.partial(_linear_kernel, act=act),
        out_shape=jax.ShapeDtypeStruct((M, N), out_dtype),
        grid=(M // tm, N // tn),
        in_specs=[
            pl.BlockSpec((tm, K), lambda i, j: (i, 0)),
            pl.BlockSpec((K, tn), lambda i, j: (0, j)),
            pl.BlockSpec((1, tn), lambda i, j: (0, j)),
        ],
        out_specs=pl.BlockSpec((tm, tn), lambda i, j: (i, j)),
        compiler_params=_cp(("parallel", "parallel")),
    )(x2d, w, bias.reshape(1, N))


def _linear_residual_kernel(x_ref, w_ref, bias_ref, res_ref, o_ref):
    acc = jnp.dot(x_ref[...].astype(jnp.bfloat16), w_ref[...],
                  preferred_element_type=jnp.float32)
    o_ref[...] = (res_ref[...] + acc + bias_ref[...]).astype(o_ref.dtype)


def linear_residual(x2d, w, bias, res2d, *, tm_target=256, tn_target=512):
    """residual + x @ W + b, fused (attention output projection + residual add)."""
    M, K = x2d.shape
    N = w.shape[1]
    tm = _row_tile(M, tm_target)
    tn = _lane_tile(N, tn_target)
    return pl.pallas_call(
        _linear_residual_kernel,
        out_shape=jax.ShapeDtypeStruct((M, N), jnp.float32),
        grid=(M // tm, N // tn),
        in_specs=[
            pl.BlockSpec((tm, K), lambda i, j: (i, 0)),
            pl.BlockSpec((K, tn), lambda i, j: (0, j)),
            pl.BlockSpec((1, tn), lambda i, j: (0, j)),
            pl.BlockSpec((tm, tn), lambda i, j: (i, j)),
        ],
        out_specs=pl.BlockSpec((tm, tn), lambda i, j: (i, j)),
        compiler_params=_cp(("parallel", "parallel")),
    )(x2d, w, bias.reshape(1, N), res2d)


def _ffn_kernel(x_ref, g_ref, b_ref, w1_ref, b1_ref, w2_ref, b2_ref, o_ref,
                ln_scr, acc_scr, *, eps):
    """out = x + FC2(relu(FC1(LN(x)))) with the intermediate dim as reduction axis."""
    k = pl.program_id(1)

    @pl.when(k == 0)
    def _():
        x = x_ref[...].astype(jnp.float32)
        mu = jnp.mean(x, axis=-1, keepdims=True)
        var = jnp.mean(jnp.square(x - mu), axis=-1, keepdims=True)
        ln_scr[...] = ((x - mu) * jax.lax.rsqrt(var + eps)) * g_ref[...] + b_ref[...]
        acc_scr[...] = jnp.zeros_like(acc_scr)

    h = jnp.dot(ln_scr[...].astype(jnp.bfloat16), w1_ref[...],
                preferred_element_type=jnp.float32) + b1_ref[...]
    h = jnp.maximum(h, 0.0)
    acc_scr[...] += jnp.dot(h.astype(jnp.bfloat16), w2_ref[...],
                            preferred_element_type=jnp.float32)

    @pl.when(k == pl.num_programs(1) - 1)
    def _():
        o_ref[...] = (x_ref[...] + acc_scr[...] + b2_ref[...]).astype(o_ref.dtype)


def ffn_block(x2d, gamma, beta, w1, b1, w2, b2, *, eps=1e-5,
              tm_target=256, tk_target=512):
    M, H = x2d.shape
    I = w1.shape[1]
    tm = _row_tile(M, tm_target)
    tk = _lane_tile(I, tk_target)
    return pl.pallas_call(
        functools.partial(_ffn_kernel, eps=eps),
        out_shape=jax.ShapeDtypeStruct((M, H), jnp.float32),
        grid=(M // tm, I // tk),
        in_specs=[
            pl.BlockSpec((tm, H), lambda i, k: (i, 0)),
            pl.BlockSpec((1, H), lambda i, k: (0, 0)),
            pl.BlockSpec((1, H), lambda i, k: (0, 0)),
            pl.BlockSpec((H, tk), lambda i, k: (0, k)),
            pl.BlockSpec((1, tk), lambda i, k: (0, k)),
            pl.BlockSpec((tk, H), lambda i, k: (k, 0)),
            pl.BlockSpec((1, H), lambda i, k: (0, 0)),
        ],
        out_specs=pl.BlockSpec((tm, H), lambda i, k: (i, 0)),
        scratch_shapes=[pltpu.VMEM((tm, H), jnp.float32),
                        pltpu.VMEM((tm, H), jnp.float32)],
        compiler_params=_cp(("parallel", "arbitrary")),
    )(x2d, gamma.reshape(1, H), beta.reshape(1, H),
      w1, b1.reshape(1, I), w2, b2.reshape(1, H))


def _attention_kernel(q_ref, k_ref, v_ref, o_ref, *, nhead, head_dim, scale, causal):
    """One batch element per grid step; all heads processed with lane-dense blocks."""
    q = q_ref[0]
    k = k_ref[0]
    v = v_ref[0]
    Sq = q.shape[0]
    Sk = k.shape[0]
    if causal:
        row = jax.lax.broadcasted_iota(jnp.int32, (Sq, Sk), 0)
        col = jax.lax.broadcasted_iota(jnp.int32, (Sq, Sk), 1)
        # mask stays in the f32 score path (-1e30 would overflow bf16)
        neg = jnp.where(col > row, jnp.float32(-1e30), jnp.float32(0.0))
    outs = []
    for h in range(nhead):
        sl = slice(h * head_dim, (h + 1) * head_dim)
        qh = q[:, sl].astype(jnp.bfloat16)
        kh = k[:, sl].astype(jnp.bfloat16)
        vh = v[:, sl].astype(jnp.bfloat16)
        s = jax.lax.dot_general(qh, kh, (((1,), (1,)), ((), ())),
                                preferred_element_type=jnp.float32) * scale
        if causal:
            s = s + neg
        m = jnp.max(s, axis=-1, keepdims=True)
        p = jnp.exp(s - m)
        denom = jnp.sum(p, axis=-1, keepdims=True)
        p = p * pl.reciprocal(denom, approx=True)
        outs.append(jnp.dot(p.astype(jnp.bfloat16), vh,
                            preferred_element_type=jnp.float32))
    o_ref[0] = jnp.concatenate(outs, axis=-1).astype(o_ref.dtype)


# TODO(synk): for long sequences convert the attention kernels to a flash-style
#             online-softmax loop over Sk tiles instead of the full (Sq, Sk) scores.

def self_attention(qkv, *, nhead):
    """qkv: (B, S, 3H) fused projection slab; Q/K/V sliced via BlockSpec index_maps."""
    B, S, threeH = qkv.shape
    H = threeH // 3
    dh = H // nhead
    kernel = functools.partial(_attention_kernel, nhead=nhead, head_dim=dh,
                               scale=1.0 / (dh ** 0.5), causal=True)
    return pl.pallas_call(
        kernel,
        out_shape=jax.ShapeDtypeStruct((B, S, H), jnp.bfloat16),
        grid=(B,),
        in_specs=[
            pl.BlockSpec((1, S, H), lambda b: (b, 0, 0)),
            pl.BlockSpec((1, S, H), lambda b: (b, 0, 1)),
            pl.BlockSpec((1, S, H), lambda b: (b, 0, 2)),
        ],
        out_specs=pl.BlockSpec((1, S, H), lambda b: (b, 0, 0)),
        compiler_params=_cp(("parallel",)),
    )(qkv, qkv, qkv)


def cross_attention(q, kv, *, nhead):
    """q: (B, S, H); kv: (B, Senc, 2H) fused K/V slab. No mask (all-False padding)."""
    B, S, H = q.shape
    Sk = kv.shape[1]
    dh = H // nhead
    kernel = functools.partial(_attention_kernel, nhead=nhead, head_dim=dh,
                               scale=1.0 / (dh ** 0.5), causal=False)
    return pl.pallas_call(
        kernel,
        out_shape=jax.ShapeDtypeStruct((B, S, H), jnp.bfloat16),
        grid=(B,),
        in_specs=[
            pl.BlockSpec((1, S, H), lambda b: (b, 0, 0)),
            pl.BlockSpec((1, Sk, H), lambda b: (b, 0, 0)),
            pl.BlockSpec((1, Sk, H), lambda b: (b, 0, 1)),
        ],
        out_specs=pl.BlockSpec((1, S, H), lambda b: (b, 0, 0)),
        compiler_params=_cp(("parallel",)),
    )(q, kv, kv)


# --------------------------------------------------------------------------
# Model glue (plain JAX: contiguous reshapes and the layer loop only)
# --------------------------------------------------------------------------

def decoder_layer_fwd(x, enc2d, p, cfg):
    B, S, H = x.shape
    nh = cfg["nhead"]
    M = B * S
    Senc = enc2d.shape[0] // B
    x2d = x.reshape(M, H)

    # ---- causal self-attention (pre-LN): fused LN->QKV, attn, fused out-proj+res ----
    qkv = ln_linear(x2d, p["self_ln_g"], p["self_ln_b"],
                    p["self_qkv_w"], p["self_qkv_b"], out_dtype=jnp.bfloat16)
    attn = self_attention(qkv.reshape(B, S, 3 * H), nhead=nh)
    x2d = linear_residual(attn.reshape(M, H), p["self_out_w"], p["self_out_b"], x2d)

    # ---- encoder-decoder cross attention (mask is all-False -> no masking) ----
    q = ln_linear(x2d, p["cross_ln_g"], p["cross_ln_b"],
                  p["cross_q_w"], p["cross_q_b"], out_dtype=jnp.bfloat16)
    kv = linear(enc2d, p["cross_kv_w"], p["cross_kv_b"], out_dtype=jnp.bfloat16)
    attn = cross_attention(q.reshape(B, S, H), kv.reshape(B, Senc, 2 * H), nhead=nh)
    x2d = linear_residual(attn.reshape(M, H), p["cross_out_w"], p["cross_out_b"], x2d)

    # ---- feed-forward: LN -> FC1 -> relu -> FC2 -> residual, single kernel ----
    x2d = ffn_block(x2d, p["ffn_ln_g"], p["ffn_ln_b"],
                    p["fc1_w"], p["fc1_b"], p["fc2_w"], p["fc2_b"])
    return x2d.reshape(B, S, H)


def ls_transformer_decoder_forward(params, inputs_embeds, encoder_hidden_states, cfg):
    B, S, H = inputs_embeds.shape
    Senc = encoder_hidden_states.shape[1]
    enc2d = encoder_hidden_states.reshape(B * Senc, H)

    x = inputs_embeds
    for i in range(cfg["num_decoder_layer"]):
        x = decoder_layer_fwd(x, enc2d, params["layers"][i], cfg)

    # final LN fused with the tied output projection (embed stored pre-transposed (H, V)).
    # TODO(synk): QuantLinear's fake int8 weight quant/dequant (amax calibration)
    #             has no clean Pallas equivalent; treated as a plain bf16 matmul.
    M = B * S
    x2d = x.reshape(M, H)
    zero_bias = jnp.zeros((cfg["vocab_size"],), jnp.float32)
    logits = ln_linear(x2d, params["final_ln_g"], params["final_ln_b"],
                       params["embed_weight_t"], zero_bias, out_dtype=jnp.float32)
    return logits.reshape(B, S, cfg["vocab_size"])


# --------------------------------------------------------------------------
# Deterministic parameter init (weights stored bf16; LN params / biases f32)
# --------------------------------------------------------------------------

def init_params(key, cfg):
    H = cfg["hidden_size"]
    I = cfg["intermediate_size"]
    V = cfg["vocab_size"]

    def dense(k, fan_in, fan_out):
        return (0.02 * jax.random.normal(k, (fan_in, fan_out), jnp.float32)
                ).astype(jnp.bfloat16)

    layers = []
    for _ in range(cfg["num_decoder_layer"]):
        key, *ks = jax.random.split(key, 9)
        layers.append({
            "self_ln_g": jnp.ones((H,), jnp.float32),
            "self_ln_b": jnp.zeros((H,), jnp.float32),
            "self_qkv_w": dense(ks[0], H, 3 * H),
            "self_qkv_b": jnp.zeros((3 * H,), jnp.float32),
            "self_out_w": dense(ks[1], H, H),
            "self_out_b": jnp.zeros((H,), jnp.float32),
            "cross_ln_g": jnp.ones((H,), jnp.float32),
            "cross_ln_b": jnp.zeros((H,), jnp.float32),
            "cross_q_w": dense(ks[2], H, H),
            "cross_q_b": jnp.zeros((H,), jnp.float32),
            # fused K/V projection weight: (H, 2H)
            "cross_kv_w": jnp.concatenate(
                [dense(ks[3], H, H), dense(ks[4], H, H)], axis=1),
            "cross_kv_b": jnp.zeros((2 * H,), jnp.float32),
            "cross_out_w": dense(ks[5], H, H),
            "cross_out_b": jnp.zeros((H,), jnp.float32),
            "ffn_ln_g": jnp.ones((H,), jnp.float32),
            "ffn_ln_b": jnp.zeros((H,), jnp.float32),
            "fc1_w": dense(ks[6], H, I), "fc1_b": jnp.zeros((I,), jnp.float32),
            "fc2_w": dense(ks[7], I, H), "fc2_b": jnp.zeros((H,), jnp.float32),
        })
    key, k_emb = jax.random.split(key)
    embed = 0.02 * jax.random.normal(k_emb, (V, H), jnp.float32)
    return {
        "layers": layers,
        "final_ln_g": jnp.ones((H,), jnp.float32),
        "final_ln_b": jnp.zeros((H,), jnp.float32),
        # tied output projection, stored pre-transposed once: (H, V)
        "embed_weight_t": embed.T.astype(jnp.bfloat16),
    }


# --------------------------------------------------------------------------

if __name__ == "__main__":
    cfg = dict(
        num_decoder_layer=2,
        hidden_size=128,          # lane-dense hidden for TPU (multiple of 128)
        intermediate_size=256,
        nhead=4,
        vocab_size=512,
        max_seq_len=8,
        padding_idx=0,
        pre_layer_norm=True,
        activation_fn="relu",
        attn_prob_dropout_ratio=0.0,
        activation_dropout_ratio=0.0,
        hidden_dropout_ratio=0.0,
    )

    B, S, Senc, H = 2, 8, 8, cfg["hidden_size"]

    key = jax.random.PRNGKey(0)
    k_in, k_enc, k_p = jax.random.split(key, 3)
    inputs_embeds = jax.random.normal(k_in, (B, S, H), jnp.float32)
    encoder_hidden_states = jax.random.normal(k_enc, (B, Senc, H), jnp.float32)
    params = init_params(k_p, cfg)

    fwd = jax.jit(functools.partial(ls_transformer_decoder_forward, cfg=cfg))
    out = fwd(params, inputs_embeds, encoder_hidden_states)
    jax.block_until_ready(out)

    assert out.shape == (B, S, cfg["vocab_size"]), out.shape
    assert out.dtype == jnp.float32
    print("KERNEL_OK")
</pallas_src>

<mosaic_0001>
module attributes {stable_mosaic.version = 11 : i64} {
  func.func @_linear_kernel(%arg0: i32, %arg1: i32, %arg2: memref<16x128xf32, #tpu.memory_space<vmem>>, %arg3: memref<128x256xbf16, #tpu.memory_space<vmem>>, %arg4: memref<1x256xf32, #tpu.memory_space<vmem>>, %arg5: memref<16x256xbf16, #tpu.memory_space<vmem>>) attributes {dimension_semantics = [#tpu.dimension_semantics<parallel>, #tpu.dimension_semantics<parallel>], iteration_bounds = array<i64: 1, 1>, scalar_prefetch = 0 : i64, scratch_operands = 0 : i64, tpu.core_type = #tpu.core_type<tc>, window_params = [{transform_indices = @transform_0, window_bounds = array<i64: 16, 128>}, {transform_indices = @transform_1, window_bounds = array<i64: 128, 256>}, {transform_indices = @transform_2, window_bounds = array<i64: 1, 256>}, {transform_indices = @transform_3, window_bounds = array<i64: 16, 256>}]} {
    %c0 = arith.constant 0 : index
    %c0_0 = arith.constant 0 : index
    %0 = vector.load %arg2[%c0, %c0_0] : memref<16x128xf32, #tpu.memory_space<vmem>>, vector<16x128xf32>
    %1 = arith.truncf %0 : vector<16x128xf32> to vector<16x128xbf16>
    %c0_1 = arith.constant 0 : index
    %c0_2 = arith.constant 0 : index
    %2 = vector.load %arg3[%c0_1, %c0_2] : memref<128x256xbf16, #tpu.memory_space<vmem>>, vector<128x256xbf16>
    %cst = arith.constant dense<0.000000e+00> : vector<16x256xf32>
    %3 = tpu.matmul %1, %2, %cst {dimension_numbers = #tpu.dot_dimension_numbers<[1], [0], [0], [1], [0, 0, 1, 1], [], []>} : vector<16x128xbf16>, vector<128x256xbf16>, vector<16x256xf32> -> vector<16x256xf32>
    %c0_3 = arith.constant 0 : index
    %c0_4 = arith.constant 0 : index
    %4 = vector.load %arg4[%c0_3, %c0_4] : memref<1x256xf32, #tpu.memory_space<vmem>>, vector<1x256xf32>
    %5 = vector.broadcast %4 : vector<1x256xf32> to vector<16x256xf32>
    %6 = arith.addf %3, %5 : vector<16x256xf32>
    %7 = arith.truncf %6 : vector<16x256xf32> to vector<16x256xbf16>
    %c0_5 = arith.constant 0 : index
    %c0_6 = arith.constant 0 : index
    %8 = vector.load %arg5[%c0_5, %c0_6] : memref<16x256xbf16, #tpu.memory_space<vmem>>, vector<16x256xbf16>
    tpu.vector_store %arg5[%c0_5, %c0_6], %7 {strides = array<i32>} : memref<16x256xbf16, #tpu.memory_space<vmem>>, vector<16x256xbf16>,
    return
  }
  func.func @transform_0(%arg0: i32, %arg1: i32) -> (i32, i32) {
    %c0_i32 = arith.constant 0 : i32
    %c0_i32_0 = arith.constant 0 : i32
    return %arg0, %c0_i32 : i32, i32
  }
  func.func @transform_1(%arg0: i32, %arg1: i32) -> (i32, i32) {
    %c0_i32 = arith.constant 0 : i32
    %c0_i32_0 = arith.constant 0 : i32
    return %c0_i32, %arg1 : i32, i32
  }
  func.func @transform_2(%arg0: i32, %arg1: i32) -> (i32, i32) {
    %c0_i32 = arith.constant 0 : i32
    %c0_i32_0 = arith.constant 0 : i32
    return %c0_i32, %arg1 : i32, i32
  }
  func.func @transform_3(%arg0: i32, %arg1: i32) -> (i32, i32) {
    %c0_i32 = arith.constant 0 : i32
    return %arg0, %arg1 : i32, i32
  }
}

module attributes {stable_mosaic.version = 11 : i64} {
  func.func @_linear_kernel(%arg0: i32, %arg1: i32, %arg2: memref<16x128xf32, #tpu.memory_space<vmem>>, %arg3: memref<128x256xbf16, #tpu.memory_space<vmem>>, %arg4: memref<1x256xf32, #tpu.memory_space<vmem>>, %arg5: memref<16x256xbf16, #tpu.memory_space<vmem>>) attributes {dimension_semantics = [#tpu.dimension_semantics<parallel>, #tpu.dimension_semantics<parallel>], iteration_bounds = array<i64: 1, 1>, scalar_prefetch = 0 : i64, scratch_operands = 0 : i64, tpu.core_type = #tpu.core_type<tc>, window_params = [{transform_indices = @transform_0, window_bounds = array<i64: 16, 128>}, {transform_indices = @transform_1, window_bounds = array<i64: 128, 256>}, {transform_indices = @transform_2, window_bounds = array<i64: 1, 256>}, {transform_indices = @transform_3, window_bounds = array<i64: 16, 256>}]} {
    %c0 = arith.constant 0 : index
    %c0_0 = arith.constant 0 : index
    %0 = vector.load %arg2[%c0, %c0_0] : memref<16x128xf32, #tpu.memory_space<vmem>>, vector<16x128xf32>
    %1 = arith.truncf %0 : vector<16x128xf32> to vector<16x128xbf16>
    %c0_1 = arith.constant 0 : index
    %c0_2 = arith.constant 0 : index
    %2 = vector.load %arg3[%c0_1, %c0_2] : memref<128x256xbf16, #tpu.memory_space<vmem>>, vector<128x256xbf16>
    %cst = arith.constant dense<0.000000e+00> : vector<16x256xf32>
    %3 = tpu.matmul %1, %2, %cst {dimension_numbers = #tpu.dot_dimension_numbers<[1], [0], [0], [1], [0, 0, 1, 1], [], []>} : vector<16x128xbf16>, vector<128x256xbf16>, vector<16x256xf32> -> vector<16x256xf32>
    %c0_3 = arith.constant 0 : index
    %c0_4 = arith.constant 0 : index
    %4 = vector.load %arg4[%c0_3, %c0_4] : memref<1x256xf32, #tpu.memory_space<vmem>>, vector<1x256xf32>
    %5 = vector.broadcast %4 : vector<1x256xf32> to vector<16x256xf32>
    %6 = arith.addf %3, %5 : vector<16x256xf32>
    %7 = arith.truncf %6 : vector<16x256xf32> to vector<16x256xbf16>
    %c0_5 = arith.constant 0 : index
    %c0_6 = arith.constant 0 : index
    %8 = vector.load %arg5[%c0_5, %c0_6] : memref<16x256xbf16, #tpu.memory_space<vmem>>, vector<16x256xbf16>
    tpu.vector_store %arg5[%c0_5, %c0_6], %7 {strides = array<i32>} : memref<16x256xbf16, #tpu.memory_space<vmem>>, vector<16x256xbf16>,
    return
  }
  func.func @transform_0(%arg0: i32, %arg1: i32) -> (i32, i32) {
    %c0_i32 = arith.constant 0 : i32
    %c0_i32_0 = arith.constant 0 : i32
    return %arg0, %c0_i32 : i32, i32
  }
  func.func @transform_1(%arg0: i32, %arg1: i32) -> (i32, i32) {
    %c0_i32 = arith.constant 0 : i32
    %c0_i32_0 = arith.constant 0 : i32
    return %c0_i32, %arg1 : i32, i32
  }
  func.func @transform_2(%arg0: i32, %arg1: i32) -> (i32, i32) {
    %c0_i32 = arith.constant 0 : i32
    %c0_i32_0 = arith.constant 0 : i32
    return %c0_i32, %arg1 : i32, i32
  }
  func.func @transform_3(%arg0: i32, %arg1: i32) -> (i32, i32) {
    %c0_i32 = arith.constant 0 : i32
    return %arg0, %arg1 : i32, i32
  }
}

module attributes {stable_mosaic.version = 11 : i64} {
  func.func @_ln_linear_kernel(%arg0: i32, %arg1: i32, %arg2: memref<16x128xf32, #tpu.memory_space<vmem>>, %arg3: memref<1x128xf32, #tpu.memory_space<vmem>>, %arg4: memref<1x128xf32, #tpu.memory_space<vmem>>, %arg5: memref<128x128xbf16, #tpu.memory_space<vmem>>, %arg6: memref<1x128xf32, #tpu.memory_space<vmem>>, %arg7: memref<16x128xbf16, #tpu.memory_space<vmem>>, %arg8: memref<16x128xf32, #tpu.memory_space<vmem>>) attributes {dimension_semantics = [#tpu.dimension_semantics<parallel>, #tpu.dimension_semantics<arbitrary>], iteration_bounds = array<i64: 1, 3>, scalar_prefetch = 0 : i64, scratch_operands = 1 : i64, tpu.core_type = #tpu.core_type<tc>, window_params = [{transform_indices = @transform_0, window_bounds = array<i64: 16, 128>}, {pipeline_mode = #tpu.pipeline_mode<synchronous>, transform_indices = @transform_1, window_bounds = array<i64: 1, 128>}, {pipeline_mode = #tpu.pipeline_mode<synchronous>, transform_indices = @transform_2, window_bounds = array<i64: 1, 128>}, {transform_indices = @transform_3, window_bounds = array<i64: 128, 128>}, {transform_indices = @transform_4, window_bounds = array<i64: 1, 128>}, {transform_indices = @transform_5, window_bounds = array<i64: 16, 128>}]} {
    %c0_i32 = arith.constant 0 : i32
    %0 = arith.cmpi eq, %arg1, %c0_i32 : i32
    %1 = arith.extui %0 : i1 to i32
    %c0_i32_0 = arith.constant 0 : i32
    %2 = arith.cmpi ne, %1, %c0_i32_0 : i32
    scf.if %2 {
      %c0_8 = arith.constant 0 : index
      %c0_9 = arith.constant 0 : index
      %12 = vector.load %arg2[%c0_8, %c0_9] : memref<16x128xf32, #tpu.memory_space<vmem>>, vector<16x128xf32>
      %cst_10 = arith.constant dense<0.000000e+00> : vector<16xf32>
      %13 = vector.multi_reduction <add>, %12, %cst_10 [1] : vector<16x128xf32> to vector<16xf32>
      %14 = vector.shape_cast %13 : vector<16xf32> to vector<16x1xf32>
      %cst_11 = arith.constant 1.280000e+02 : f32
      %15 = vector.broadcast %cst_11 : f32 to vector<16x1xf32>
      %16 = arith.divf %14, %15 : vector<16x1xf32>
      %17 = vector.broadcast %16 : vector<16x1xf32> to vector<16x128xf32>
      %18 = arith.subf %12, %17 : vector<16x128xf32>
      %19 = arith.mulf %18, %18 : vector<16x128xf32>
      %cst_12 = arith.constant dense<0.000000e+00> : vector<16xf32>
      %20 = vector.multi_reduction <add>, %19, %cst_12 [1] : vector<16x128xf32> to vector<16xf32>
      %21 = vector.shape_cast %20 : vector<16xf32> to vector<16x1xf32>
      %cst_13 = arith.constant 1.280000e+02 : f32
      %22 = vector.broadcast %cst_13 : f32 to vector<16x1xf32>
      %23 = arith.divf %21, %22 : vector<16x1xf32>
      %24 = vector.broadcast %16 : vector<16x1xf32> to vector<16x128xf32>
      %25 = arith.subf %12, %24 : vector<16x128xf32>
      %cst_14 = arith.constant 9.99999974E-6 : f32
      %26 = vector.broadcast %cst_14 : f32 to vector<16x1xf32>
      %27 = arith.addf %23, %26 : vector<16x1xf32>
      %28 = math.rsqrt %27 : vector<16x1xf32>
      %29 = vector.broadcast %28 : vector<16x1xf32> to vector<16x128xf32>
      %30 = arith.mulf %25, %29 : vector<16x128xf32>
      %c0_15 = arith.constant 0 : index
      %c0_16 = arith.constant 0 : index
      %31 = vector.load %arg3[%c0_15, %c0_16] : memref<1x128xf32, #tpu.memory_space<vmem>>, vector<1x128xf32>
      %32 = vector.broadcast %31 : vector<1x128xf32> to vector<16x128xf32>
      %33 = arith.mulf %30, %32 : vector<16x128xf32>
      %c0_17 = arith.constant 0 : index
      %c0_18 = arith.constant 0 : index
      %34 = vector.load %arg4[%c0_17, %c0_18] : memref<1x128xf32, #tpu.memory_space<vmem>>, vector<1x128xf32>
      %35 = vector.broadcast %34 : vector<1x128xf32> to vector<16x128xf32>
      %36 = arith.addf %33, %35 : vector<16x128xf32>
      %c0_19 = arith.constant 0 : index
      %c0_20 = arith.constant 0 : index
      %37 = vector.load %arg8[%c0_19, %c0_20] : memref<16x128xf32, #tpu.memory_space<vmem>>, vector<16x128xf32>
      tpu.vector_store %arg8[%c0_19, %c0_20], %36 {strides = array<i32>} : memref<16x128xf32, #tpu.memory_space<vmem>>, vector<16x128xf32>,
    } else {
    }
    %c0 = arith.constant 0 : index
    %c0_1 = arith.constant 0 : index
    %3 = vector.load %arg8[%c0, %c0_1] : memref<16x128xf32, #tpu.memory_space<vmem>>, vector<16x128xf32>
    %4 = arith.truncf %3 : vector<16x128xf32> to vector<16x128xbf16>
    %c0_2 = arith.constant 0 : index
    %c0_3 = arith.constant 0 : index
    %5 = vector.load %arg5[%c0_2, %c0_3] : memref<128x128xbf16, #tpu.memory_space<vmem>>, vector<128x128xbf16>
    %cst = arith.constant dense<0.000000e+00> : vector<16x128xf32>
    %6 = tpu.matmul %4, %5, %cst {dimension_numbers = #tpu.dot_dimension_numbers<[1], [0], [0], [1], [0, 0, 1, 1], [], []>} : vector<16x128xbf16>, vector<128x128xbf16>, vector<16x128xf32> -> vector<16x128xf32>
    %c0_4 = arith.constant 0 : index
    %c0_5 = arith.constant 0 : index
    %7 = vector.load %arg6[%c0_4, %c0_5] : memref<1x128xf32, #tpu.memory_space<vmem>>, vector<1x128xf32>
    %8 = vector.broadcast %7 : vector<1x128xf32> to vector<16x128xf32>
    %9 = arith.addf %6, %8 : vector<16x128xf32>
    %10 = arith.truncf %9 : vector<16x128xf32> to vector<16x128xbf16>
    %c0_6 = arith.constant 0 : index
    %c0_7 = arith.constant 0 : index
    %11 = vector.load %arg7[%c0_6, %c0_7] : memref<16x128xbf16, #tpu.memory_space<vmem>>, vector<16x128xbf16>
    tpu.vector_store %arg7[%c0_6, %c0_7], %10 {strides = array<i32>} : memref<16x128xbf16, #tpu.memory_space<vmem>>, vector<16x128xbf16>,
    return
  }
  func.func @transform_0(%arg0: i32, %arg1: i32) -> (i32, i32) {
    %c0_i32 = arith.constant 0 : i32
    %c0_i32_0 = arith.constant 0 : i32
    return %arg0, %c0_i32 : i32, i32
  }
  func.func @transform_1(%arg0: i32, %arg1: i32) -> (i32, i32) {
    %c0_i32 = arith.constant 0 : i32
    %c0_i32_0 = arith.constant 0 : i32
    %c0_i32_1 = arith.constant 0 : i32
    return %c0_i32, %c0_i32_0 : i32, i32
  }
  func.func @transform_2(%arg0: i32, %arg1: i32) -> (i32, i32) {
    %c0_i32 = arith.constant 0 : i32
    %c0_i32_0 = arith.constant 0 : i32
    %c0_i32_1 = arith.constant 0 : i32
    return %c0_i32, %c0_i32_0 : i32, i32
  }
  func.func @transform_3(%arg0: i32, %arg1: i32) -> (i32, i32) {
    %c0_i32 = arith.constant 0 : i32
    %c0_i32_0 = arith.constant 0 : i32
    return %c0_i32, %arg1 : i32, i32
  }
  func.func @transform_4(%arg0: i32, %arg1: i32) -> (i32, i32) {
    %c0_i32 = arith.constant 0 : i32
    %c0_i32_0 = arith.constant 0 : i32
    return %c0_i32, %arg1 : i32, i32
  }
  func.func @transform_5(%arg0: i32, %arg1: i32) -> (i32, i32) {
    %c0_i32 = arith.constant 0 : i32
    return %arg0, %arg1 : i32, i32
  }
}

module attributes {stable_mosaic.version = 11 : i64} {
  func.func @_attention_kernel(%arg0: i32, %arg1: memref<1x8x128xbf16, #tpu.memory_space<vmem>>, %arg2: memref<1x8x128xbf16, #tpu.memory_space<vmem>>, %arg3: memref<1x8x128xbf16, #tpu.memory_space<vmem>>, %arg4: memref<1x8x128xbf16, #tpu.memory_space<vmem>>) attributes {dimension_semantics = [#tpu.dimension_semantics<parallel>], iteration_bounds = array<i64: 2>, scalar_prefetch = 0 : i64, scratch_operands = 0 : i64, tpu.core_type = #tpu.core_type<tc>, window_params = [{transform_indices = @transform_0, window_bounds = array<i64: 1, 8, 128>}, {transform_indices = @transform_1, window_bounds = array<i64: 1, 8, 128>}, {transform_indices = @transform_2, window_bounds = array<i64: 1, 8, 128>}, {transform_indices = @transform_3, window_bounds = array<i64: 1, 8, 128>}]} {
    %c0 = arith.constant 0 : index
    %c0_0 = arith.constant 0 : index
    %c0_1 = arith.constant 0 : index
    %0 = vector.load %arg1[%c0, %c0_0, %c0_1] : memref<1x8x128xbf16, #tpu.memory_space<vmem>>, vector<1x8x128xbf16>
    %1 = vector.shape_cast %0 : vector<1x8x128xbf16> to vector<8x128xbf16>
    %c0_2 = arith.constant 0 : index
    %c0_3 = arith.constant 0 : index
    %c0_4 = arith.constant 0 : index
    %2 = vector.load %arg2[%c0_2, %c0_3, %c0_4] : memref<1x8x128xbf16, #tpu.memory_space<vmem>>, vector<1x8x128xbf16>
    %3 = vector.shape_cast %2 : vector<1x8x128xbf16> to vector<8x128xbf16>
    %c0_5 = arith.constant 0 : index
    %c0_6 = arith.constant 0 : index
    %c0_7 = arith.constant 0 : index
    %4 = vector.load %arg3[%c0_5, %c0_6, %c0_7] : memref<1x8x128xbf16, #tpu.memory_space<vmem>>, vector<1x8x128xbf16>
    %5 = vector.shape_cast %4 : vector<1x8x128xbf16> to vector<8x128xbf16>
    %6 = tpu.iota {dimensions = array<i32: 0>} : vector<8x8xi32>
    %7 = tpu.iota {dimensions = array<i32: 1>} : vector<8x8xi32>
    %8 = arith.cmpi sgt, %7, %6 : vector<8x8xi32>
    %cst = arith.constant -1.000000e+30 : f32
    %cst_8 = arith.constant 0.000000e+00 : f32
    %9 = vector.broadcast %cst : f32 to vector<8x8xf32>
    %10 = vector.broadcast %cst_8 : f32 to vector<8x8xf32>
    %11 = arith.select %8, %9, %10 : vector<8x8xi1>, vector<8x8xf32>
    %12 = vector.extract_strided_slice %1 {offsets = [0, 0], sizes = [8, 32], strides = [1, 1]} : vector<8x128xbf16> to vector<8x32xbf16>
    %13 = vector.extract_strided_slice %3 {offsets = [0, 0], sizes = [8, 32], strides = [1, 1]} : vector<8x128xbf16> to vector<8x32xbf16>
    %14 = vector.extract_strided_slice %5 {offsets = [0, 0], sizes = [8, 32], strides = [1, 1]} : vector<8x128xbf16> to vector<8x32xbf16>
    %cst_9 = arith.constant dense<0.000000e+00> : vector<8x8xf32>
    %15 = tpu.matmul %12, %13, %cst_9 {dimension_numbers = #tpu.dot_dimension_numbers<[1], [1], [0], [0], [0, 0, 1, 0], [], []>} : vector<8x32xbf16>, vector<8x32xbf16>, vector<8x8xf32> -> vector<8x8xf32>
    %cst_10 = arith.constant 0.176776692 : f32
    %16 = vector.broadcast %cst_10 : f32 to vector<8x8xf32>
    %17 = arith.mulf %15, %16 : vector<8x8xf32>
    %18 = arith.addf %17, %11 : vector<8x8xf32>
    %cst_11 = arith.constant dense<0xFF800000> : vector<8xf32>
    %19 = vector.multi_reduction <maximumf>, %18, %cst_11 [1] : vector<8x8xf32> to vector<8xf32>
    %20 = vector.shape_cast %19 : vector<8xf32> to vector<8x1xf32>
    %21 = vector.broadcast %20 : vector<8x1xf32> to vector<8x8xf32>
    %22 = arith.subf %18, %21 : vector<8x8xf32>
    %23 = math.exp %22 : vector<8x8xf32>
    %cst_12 = arith.constant dense<0.000000e+00> : vector<8xf32>
    %24 = vector.multi_reduction <add>, %23, %cst_12 [1] : vector<8x8xf32> to vector<8xf32>
    %25 = vector.shape_cast %24 : vector<8xf32> to vector<8x1xf32>
    %26 = tpu.reciprocal %25 {approx = true} : vector<8x1xf32> -> vector<8x1xf32>
    %27 = vector.broadcast %26 : vector<8x1xf32> to vector<8x8xf32>
    %28 = arith.mulf %23, %27 : vector<8x8xf32>
    %29 = arith.truncf %28 : vector<8x8xf32> to vector<8x8xbf16>
    %cst_13 = arith.constant dense<0.000000e+00> : vector<8x32xf32>
    %30 = tpu.matmul %29, %14, %cst_13 {dimension_numbers = #tpu.dot_dimension_numbers<[1], [0], [0], [1], [0, 0, 1, 1], [], []>} : vector<8x8xbf16>, vector<8x32xbf16>, vector<8x32xf32> -> vector<8x32xf32>
    %31 = vector.extract_strided_slice %1 {offsets = [0, 32], sizes = [8, 32], strides = [1, 1]} : vector<8x128xbf16> to vector<8x32xbf16>
    %32 = vector.extract_strided_slice %3 {offsets = [0, 32], sizes = [8, 32], strides = [1, 1]} : vector<8x128xbf16> to vector<8x32xbf16>
    %33 = vector.extract_strided_slice %5 {offsets = [0, 32], sizes = [8, 32], strides = [1, 1]} : vector<8x128xbf16> to vector<8x32xbf16>
    %cst_14 = arith.constant dense<0.000000e+00> : vector<8x8xf32>
    %34 = tpu.matmul %31, %32, %cst_14 {dimension_numbers = #tpu.dot_dimension_numbers<[1], [1], [0], [0], [0, 0, 1, 0], [], []>} : vector<8x32xbf16>, vector<8x32xbf16>, vector<8x8xf32> -> vector<8x8xf32>
    %cst_15 = arith.constant 0.176776692 : f32
    %35 = vector.broadcast %cst_15 : f32 to vector<8x8xf32>
    %36 = arith.mulf %34, %35 : vector<8x8xf32>
    %37 = arith.addf %36, %11 : vector<8x8xf32>
    %cst_16 = arith.constant dense<0xFF800000> : vector<8xf32>
    %38 = vector.multi_reduction <maximumf>, %37, %cst_16 [1] : vector<8x8xf32> to vector<8xf32>
    %39 = vector.shape_cast %38 : vector<8xf32> to vector<8x1xf32>
    %40 = vector.broadcast %39 : vector<8x1xf32> to vector<8x8xf32>
    %41 = arith.subf %37, %40 : vector<8x8xf32>
    %42 = math.exp %41 : vector<8x8xf32>
    %cst_17 = arith.constant dense<0.000000e+00> : vector<8xf32>
    %43 = vector.multi_reduction <add>, %42, %cst_17 [1] : vector<8x8xf32> to vector<8xf32>
    %44 = vector.shape_cast %43 : vector<8xf32> to vector<8x1xf32>
    %45 = tpu.reciprocal %44 {approx = true} : vector<8x1xf32> -> vector<8x1xf32>
    %46 = vector.broadcast %45 : vector<8x1xf32> to vector<8x8xf32>
    %47 = arith.mulf %42, %46 : vector<8x8xf32>
    %48 = arith.truncf %47 : vector<8x8xf32> to vector<8x8xbf16>
    %cst_18 = arith.constant dense<0.000000e+00> : vector<8x32xf32>
    %49 = tpu.matmul %48, %33, %cst_18 {dimension_numbers = #tpu.dot_dimension_numbers<[1], [0], [0], [1], [0, 0, 1, 1], [], []>} : vector<8x8xbf16>, vector<8x32xbf16>, vector<8x32xf32> -> vector<8x32xf32>
    %50 = vector.extract_strided_slice %1 {offsets = [0, 64], sizes = [8, 32], strides = [1, 1]} : vector<8x128xbf16> to vector<8x32xbf16>
    %51 = vector.extract_strided_slice %3 {offsets = [0, 64], sizes = [8, 32], strides = [1, 1]} : vector<8x128xbf16> to vector<8x32xbf16>
    %52 = vector.extract_strided_slice %5 {offsets = [0, 64], sizes = [8, 32], strides = [1, 1]} : vector<8x128xbf16> to vector<8x32xbf16>
    %cst_19 = arith.constant dense<0.000000e+00> : vector<8x8xf32>
    %53 = tpu.matmul %50, %51, %cst_19 {dimension_numbers = #tpu.dot_dimension_numbers<[1], [1], [0], [0], [0, 0, 1, 0], [], []>} : vector<8x32xbf16>, vector<8x32xbf16>, vector<8x8xf32> -> vector<8x8xf32>
    %cst_20 = arith.constant 0.176776692 : f32
    %54 = vector.broadcast %cst_20 : f32 to vector<8x8xf32>
    %55 = arith.mulf %53, %54 : vector<8x8xf32>
    %56 = arith.addf %55, %11 : vector<8x8xf32>
    %cst_21 = arith.constant dense<0xFF800000> : vector<8xf32>
    %57 = vector.multi_reduction <maximumf>, %56, %cst_21 [1] : vector<8x8xf32> to vector<8xf32>
    %58 = vector.shape_cast %57 : vector<8xf32> to vector<8x1xf32>
    %59 = vector.broadcast %58 : vector<8x1xf32> to vector<8x8xf32>
    %60 = arith.subf %56, %59 : vector<8x8xf32>
    %61 = math.exp %60 : vector<8x8xf32>
    %cst_22 = arith.constant dense<0.000000e+00> : vector<8xf32>
    %62 = vector.multi_reduction <add>, %61, %cst_22 [1] : vector<8x8xf32> to vector<8xf32>
    %63 = vector.shape_cast %62 : vector<8xf32> to vector<8x1xf32>
    %64 = tpu.reciprocal %63 {approx = true} : vector<8x1xf32> -> vector<8x1xf32>
    %65 = vector.broadcast %64 : vector<8x1xf32> to vector<8x8xf32>
    %66 = arith.mulf %61, %65 : vector<8x8xf32>
    %67 = arith.truncf %66 : vector<8x8xf32> to vector<8x8xbf16>
    %cst_23 = arith.constant dense<0.000000e+00> : vector<8x32xf32>
    %68 = tpu.matmul %67, %52, %cst_23 {dimension_numbers = #tpu.dot_dimension_numbers<[1], [0], [0], [1], [0, 0, 1, 1], [], []>} : vector<8x8xbf16>, vector<8x32xbf16>, vector<8x32xf32> -> vector<8x32xf32>
    %69 = vector.extract_strided_slice %1 {offsets = [0, 96], sizes = [8, 32], strides = [1, 1]} : vector<8x128xbf16> to vector<8x32xbf16>
    %70 = vector.extract_strided_slice %3 {offsets = [0, 96], sizes = [8, 32], strides = [1, 1]} : vector<8x128xbf16> to vector<8x32xbf16>
    %71 = vector.extract_strided_slice %5 {offsets = [0, 96], sizes = [8, 32], strides = [1, 1]} : vector<8x128xbf16> to vector<8x32xbf16>
    %cst_24 = arith.constant dense<0.000000e+00> : vector<8x8xf32>
    %72 = tpu.matmul %69, %70, %cst_24 {dimension_numbers = #tpu.dot_dimension_numbers<[1], [1], [0], [0], [0, 0, 1, 0], [], []>} : vector<8x32xbf16>, vector<8x32xbf16>, vector<8x8xf32> -> vector<8x8xf32>
    %cst_25 = arith.constant 0.176776692 : f32
    %73 = vector.broadcast %cst_25 : f32 to vector<8x8xf32>
    %74 = arith.mulf %72, %73 : vector<8x8xf32>
    %75 = arith.addf %74, %11 : vector<8x8xf32>
    %cst_26 = arith.constant dense<0xFF800000> : vector<8xf32>
    %76 = vector.multi_reduction <maximumf>, %75, %cst_26 [1] : vector<8x8xf32> to vector<8xf32>
    %77 = vector.shape_cast %76 : vector<8xf32> to vector<8x1xf32>
    %78 = vector.broadcast %77 : vector<8x1xf32> to vector<8x8xf32>
    %79 = arith.subf %75, %78 : vector<8x8xf32>
    %80 = math.exp %79 : vector<8x8xf32>
    %cst_27 = arith.constant dense<0.000000e+00> : vector<8xf32>
    %81 = vector.multi_reduction <add>, %80, %cst_27 [1] : vector<8x8xf32> to vector<8xf32>
    %82 = vector.shape_cast %81 : vector<8xf32> to vector<8x1xf32>
    %83 = tpu.reciprocal %82 {approx = true} : vector<8x1xf32> -> vector<8x1xf32>
    %84 = vector.broadcast %83 : vector<8x1xf32> to vector<8x8xf32>
    %85 = arith.mulf %80, %84 : vector<8x8xf32>
    %86 = arith.truncf %85 : vector<8x8xf32> to vector<8x8xbf16>
    %cst_28 = arith.constant dense<0.000000e+00> : vector<8x32xf32>
    %87 = tpu.matmul %86, %71, %cst_28 {dimension_numbers = #tpu.dot_dimension_numbers<[1], [0], [0], [1], [0, 0, 1, 1], [], []>} : vector<8x8xbf16>, vector<8x32xbf16>, vector<8x32xf32> -> vector<8x32xf32>
    %88 = tpu.concatenate %30, %49, %68, %87 in 1 : vector<8x32xf32>, vector<8x32xf32>, vector<8x32xf32>, vector<8x32xf32> -> vector<8x128xf32>
    %89 = arith.truncf %88 : vector<8x128xf32> to vector<8x128xbf16>
    %c0_29 = arith.constant 0 : index
    %c0_30 = arith.constant 0 : index
    %c0_31 = arith.constant 0 : index
    %90 = vector.load %arg4[%c0_29, %c0_30, %c0_31] : memref<1x8x128xbf16, #tpu.memory_space<vmem>>, vector<1x8x128xbf16>
    %91 = vector.shape_cast %90 : vector<1x8x128xbf16> to vector<8x128xbf16>
    %92 = vector.shape_cast %89 : vector<8x128xbf16> to vector<1x8x128xbf16>
    tpu.vector_store %arg4[%c0_29, %c0_30, %c0_31], %92 {strides = array<i32>} : memref<1x8x128xbf16, #tpu.memory_space<vmem>>, vector<1x8x128xbf16>,
    return
  }
  func.func @transform_0(%arg0: i32) -> (i32, i32, i32) {
    %c0_i32 = arith.constant 0 : i32
    %c0_i32_0 = arith.constant 0 : i32
    %c0_i32_1 = arith.constant 0 : i32
    return %arg0, %c0_i32, %c0_i32_0 : i32, i32, i32
  }
  func.func @transform_1(%arg0: i32) -> (i32, i32, i32) {
    %c0_i32 = arith.constant 0 : i32
    %c1_i32 = arith.constant 1 : i32
    %c0_i32_0 = arith.constant 0 : i32
    return %arg0, %c0_i32, %c1_i32 : i32, i32, i32
  }
  func.func @transform_2(%arg0: i32) -> (i32, i32, i32) {
    %c0_i32 = arith.constant 0 : i32
    %c2_i32 = arith.constant 2 : i32
    %c0_i32_0 = arith.constant 0 : i32
    return %arg0, %c0_i32, %c2_i32 : i32, i32, i32
  }
  func.func @transform_3(%arg0: i32) -> (i32, i32, i32) {
    %c0_i32 = arith.constant 0 : i32
    %c0_i32_0 = arith.constant 0 : i32
    %c0_i32_1 = arith.constant 0 : i32
    return %arg0, %c0_i32, %c0_i32_0 : i32, i32, i32
  }
}

module attributes {stable_mosaic.version = 11 : i64} {
  func.func @_linear_residual_kernel(%arg0: i32, %arg1: i32, %arg2: memref<16x128xbf16, #tpu.memory_space<vmem>>, %arg3: memref<128x128xbf16, #tpu.memory_space<vmem>>, %arg4: memref<1x128xf32, #tpu.memory_space<vmem>>, %arg5: memref<16x128xf32, #tpu.memory_space<vmem>>, %arg6: memref<16x128xf32, #tpu.memory_space<vmem>>) attributes {dimension_semantics = [#tpu.dimension_semantics<parallel>, #tpu.dimension_semantics<parallel>], iteration_bounds = array<i64: 1, 1>, scalar_prefetch = 0 : i64, scratch_operands = 0 : i64, tpu.core_type = #tpu.core_type<tc>, window_params = [{transform_indices = @transform_0, window_bounds = array<i64: 16, 128>}, {transform_indices = @transform_1, window_bounds = array<i64: 128, 128>}, {transform_indices = @transform_2, window_bounds = array<i64: 1, 128>}, {transform_indices = @transform_3, window_bounds = array<i64: 16, 128>}, {transform_indices = @transform_4, window_bounds = array<i64: 16, 128>}]} {
    %c0 = arith.constant 0 : index
    %c0_0 = arith.constant 0 : index
    %0 = vector.load %arg2[%c0, %c0_0] : memref<16x128xbf16, #tpu.memory_space<vmem>>, vector<16x128xbf16>
    %c0_1 = arith.constant 0 : index
    %c0_2 = arith.constant 0 : index
    %1 = vector.load %arg3[%c0_1, %c0_2] : memref<128x128xbf16, #tpu.memory_space<vmem>>, vector<128x128xbf16>
    %cst = arith.constant dense<0.000000e+00> : vector<16x128xf32>
    %2 = tpu.matmul %0, %1, %cst {dimension_numbers = #tpu.dot_dimension_numbers<[1], [0], [0], [1], [0, 0, 1, 1], [], []>} : vector<16x128xbf16>, vector<128x128xbf16>, vector<16x128xf32> -> vector<16x128xf32>
    %c0_3 = arith.constant 0 : index
    %c0_4 = arith.constant 0 : index
    %3 = vector.load %arg5[%c0_3, %c0_4] : memref<16x128xf32, #tpu.memory_space<vmem>>, vector<16x128xf32>
    %4 = arith.addf %3, %2 : vector<16x128xf32>
    %c0_5 = arith.constant 0 : index
    %c0_6 = arith.constant 0 : index
    %5 = vector.load %arg4[%c0_5, %c0_6] : memref<1x128xf32, #tpu.memory_space<vmem>>, vector<1x128xf32>
    %6 = vector.broadcast %5 : vector<1x128xf32> to vector<16x128xf32>
    %7 = arith.addf %4, %6 : vector<16x128xf32>
    %c0_7 = arith.constant 0 : index
    %c0_8 = arith.constant 0 : index
    %8 = vector.load %arg6[%c0_7, %c0_8] : memref<16x128xf32, #tpu.memory_space<vmem>>, vector<16x128xf32>
    tpu.vector_store %arg6[%c0_7, %c0_8], %7 {strides = array<i32>} : memref<16x128xf32, #tpu.memory_space<vmem>>, vector<16x128xf32>,
    return
  }
  func.func @transform_0(%arg0: i32, %arg1: i32) -> (i32, i32) {
    %c0_i32 = arith.constant 0 : i32
    %c0_i32_0 = arith.constant 0 : i32
    return %arg0, %c0_i32 : i32, i32
  }
  func.func @transform_1(%arg0: i32, %arg1: i32) -> (i32, i32) {
    %c0_i32 = arith.constant 0 : i32
    %c0_i32_0 = arith.constant 0 : i32
    return %c0_i32, %arg1 : i32, i32
  }
  func.func @transform_2(%arg0: i32, %arg1: i32) -> (i32, i32) {
    %c0_i32 = arith.constant 0 : i32
    %c0_i32_0 = arith.constant 0 : i32
    return %c0_i32, %arg1 : i32, i32
  }
  func.func @transform_3(%arg0: i32, %arg1: i32) -> (i32, i32) {
    %c0_i32 = arith.constant 0 : i32
    return %arg0, %arg1 : i32, i32
  }
  func.func @transform_4(%arg0: i32, %arg1: i32) -> (i32, i32) {
    %c0_i32 = arith.constant 0 : i32
    return %arg0, %arg1 : i32, i32
  }
}

module attributes {stable_mosaic.version = 11 : i64} {
  func.func @_ln_linear_kernel(%arg0: i32, %arg1: i32, %arg2: memref<16x128xf32, #tpu.memory_space<vmem>>, %arg3: memref<1x128xf32, #tpu.memory_space<vmem>>, %arg4: memref<1x128xf32, #tpu.memory_space<vmem>>, %arg5: memref<128x128xbf16, #tpu.memory_space<vmem>>, %arg6: memref<1x128xf32, #tpu.memory_space<vmem>>, %arg7: memref<16x128xbf16, #tpu.memory_space<vmem>>, %arg8: memref<16x128xf32, #tpu.memory_space<vmem>>) attributes {dimension_semantics = [#tpu.dimension_semantics<parallel>, #tpu.dimension_semantics<arbitrary>], iteration_bounds = array<i64: 1, 1>, scalar_prefetch = 0 : i64, scratch_operands = 1 : i64, tpu.core_type = #tpu.core_type<tc>, window_params = [{transform_indices = @transform_0, window_bounds = array<i64: 16, 128>}, {pipeline_mode = #tpu.pipeline_mode<synchronous>, transform_indices = @transform_1, window_bounds = array<i64: 1, 128>}, {pipeline_mode = #tpu.pipeline_mode<synchronous>, transform_indices = @transform_2, window_bounds = array<i64: 1, 128>}, {transform_indices = @transform_3, window_bounds = array<i64: 128, 128>}, {transform_indices = @transform_4, window_bounds = array<i64: 1, 128>}, {transform_indices = @transform_5, window_bounds = array<i64: 16, 128>}]} {
    %c0_i32 = arith.constant 0 : i32
    %0 = arith.cmpi eq, %arg1, %c0_i32 : i32
    %1 = arith.extui %0 : i1 to i32
    %c0_i32_0 = arith.constant 0 : i32
    %2 = arith.cmpi ne, %1, %c0_i32_0 : i32
    scf.if %2 {
      %c0_8 = arith.constant 0 : index
      %c0_9 = arith.constant 0 : index
      %12 = vector.load %arg2[%c0_8, %c0_9] : memref<16x128xf32, #tpu.memory_space<vmem>>, vector<16x128xf32>
      %cst_10 = arith.constant dense<0.000000e+00> : vector<16xf32>
      %13 = vector.multi_reduction <add>, %12, %cst_10 [1] : vector<16x128xf32> to vector<16xf32>
      %14 = vector.shape_cast %13 : vector<16xf32> to vector<16x1xf32>
      %cst_11 = arith.constant 1.280000e+02 : f32
      %15 = vector.broadcast %cst_11 : f32 to vector<16x1xf32>
      %16 = arith.divf %14, %15 : vector<16x1xf32>
      %17 = vector.broadcast %16 : vector<16x1xf32> to vector<16x128xf32>
      %18 = arith.subf %12, %17 : vector<16x128xf32>
      %19 = arith.mulf %18, %18 : vector<16x128xf32>
      %cst_12 = arith.constant dense<0.000000e+00> : vector<16xf32>
      %20 = vector.multi_reduction <add>, %19, %cst_12 [1] : vector<16x128xf32> to vector<16xf32>
      %21 = vector.shape_cast %20 : vector<16xf32> to vector<16x1xf32>
      %cst_13 = arith.constant 1.280000e+02 : f32
      %22 = vector.broadcast %cst_13 : f32 to vector<16x1xf32>
      %23 = arith.divf %21, %22 : vector<16x1xf32>
      %24 = vector.broadcast %16 : vector<16x1xf32> to vector<16x128xf32>
      %25 = arith.subf %12, %24 : vector<16x128xf32>
      %cst_14 = arith.constant 9.99999974E-6 : f32
      %26 = vector.broadcast %cst_14 : f32 to vector<16x1xf32>
      %27 = arith.addf %23, %26 : vector<16x1xf32>
      %28 = math.rsqrt %27 : vector<16x1xf32>
      %29 = vector.broadcast %28 : vector<16x1xf32> to vector<16x128xf32>
      %30 = arith.mulf %25, %29 : vector<16x128xf32>
      %c0_15 = arith.constant 0 : index
      %c0_16 = arith.constant 0 : index
      %31 = vector.load %arg3[%c0_15, %c0_16] : memref<1x128xf32, #tpu.memory_space<vmem>>, vector<1x128xf32>
      %32 = vector.broadcast %31 : vector<1x128xf32> to vector<16x128xf32>
      %33 = arith.mulf %30, %32 : vector<16x128xf32>
      %c0_17 = arith.constant 0 : index
      %c0_18 = arith.constant 0 : index
      %34 = vector.load %arg4[%c0_17, %c0_18] : memref<1x128xf32, #tpu.memory_space<vmem>>, vector<1x128xf32>
      %35 = vector.broadcast %34 : vector<1x128xf32> to vector<16x128xf32>
      %36 = arith.addf %33, %35 : vector<16x128xf32>
      %c0_19 = arith.constant 0 : index
      %c0_20 = arith.constant 0 : index
      %37 = vector.load %arg8[%c0_19, %c0_20] : memref<16x128xf32, #tpu.memory_space<vmem>>, vector<16x128xf32>
      tpu.vector_store %arg8[%c0_19, %c0_20], %36 {strides = array<i32>} : memref<16x128xf32, #tpu.memory_space<vmem>>, vector<16x128xf32>,
    } else {
    }
    %c0 = arith.constant 0 : index
    %c0_1 = arith.constant 0 : index
    %3 = vector.load %arg8[%c0, %c0_1] : memref<16x128xf32, #tpu.memory_space<vmem>>, vector<16x128xf32>
    %4 = arith.truncf %3 : vector<16x128xf32> to vector<16x128xbf16>
    %c0_2 = arith.constant 0 : index
    %c0_3 = arith.constant 0 : index
    %5 = vector.load %arg5[%c0_2, %c0_3] : memref<128x128xbf16, #tpu.memory_space<vmem>>, vector<128x128xbf16>
    %cst = arith.constant dense<0.000000e+00> : vector<16x128xf32>
    %6 = tpu.matmul %4, %5, %cst {dimension_numbers = #tpu.dot_dimension_numbers<[1], [0], [0], [1], [0, 0, 1, 1], [], []>} : vector<16x128xbf16>, vector<128x128xbf16>, vector<16x128xf32> -> vector<16x128xf32>
    %c0_4 = arith.constant 0 : index
    %c0_5 = arith.constant 0 : index
    %7 = vector.load %arg6[%c0_4, %c0_5] : memref<1x128xf32, #tpu.memory_space<vmem>>, vector<1x128xf32>
    %8 = vector.broadcast %7 : vector<1x128xf32> to vector<16x128xf32>
    %9 = arith.addf %6, %8 : vector<16x128xf32>
    %10 = arith.truncf %9 : vector<16x128xf32> to vector<16x128xbf16>
    %c0_6 = arith.constant 0 : index
    %c0_7 = arith.constant 0 : index
    %11 = vector.load %arg7[%c0_6, %c0_7] : memref<16x128xbf16, #tpu.memory_space<vmem>>, vector<16x128xbf16>
    tpu.vector_store %arg7[%c0_6, %c0_7], %10 {strides = array<i32>} : memref<16x128xbf16, #tpu.memory_space<vmem>>, vector<16x128xbf16>,
    return
  }
  func.func @transform_0(%arg0: i32, %arg1: i32) -> (i32, i32) {
    %c0_i32 = arith.constant 0 : i32
    %c0_i32_0 = arith.constant 0 : i32
    return %arg0, %c0_i32 : i32, i32
  }
  func.func @transform_1(%arg0: i32, %arg1: i32) -> (i32, i32) {
    %c0_i32 = arith.constant 0 : i32
    %c0_i32_0 = arith.constant 0 : i32
    %c0_i32_1 = arith.constant 0 : i32
    return %c0_i32, %c0_i32_0 : i32, i32
  }
  func.func @transform_2(%arg0: i32, %arg1: i32) -> (i32, i32) {
    %c0_i32 = arith.constant 0 : i32
    %c0_i32_0 = arith.constant 0 : i32
    %c0_i32_1 = arith.constant 0 : i32
    return %c0_i32, %c0_i32_0 : i32, i32
  }
  func.func @transform_3(%arg0: i32, %arg1: i32) -> (i32, i32) {
    %c0_i32 = arith.constant 0 : i32
    %c0_i32_0 = arith.constant 0 : i32
    return %c0_i32, %arg1 : i32, i32
  }
  func.func @transform_4(%arg0: i32, %arg1: i32) -> (i32, i32) {
    %c0_i32 = arith.constant 0 : i32
    %c0_i32_0 = arith.constant 0 : i32
    return %c0_i32, %arg1 : i32, i32
  }
  func.func @transform_5(%arg0: i32, %arg1: i32) -> (i32, i32) {
    %c0_i32 = arith.constant 0 : i32
    return %arg0, %arg1 : i32, i32
  }
}

module attributes {stable_mosaic.version = 11 : i64} {
  func.func @_attention_kernel(%arg0: i32, %arg1: memref<1x8x128xbf16, #tpu.memory_space<vmem>>, %arg2: memref<1x8x128xbf16, #tpu.memory_space<vmem>>, %arg3: memref<1x8x128xbf16, #tpu.memory_space<vmem>>, %arg4: memref<1x8x128xbf16, #tpu.memory_space<vmem>>) attributes {dimension_semantics = [#tpu.dimension_semantics<parallel>], iteration_bounds = array<i64: 2>, scalar_prefetch = 0 : i64, scratch_operands = 0 : i64, tpu.core_type = #tpu.core_type<tc>, window_params = [{transform_indices = @transform_0, window_bounds = array<i64: 1, 8, 128>}, {transform_indices = @transform_1, window_bounds = array<i64: 1, 8, 128>}, {transform_indices = @transform_2, window_bounds = array<i64: 1, 8, 128>}, {transform_indices = @transform_3, window_bounds = array<i64: 1, 8, 128>}]} {
    %c0 = arith.constant 0 : index
    %c0_0 = arith.constant 0 : index
    %c0_1 = arith.constant 0 : index
    %0 = vector.load %arg1[%c0, %c0_0, %c0_1] : memref<1x8x128xbf16, #tpu.memory_space<vmem>>, vector<1x8x128xbf16>
    %1 = vector.shape_cast %0 : vector<1x8x128xbf16> to vector<8x128xbf16>
    %c0_2 = arith.constant 0 : index
    %c0_3 = arith.constant 0 : index
    %c0_4 = arith.constant 0 : index
    %2 = vector.load %arg2[%c0_2, %c0_3, %c0_4] : memref<1x8x128xbf16, #tpu.memory_space<vmem>>, vector<1x8x128xbf16>
    %3 = vector.shape_cast %2 : vector<1x8x128xbf16> to vector<8x128xbf16>
    %c0_5 = arith.constant 0 : index
    %c0_6 = arith.constant 0 : index
    %c0_7 = arith.constant 0 : index
    %4 = vector.load %arg3[%c0_5, %c0_6, %c0_7] : memref<1x8x128xbf16, #tpu.memory_space<vmem>>, vector<1x8x128xbf16>
    %5 = vector.shape_cast %4 : vector<1x8x128xbf16> to vector<8x128xbf16>
    %6 = vector.extract_strided_slice %1 {offsets = [0, 0], sizes = [8, 32], strides = [1, 1]} : vector<8x128xbf16> to vector<8x32xbf16>
    %7 = vector.extract_strided_slice %3 {offsets = [0, 0], sizes = [8, 32], strides = [1, 1]} : vector<8x128xbf16> to vector<8x32xbf16>
    %8 = vector.extract_strided_slice %5 {offsets = [0, 0], sizes = [8, 32], strides = [1, 1]} : vector<8x128xbf16> to vector<8x32xbf16>
    %cst = arith.constant dense<0.000000e+00> : vector<8x8xf32>
    %9 = tpu.matmul %6, %7, %cst {dimension_numbers = #tpu.dot_dimension_numbers<[1], [1], [0], [0], [0, 0, 1, 0], [], []>} : vector<8x32xbf16>, vector<8x32xbf16>, vector<8x8xf32> -> vector<8x8xf32>
    %cst_8 = arith.constant 0.176776692 : f32
    %10 = vector.broadcast %cst_8 : f32 to vector<8x8xf32>
    %11 = arith.mulf %9, %10 : vector<8x8xf32>
    %cst_9 = arith.constant dense<0xFF800000> : vector<8xf32>
    %12 = vector.multi_reduction <maximumf>, %11, %cst_9 [1] : vector<8x8xf32> to vector<8xf32>
    %13 = vector.shape_cast %12 : vector<8xf32> to vector<8x1xf32>
    %14 = vector.broadcast %13 : vector<8x1xf32> to vector<8x8xf32>
    %15 = arith.subf %11, %14 : vector<8x8xf32>
    %16 = math.exp %15 : vector<8x8xf32>
    %cst_10 = arith.constant dense<0.000000e+00> : vector<8xf32>
    %17 = vector.multi_reduction <add>, %16, %cst_10 [1] : vector<8x8xf32> to vector<8xf32>
    %18 = vector.shape_cast %17 : vector<8xf32> to vector<8x1xf32>
    %19 = tpu.reciprocal %18 {approx = true} : vector<8x1xf32> -> vector<8x1xf32>
    %20 = vector.broadcast %19 : vector<8x1xf32> to vector<8x8xf32>
    %21 = arith.mulf %16, %20 : vector<8x8xf32>
    %22 = arith.truncf %21 : vector<8x8xf32> to vector<8x8xbf16>
    %cst_11 = arith.constant dense<0.000000e+00> : vector<8x32xf32>
    %23 = tpu.matmul %22, %8, %cst_11 {dimension_numbers = #tpu.dot_dimension_numbers<[1], [0], [0], [1], [0, 0, 1, 1], [], []>} : vector<8x8xbf16>, vector<8x32xbf16>, vector<8x32xf32> -> vector<8x32xf32>
    %24 = vector.extract_strided_slice %1 {offsets = [0, 32], sizes = [8, 32], strides = [1, 1]} : vector<8x128xbf16> to vector<8x32xbf16>
    %25 = vector.extract_strided_slice %3 {offsets = [0, 32], sizes = [8, 32], strides = [1, 1]} : vector<8x128xbf16> to vector<8x32xbf16>
    %26 = vector.extract_strided_slice %5 {offsets = [0, 32], sizes = [8, 32], strides = [1, 1]} : vector<8x128xbf16> to vector<8x32xbf16>
    %cst_12 = arith.constant dense<0.000000e+00> : vector<8x8xf32>
    %27 = tpu.matmul %24, %25, %cst_12 {dimension_numbers = #tpu.dot_dimension_numbers<[1], [1], [0], [0], [0, 0, 1, 0], [], []>} : vector<8x32xbf16>, vector<8x32xbf16>, vector<8x8xf32> -> vector<8x8xf32>
    %cst_13 = arith.constant 0.176776692 : f32
    %28 = vector.broadcast %cst_13 : f32 to vector<8x8xf32>
    %29 = arith.mulf %27, %28 : vector<8x8xf32>
    %cst_14 = arith.constant dense<0xFF800000> : vector<8xf32>
    %30 = vector.multi_reduction <maximumf>, %29, %cst_14 [1] : vector<8x8xf32> to vector<8xf32>
    %31 = vector.shape_cast %30 : vector<8xf32> to vector<8x1xf32>
    %32 = vector.broadcast %31 : vector<8x1xf32> to vector<8x8xf32>
    %33 = arith.subf %29, %32 : vector<8x8xf32>
    %34 = math.exp %33 : vector<8x8xf32>
    %cst_15 = arith.constant dense<0.000000e+00> : vector<8xf32>
    %35 = vector.multi_reduction <add>, %34, %cst_15 [1] : vector<8x8xf32> to vector<8xf32>
    %36 = vector.shape_cast %35 : vector<8xf32> to vector<8x1xf32>
    %37 = tpu.reciprocal %36 {approx = true} : vector<8x1xf32> -> vector<8x1xf32>
    %38 = vector.broadcast %37 : vector<8x1xf32> to vector<8x8xf32>
    %39 = arith.mulf %34, %38 : vector<8x8xf32>
    %40 = arith.truncf %39 : vector<8x8xf32> to vector<8x8xbf16>
    %cst_16 = arith.constant dense<0.000000e+00> : vector<8x32xf32>
    %41 = tpu.matmul %40, %26, %cst_16 {dimension_numbers = #tpu.dot_dimension_numbers<[1], [0], [0], [1], [0, 0, 1, 1], [], []>} : vector<8x8xbf16>, vector<8x32xbf16>, vector<8x32xf32> -> vector<8x32xf32>
    %42 = vector.extract_strided_slice %1 {offsets = [0, 64], sizes = [8, 32], strides = [1, 1]} : vector<8x128xbf16> to vector<8x32xbf16>
    %43 = vector.extract_strided_slice %3 {offsets = [0, 64], sizes = [8, 32], strides = [1, 1]} : vector<8x128xbf16> to vector<8x32xbf16>
    %44 = vector.extract_strided_slice %5 {offsets = [0, 64], sizes = [8, 32], strides = [1, 1]} : vector<8x128xbf16> to vector<8x32xbf16>
    %cst_17 = arith.constant dense<0.000000e+00> : vector<8x8xf32>
    %45 = tpu.matmul %42, %43, %cst_17 {dimension_numbers = #tpu.dot_dimension_numbers<[1], [1], [0], [0], [0, 0, 1, 0], [], []>} : vector<8x32xbf16>, vector<8x32xbf16>, vector<8x8xf32> -> vector<8x8xf32>
    %cst_18 = arith.constant 0.176776692 : f32
    %46 = vector.broadcast %cst_18 : f32 to vector<8x8xf32>
    %47 = arith.mulf %45, %46 : vector<8x8xf32>
    %cst_19 = arith.constant dense<0xFF800000> : vector<8xf32>
    %48 = vector.multi_reduction <maximumf>, %47, %cst_19 [1] : vector<8x8xf32> to vector<8xf32>
    %49 = vector.shape_cast %48 : vector<8xf32> to vector<8x1xf32>
    %50 = vector.broadcast %49 : vector<8x1xf32> to vector<8x8xf32>
    %51 = arith.subf %47, %50 : vector<8x8xf32>
    %52 = math.exp %51 : vector<8x8xf32>
    %cst_20 = arith.constant dense<0.000000e+00> : vector<8xf32>
    %53 = vector.multi_reduction <add>, %52, %cst_20 [1] : vector<8x8xf32> to vector<8xf32>
    %54 = vector.shape_cast %53 : vector<8xf32> to vector<8x1xf32>
    %55 = tpu.reciprocal %54 {approx = true} : vector<8x1xf32> -> vector<8x1xf32>
    %56 = vector.broadcast %55 : vector<8x1xf32> to vector<8x8xf32>
    %57 = arith.mulf %52, %56 : vector<8x8xf32>
    %58 = arith.truncf %57 : vector<8x8xf32> to vector<8x8xbf16>
    %cst_21 = arith.constant dense<0.000000e+00> : vector<8x32xf32>
    %59 = tpu.matmul %58, %44, %cst_21 {dimension_numbers = #tpu.dot_dimension_numbers<[1], [0], [0], [1], [0, 0, 1, 1], [], []>} : vector<8x8xbf16>, vector<8x32xbf16>, vector<8x32xf32> -> vector<8x32xf32>
    %60 = vector.extract_strided_slice %1 {offsets = [0, 96], sizes = [8, 32], strides = [1, 1]} : vector<8x128xbf16> to vector<8x32xbf16>
    %61 = vector.extract_strided_slice %3 {offsets = [0, 96], sizes = [8, 32], strides = [1, 1]} : vector<8x128xbf16> to vector<8x32xbf16>
    %62 = vector.extract_strided_slice %5 {offsets = [0, 96], sizes = [8, 32], strides = [1, 1]} : vector<8x128xbf16> to vector<8x32xbf16>
    %cst_22 = arith.constant dense<0.000000e+00> : vector<8x8xf32>
    %63 = tpu.matmul %60, %61, %cst_22 {dimension_numbers = #tpu.dot_dimension_numbers<[1], [1], [0], [0], [0, 0, 1, 0], [], []>} : vector<8x32xbf16>, vector<8x32xbf16>, vector<8x8xf32> -> vector<8x8xf32>
    %cst_23 = arith.constant 0.176776692 : f32
    %64 = vector.broadcast %cst_23 : f32 to vector<8x8xf32>
    %65 = arith.mulf %63, %64 : vector<8x8xf32>
    %cst_24 = arith.constant dense<0xFF800000> : vector<8xf32>
    %66 = vector.multi_reduction <maximumf>, %65, %cst_24 [1] : vector<8x8xf32> to vector<8xf32>
    %67 = vector.shape_cast %66 : vector<8xf32> to vector<8x1xf32>
    %68 = vector.broadcast %67 : vector<8x1xf32> to vector<8x8xf32>
    %69 = arith.subf %65, %68 : vector<8x8xf32>
    %70 = math.exp %69 : vector<8x8xf32>
    %cst_25 = arith.constant dense<0.000000e+00> : vector<8xf32>
    %71 = vector.multi_reduction <add>, %70, %cst_25 [1] : vector<8x8xf32> to vector<8xf32>
    %72 = vector.shape_cast %71 : vector<8xf32> to vector<8x1xf32>
    %73 = tpu.reciprocal %72 {approx = true} : vector<8x1xf32> -> vector<8x1xf32>
    %74 = vector.broadcast %73 : vector<8x1xf32> to vector<8x8xf32>
    %75 = arith.mulf %70, %74 : vector<8x8xf32>
    %76 = arith.truncf %75 : vector<8x8xf32> to vector<8x8xbf16>
    %cst_26 = arith.constant dense<0.000000e+00> : vector<8x32xf32>
    %77 = tpu.matmul %76, %62, %cst_26 {dimension_numbers = #tpu.dot_dimension_numbers<[1], [0], [0], [1], [0, 0, 1, 1], [], []>} : vector<8x8xbf16>, vector<8x32xbf16>, vector<8x32xf32> -> vector<8x32xf32>
    %78 = tpu.concatenate %23, %41, %59, %77 in 1 : vector<8x32xf32>, vector<8x32xf32>, vector<8x32xf32>, vector<8x32xf32> -> vector<8x128xf32>
    %79 = arith.truncf %78 : vector<8x128xf32> to vector<8x128xbf16>
    %c0_27 = arith.constant 0 : index
    %c0_28 = arith.constant 0 : index
    %c0_29 = arith.constant 0 : index
    %80 = vector.load %arg4[%c0_27, %c0_28, %c0_29] : memref<1x8x128xbf16, #tpu.memory_space<vmem>>, vector<1x8x128xbf16>
    %81 = vector.shape_cast %80 : vector<1x8x128xbf16> to vector<8x128xbf16>
    %82 = vector.shape_cast %79 : vector<8x128xbf16> to vector<1x8x128xbf16>
    tpu.vector_store %arg4[%c0_27, %c0_28, %c0_29], %82 {strides = array<i32>} : memref<1x8x128xbf16, #tpu.memory_space<vmem>>, vector<1x8x128xbf16>,
    return
  }
  func.func @transform_0(%arg0: i32) -> (i32, i32, i32) {
    %c0_i32 = arith.constant 0 : i32
    %c0_i32_0 = arith.constant 0 : i32
    %c0_i32_1 = arith.constant 0 : i32
    return %arg0, %c0_i32, %c0_i32_0 : i32, i32, i32
  }
  func.func @transform_1(%arg0: i32) -> (i32, i32, i32) {
    %c0_i32 = arith.constant 0 : i32
    %c0_i32_0 = arith.constant 0 : i32
    %c0_i32_1 = arith.constant 0 : i32
    return %arg0, %c0_i32, %c0_i32_0 : i32, i32, i32
  }
  func.func @transform_2(%arg0: i32) -> (i32, i32, i32) {
    %c0_i32 = arith.constant 0 : i32
    %c1_i32 = arith.constant 1 : i32
    %c0_i32_0 = arith.constant 0 : i32
    return %arg0, %c0_i32, %c1_i32 : i32, i32, i32
  }
  func.func @transform_3(%arg0: i32) -> (i32, i32, i32) {
    %c0_i32 = arith.constant 0 : i32
    %c0_i32_0 = arith.constant 0 : i32
    %c0_i32_1 = arith.constant 0 : i32
    return %arg0, %c0_i32, %c0_i32_0 : i32, i32, i32
  }
}

module attributes {stable_mosaic.version = 11 : i64} {
  func.func @_ffn_kernel(%arg0: i32, %arg1: i32, %arg2: memref<16x128xf32, #tpu.memory_space<vmem>>, %arg3: memref<1x128xf32, #tpu.memory_space<vmem>>, %arg4: memref<1x128xf32, #tpu.memory_space<vmem>>, %arg5: memref<128x256xbf16, #tpu.memory_space<vmem>>, %arg6: memref<1x256xf32, #tpu.memory_space<vmem>>, %arg7: memref<256x128xbf16, #tpu.memory_space<vmem>>, %arg8: memref<1x128xf32, #tpu.memory_space<vmem>>, %arg9: memref<16x128xf32, #tpu.memory_space<vmem>>, %arg10: memref<16x128xf32, #tpu.memory_space<vmem>>, %arg11: memref<16x128xf32, #tpu.memory_space<vmem>>) attributes {dimension_semantics = [#tpu.dimension_semantics<parallel>, #tpu.dimension_semantics<arbitrary>], iteration_bounds = array<i64: 1, 1>, scalar_prefetch = 0 : i64, scratch_operands = 2 : i64, tpu.core_type = #tpu.core_type<tc>, window_params = [{transform_indices = @transform_0, window_bounds = array<i64: 16, 128>}, {pipeline_mode = #tpu.pipeline_mode<synchronous>, transform_indices = @transform_1, window_bounds = array<i64: 1, 128>}, {pipeline_mode = #tpu.pipeline_mode<synchronous>, transform_indices = @transform_2, window_bounds = array<i64: 1, 128>}, {transform_indices = @transform_3, window_bounds = array<i64: 128, 256>}, {transform_indices = @transform_4, window_bounds = array<i64: 1, 256>}, {transform_indices = @transform_5, window_bounds = array<i64: 256, 128>}, {pipeline_mode = #tpu.pipeline_mode<synchronous>, transform_indices = @transform_6, window_bounds = array<i64: 1, 128>}, {transform_indices = @transform_7, window_bounds = array<i64: 16, 128>}]} {
    %c0_i32 = arith.constant 0 : i32
    %0 = arith.cmpi eq, %arg1, %c0_i32 : i32
    %1 = arith.extui %0 : i1 to i32
    %c0_i32_0 = arith.constant 0 : i32
    %2 = arith.cmpi ne, %1, %c0_i32_0 : i32
    scf.if %2 {
      %c0_16 = arith.constant 0 : index
      %c0_17 = arith.constant 0 : index
      %21 = vector.load %arg2[%c0_16, %c0_17] : memref<16x128xf32, #tpu.memory_space<vmem>>, vector<16x128xf32>
      %cst_18 = arith.constant dense<0.000000e+00> : vector<16xf32>
      %22 = vector.multi_reduction <add>, %21, %cst_18 [1] : vector<16x128xf32> to vector<16xf32>
      %23 = vector.shape_cast %22 : vector<16xf32> to vector<16x1xf32>
      %cst_19 = arith.constant 1.280000e+02 : f32
      %24 = vector.broadcast %cst_19 : f32 to vector<16x1xf32>
      %25 = arith.divf %23, %24 : vector<16x1xf32>
      %26 = vector.broadcast %25 : vector<16x1xf32> to vector<16x128xf32>
      %27 = arith.subf %21, %26 : vector<16x128xf32>
      %28 = arith.mulf %27, %27 : vector<16x128xf32>
      %cst_20 = arith.constant dense<0.000000e+00> : vector<16xf32>
      %29 = vector.multi_reduction <add>, %28, %cst_20 [1] : vector<16x128xf32> to vector<16xf32>
      %30 = vector.shape_cast %29 : vector<16xf32> to vector<16x1xf32>
      %cst_21 = arith.constant 1.280000e+02 : f32
      %31 = vector.broadcast %cst_21 : f32 to vector<16x1xf32>
      %32 = arith.divf %30, %31 : vector<16x1xf32>
      %33 = vector.broadcast %25 : vector<16x1xf32> to vector<16x128xf32>
      %34 = arith.subf %21, %33 : vector<16x128xf32>
      %cst_22 = arith.constant 9.99999974E-6 : f32
      %35 = vector.broadcast %cst_22 : f32 to vector<16x1xf32>
      %36 = arith.addf %32, %35 : vector<16x1xf32>
      %37 = math.rsqrt %36 : vector<16x1xf32>
      %38 = vector.broadcast %37 : vector<16x1xf32> to vector<16x128xf32>
      %39 = arith.mulf %34, %38 : vector<16x128xf32>
      %c0_23 = arith.constant 0 : index
      %c0_24 = arith.constant 0 : index
      %40 = vector.load %arg3[%c0_23, %c0_24] : memref<1x128xf32, #tpu.memory_space<vmem>>, vector<1x128xf32>
      %41 = vector.broadcast %40 : vector<1x128xf32> to vector<16x128xf32>
      %42 = arith.mulf %39, %41 : vector<16x128xf32>
      %c0_25 = arith.constant 0 : index
      %c0_26 = arith.constant 0 : index
      %43 = vector.load %arg4[%c0_25, %c0_26] : memref<1x128xf32, #tpu.memory_space<vmem>>, vector<1x128xf32>
      %44 = vector.broadcast %43 : vector<1x128xf32> to vector<16x128xf32>
      %45 = arith.addf %42, %44 : vector<16x128xf32>
      %c0_27 = arith.constant 0 : index
      %c0_28 = arith.constant 0 : index
      %46 = vector.load %arg10[%c0_27, %c0_28] : memref<16x128xf32, #tpu.memory_space<vmem>>, vector<16x128xf32>
      tpu.vector_store %arg10[%c0_27, %c0_28], %45 {strides = array<i32>} : memref<16x128xf32, #tpu.memory_space<vmem>>, vector<16x128xf32>,
      %cst_29 = arith.constant 0.000000e+00 : f32
      %47 = vector.broadcast %cst_29 : f32 to vector<16x128xf32>
      %c0_30 = arith.constant 0 : index
      %c0_31 = arith.constant 0 : index
      %48 = vector.load %arg11[%c0_30, %c0_31] : memref<16x128xf32, #tpu.memory_space<vmem>>, vector<16x128xf32>
      tpu.vector_store %arg11[%c0_30, %c0_31], %47 {strides = array<i32>} : memref<16x128xf32, #tpu.memory_space<vmem>>, vector<16x128xf32>,
    } else {
    }
    %c0 = arith.constant 0 : index
    %c0_1 = arith.constant 0 : index
    %3 = vector.load %arg10[%c0, %c0_1] : memref<16x128xf32, #tpu.memory_space<vmem>>, vector<16x128xf32>
    %4 = arith.truncf %3 : vector<16x128xf32> to vector<16x128xbf16>
    %c0_2 = arith.constant 0 : index
    %c0_3 = arith.constant 0 : index
    %5 = vector.load %arg5[%c0_2, %c0_3] : memref<128x256xbf16, #tpu.memory_space<vmem>>, vector<128x256xbf16>
    %cst = arith.constant dense<0.000000e+00> : vector<16x256xf32>
    %6 = tpu.matmul %4, %5, %cst {dimension_numbers = #tpu.dot_dimension_numbers<[1], [0], [0], [1], [0, 0, 1, 1], [], []>} : vector<16x128xbf16>, vector<128x256xbf16>, vector<16x256xf32> -> vector<16x256xf32>
    %c0_4 = arith.constant 0 : index
    %c0_5 = arith.constant 0 : index
    %7 = vector.load %arg6[%c0_4, %c0_5] : memref<1x256xf32, #tpu.memory_space<vmem>>, vector<1x256xf32>
    %8 = vector.broadcast %7 : vector<1x256xf32> to vector<16x256xf32>
    %9 = arith.addf %6, %8 : vector<16x256xf32>
    %cst_6 = arith.constant 0.000000e+00 : f32
    %10 = vector.broadcast %cst_6 : f32 to vector<16x256xf32>
    %11 = arith.maximumf %9, %10 : vector<16x256xf32>
    %c0_7 = arith.constant 0 : index
    %c0_8 = arith.constant 0 : index
    %12 = vector.load %arg11[%c0_7, %c0_8] : memref<16x128xf32, #tpu.memory_space<vmem>>, vector<16x128xf32>
    %13 = arith.truncf %11 : vector<16x256xf32> to vector<16x256xbf16>
    %c0_9 = arith.constant 0 : index
    %c0_10 = arith.constant 0 : index
    %14 = vector.load %arg7[%c0_9, %c0_10] : memref<256x128xbf16, #tpu.memory_space<vmem>>, vector<256x128xbf16>
    %cst_11 = arith.constant dense<0.000000e+00> : vector<16x128xf32>
    %15 = tpu.matmul %13, %14, %cst_11 {dimension_numbers = #tpu.dot_dimension_numbers<[1], [0], [0], [1], [0, 0, 1, 1], [], []>} : vector<16x256xbf16>, vector<256x128xbf16>, vector<16x128xf32> -> vector<16x128xf32>
    %16 = arith.addf %12, %15 : vector<16x128xf32>
    %c0_12 = arith.constant 0 : index
    %c0_13 = arith.constant 0 : index
    %17 = vector.load %arg11[%c0_12, %c0_13] : memref<16x128xf32, #tpu.memory_space<vmem>>, vector<16x128xf32>
    tpu.vector_store %arg11[%c0_12, %c0_13], %16 {strides = array<i32>} : memref<16x128xf32, #tpu.memory_space<vmem>>, vector<16x128xf32>,
    %c0_i32_14 = arith.constant 0 : i32
    %18 = arith.cmpi eq, %arg1, %c0_i32_14 : i32
    %19 = arith.extui %18 : i1 to i32
    %c0_i32_15 = arith.constant 0 : i32
    %20 = arith.cmpi ne, %19, %c0_i32_15 : i32
    scf.if %20 {
      %c0_16 = arith.constant 0 : index
      %c0_17 = arith.constant 0 : index
      %21 = vector.load %arg2[%c0_16, %c0_17] : memref<16x128xf32, #tpu.memory_space<vmem>>, vector<16x128xf32>
      %c0_18 = arith.constant 0 : index
      %c0_19 = arith.constant 0 : index
      %22 = vector.load %arg11[%c0_18, %c0_19] : memref<16x128xf32, #tpu.memory_space<vmem>>, vector<16x128xf32>
      %23 = arith.addf %21, %22 : vector<16x128xf32>
      %c0_20 = arith.constant 0 : index
      %c0_21 = arith.constant 0 : index
      %24 = vector.load %arg8[%c0_20, %c0_21] : memref<1x128xf32, #tpu.memory_space<vmem>>, vector<1x128xf32>
      %25 = vector.broadcast %24 : vector<1x128xf32> to vector<16x128xf32>
      %26 = arith.addf %23, %25 : vector<16x128xf32>
      %c0_22 = arith.constant 0 : index
      %c0_23 = arith.constant 0 : index
      %27 = vector.load %arg9[%c0_22, %c0_23] : memref<16x128xf32, #tpu.memory_space<vmem>>, vector<16x128xf32>
      tpu.vector_store %arg9[%c0_22, %c0_23], %26 {strides = array<i32>} : memref<16x128xf32, #tpu.memory_space<vmem>>, vector<16x128xf32>,
    } else {
    }
    return
  }
  func.func @transform_0(%arg0: i32, %arg1: i32) -> (i32, i32) {
    %c0_i32 = arith.constant 0 : i32
    %c0_i32_0 = arith.constant 0 : i32
    return %arg0, %c0_i32 : i32, i32
  }
  func.func @transform_1(%arg0: i32, %arg1: i32) -> (i32, i32) {
    %c0_i32 = arith.constant 0 : i32
    %c0_i32_0 = arith.constant 0 : i32
    %c0_i32_1 = arith.constant 0 : i32
    return %c0_i32, %c0_i32_0 : i32, i32
  }
  func.func @transform_2(%arg0: i32, %arg1: i32) -> (i32, i32) {
    %c0_i32 = arith.constant 0 : i32
    %c0_i32_0 = arith.constant 0 : i32
    %c0_i32_1 = arith.constant 0 : i32
    return %c0_i32, %c0_i32_0 : i32, i32
  }
  func.func @transform_3(%arg0: i32, %arg1: i32) -> (i32, i32) {
    %c0_i32 = arith.constant 0 : i32
    %c0_i32_0 = arith.constant 0 : i32
    return %c0_i32, %arg1 : i32, i32
  }
  func.func @transform_4(%arg0: i32, %arg1: i32) -> (i32, i32) {
    %c0_i32 = arith.constant 0 : i32
    %c0_i32_0 = arith.constant 0 : i32
    return %c0_i32, %arg1 : i32, i32
  }
  func.func @transform_5(%arg0: i32, %arg1: i32) -> (i32, i32) {
    %c0_i32 = arith.constant 0 : i32
    %c0_i32_0 = arith.constant 0 : i32
    return %arg1, %c0_i32 : i32, i32
  }
  func.func @transform_6(%arg0: i32, %arg1: i32) -> (i32, i32) {
    %c0_i32 = arith.constant 0 : i32
    %c0_i32_0 = arith.constant 0 : i32
    %c0_i32_1 = arith.constant 0 : i32
    return %c0_i32, %c0_i32_0 : i32, i32
  }
  func.func @transform_7(%arg0: i32, %arg1: i32) -> (i32, i32) {
    %c0_i32 = arith.constant 0 : i32
    %c0_i32_0 = arith.constant 0 : i32
    return %arg0, %c0_i32 : i32, i32
  }
}

module attributes {stable_mosaic.version = 11 : i64} {
  func.func @_ln_linear_kernel(%arg0: i32, %arg1: i32, %arg2: memref<16x128xf32, #tpu.memory_space<vmem>>, %arg3: memref<1x128xf32, #tpu.memory_space<vmem>>, %arg4: memref<1x128xf32, #tpu.memory_space<vmem>>, %arg5: memref<128x512xbf16, #tpu.memory_space<vmem>>, %arg6: memref<1x512xf32, #tpu.memory_space<vmem>>, %arg7: memref<16x512xf32, #tpu.memory_space<vmem>>, %arg8: memref<16x128xf32, #tpu.memory_space<vmem>>) attributes {dimension_semantics = [#tpu.dimension_semantics<parallel>, #tpu.dimension_semantics<arbitrary>], iteration_bounds = array<i64: 1, 1>, scalar_prefetch = 0 : i64, scratch_operands = 1 : i64, tpu.core_type = #tpu.core_type<tc>, window_params = [{transform_indices = @transform_0, window_bounds = array<i64: 16, 128>}, {pipeline_mode = #tpu.pipeline_mode<synchronous>, transform_indices = @transform_1, window_bounds = array<i64: 1, 128>}, {pipeline_mode = #tpu.pipeline_mode<synchronous>, transform_indices = @transform_2, window_bounds = array<i64: 1, 128>}, {transform_indices = @transform_3, window_bounds = array<i64: 128, 512>}, {transform_indices = @transform_4, window_bounds = array<i64: 1, 512>}, {transform_indices = @transform_5, window_bounds = array<i64: 16, 512>}]} {
    %c0_i32 = arith.constant 0 : i32
    %0 = arith.cmpi eq, %arg1, %c0_i32 : i32
    %1 = arith.extui %0 : i1 to i32
    %c0_i32_0 = arith.constant 0 : i32
    %2 = arith.cmpi ne, %1, %c0_i32_0 : i32
    scf.if %2 {
      %c0_8 = arith.constant 0 : index
      %c0_9 = arith.constant 0 : index
      %11 = vector.load %arg2[%c0_8, %c0_9] : memref<16x128xf32, #tpu.memory_space<vmem>>, vector<16x128xf32>
      %cst_10 = arith.constant dense<0.000000e+00> : vector<16xf32>
      %12 = vector.multi_reduction <add>, %11, %cst_10 [1] : vector<16x128xf32> to vector<16xf32>
      %13 = vector.shape_cast %12 : vector<16xf32> to vector<16x1xf32>
      %cst_11 = arith.constant 1.280000e+02 : f32
      %14 = vector.broadcast %cst_11 : f32 to vector<16x1xf32>
      %15 = arith.divf %13, %14 : vector<16x1xf32>
      %16 = vector.broadcast %15 : vector<16x1xf32> to vector<16x128xf32>
      %17 = arith.subf %11, %16 : vector<16x128xf32>
      %18 = arith.mulf %17, %17 : vector<16x128xf32>
      %cst_12 = arith.constant dense<0.000000e+00> : vector<16xf32>
      %19 = vector.multi_reduction <add>, %18, %cst_12 [1] : vector<16x128xf32> to vector<16xf32>
      %20 = vector.shape_cast %19 : vector<16xf32> to vector<16x1xf32>
      %cst_13 = arith.constant 1.280000e+02 : f32
      %21 = vector.broadcast %cst_13 : f32 to vector<16x1xf32>
      %22 = arith.divf %20, %21 : vector<16x1xf32>
      %23 = vector.broadcast %15 : vector<16x1xf32> to vector<16x128xf32>
      %24 = arith.subf %11, %23 : vector<16x128xf32>
      %cst_14 = arith.constant 9.99999974E-6 : f32
      %25 = vector.broadcast %cst_14 : f32 to vector<16x1xf32>
      %26 = arith.addf %22, %25 : vector<16x1xf32>
      %27 = math.rsqrt %26 : vector<16x1xf32>
      %28 = vector.broadcast %27 : vector<16x1xf32> to vector<16x128xf32>
      %29 = arith.mulf %24, %28 : vector<16x128xf32>
      %c0_15 = arith.constant 0 : index
      %c0_16 = arith.constant 0 : index
      %30 = vector.load %arg3[%c0_15, %c0_16] : memref<1x128xf32, #tpu.memory_space<vmem>>, vector<1x128xf32>
      %31 = vector.broadcast %30 : vector<1x128xf32> to vector<16x128xf32>
      %32 = arith.mulf %29, %31 : vector<16x128xf32>
      %c0_17 = arith.constant 0 : index
      %c0_18 = arith.constant 0 : index
      %33 = vector.load %arg4[%c0_17, %c0_18] : memref<1x128xf32, #tpu.memory_space<vmem>>, vector<1x128xf32>
      %34 = vector.broadcast %33 : vector<1x128xf32> to vector<16x128xf32>
      %35 = arith.addf %32, %34 : vector<16x128xf32>
      %c0_19 = arith.constant 0 : index
      %c0_20 = arith.constant 0 : index
      %36 = vector.load %arg8[%c0_19, %c0_20] : memref<16x128xf32, #tpu.memory_space<vmem>>, vector<16x128xf32>
      tpu.vector_store %arg8[%c0_19, %c0_20], %35 {strides = array<i32>} : memref<16x128xf32, #tpu.memory_space<vmem>>, vector<16x128xf32>,
    } else {
    }
    %c0 = arith.constant 0 : index
    %c0_1 = arith.constant 0 : index
    %3 = vector.load %arg8[%c0, %c0_1] : memref<16x128xf32, #tpu.memory_space<vmem>>, vector<16x128xf32>
    %4 = arith.truncf %3 : vector<16x128xf32> to vector<16x128xbf16>
    %c0_2 = arith.constant 0 : index
    %c0_3 = arith.constant 0 : index
    %5 = vector.load %arg5[%c0_2, %c0_3] : memref<128x512xbf16, #tpu.memory_space<vmem>>, vector<128x512xbf16>
    %cst = arith.constant dense<0.000000e+00> : vector<16x512xf32>
    %6 = tpu.matmul %4, %5, %cst {dimension_numbers = #tpu.dot_dimension_numbers<[1], [0], [0], [1], [0, 0, 1, 1], [], []>} : vector<16x128xbf16>, vector<128x512xbf16>, vector<16x512xf32> -> vector<16x512xf32>
    %c0_4 = arith.constant 0 : index
    %c0_5 = arith.constant 0 : index
    %7 = vector.load %arg6[%c0_4, %c0_5] : memref<1x512xf32, #tpu.memory_space<vmem>>, vector<1x512xf32>
    %8 = vector.broadcast %7 : vector<1x512xf32> to vector<16x512xf32>
    %9 = arith.addf %6, %8 : vector<16x512xf32>
    %c0_6 = arith.constant 0 : index
    %c0_7 = arith.constant 0 : index
    %10 = vector.load %arg7[%c0_6, %c0_7] : memref<16x512xf32, #tpu.memory_space<vmem>>, vector<16x512xf32>
    tpu.vector_store %arg7[%c0_6, %c0_7], %9 {strides = array<i32>} : memref<16x512xf32, #tpu.memory_space<vmem>>, vector<16x512xf32>,
    return
  }
  func.func @transform_0(%arg0: i32, %arg1: i32) -> (i32, i32) {
    %c0_i32 = arith.constant 0 : i32
    %c0_i32_0 = arith.constant 0 : i32
    return %arg0, %c0_i32 : i32, i32
  }
  func.func @transform_1(%arg0: i32, %arg1: i32) -> (i32, i32) {
    %c0_i32 = arith.constant 0 : i32
    %c0_i32_0 = arith.constant 0 : i32
    %c0_i32_1 = arith.constant 0 : i32
    return %c0_i32, %c0_i32_0 : i32, i32
  }
  func.func @transform_2(%arg0: i32, %arg1: i32) -> (i32, i32) {
    %c0_i32 = arith.constant 0 : i32
    %c0_i32_0 = arith.constant 0 : i32
    %c0_i32_1 = arith.constant 0 : i32
    return %c0_i32, %c0_i32_0 : i32, i32
  }
  func.func @transform_3(%arg0: i32, %arg1: i32) -> (i32, i32) {
    %c0_i32 = arith.constant 0 : i32
    %c0_i32_0 = arith.constant 0 : i32
    return %c0_i32, %arg1 : i32, i32
  }
  func.func @transform_4(%arg0: i32, %arg1: i32) -> (i32, i32) {
    %c0_i32 = arith.constant 0 : i32
    %c0_i32_0 = arith.constant 0 : i32
    return %c0_i32, %arg1 : i32, i32
  }
  func.func @transform_5(%arg0: i32, %arg1: i32) -> (i32, i32) {
    %c0_i32 = arith.constant 0 : i32
    return %arg0, %arg1 : i32, i32
  }
}

</mosaic_0001>

<bundles_post_ra>
// kernel: ls_transformer_decoder_forward.29
= control target key start
LH: loop header
LB: loop body
LE: loop exit
PB: predicated region body
PF: predicated region fallthrough
CT: control target
= control target key end

     0   :  { %v232_v1 = vmov 0   ;;  %v36_v20 = vlaneseq  ;;  %s316_s1 = inlined_call_operand.vmem [shape: bf16[128,256], index: 1, kind: input, shape index: {}]   ;;  %s317_s0 = inlined_call_operand.vmem [shape: f32[16,128], index: 0, kind: input, shape index: {}]   ;;  %s318_s2 = inlined_call_operand.vmem [shape: f32[1,256], index: 2, kind: input, shape index: {}]   ;;  %s319_s3 = inlined_call_operand.vmem [shape: bf16[16,256], index: 3, kind: output, shape index: {}]  }
   0x1   :  { %v208_v0 = vld [vmem:[%s316_s1 + $0x4] ss:$8 sps:$4 sm:$0xff]   ;;  %158 = vmatprep.mubr.bf16.mxu0 %v232_v1  ;;  %v210_v2 = vld [vmem:[%s316_s1] ss:$8 sps:$4 sm:$0xff]   ;;  %v211_v3 = vld [vmem:[%s316_s1 + $0x14] ss:$8 sps:$4 sm:$0xff]  }
   0x2   :  { %126 = vmatprep.subr.bf16.mxu0 %v208_v0  ;;  %v213_v4 = vld [vmem:[%s316_s1 + $0x10] ss:$8 sps:$4 sm:$0xff]   ;;  %v214_v5 = vld [vmem:[%s316_s1 + $0x24] ss:$8 sps:$4 sm:$0xff]   ;;  %v216_v6 = vld [vmem:[%s316_s1 + $0x20] ss:$8 sps:$4 sm:$0xff]  }
   0x3   :  { %127 = vmatpush1.bf16.msra.mxu0 %v210_v2  ;;  %v217_v7 = vld [vmem:[%s316_s1 + $0x34] ss:$8 sps:$4 sm:$0xff]   ;;  %v219_v8 = vld [vmem:[%s316_s1 + $0x30] ss:$8 sps:$4 sm:$0xff]   ;;  %v220_v9 = vld [vmem:[%s316_s1 + $0x44] ss:$8 sps:$4 sm:$0xff]  }
   0x4   :  { %128 = vmatprep.subr.bf16.mxu0 %v211_v3  ;;  %v222_v10 = vld [vmem:[%s316_s1 + $0x40] ss:$8 sps:$4 sm:$0xff]   ;;  %v223_v11 = vld [vmem:[%s316_s1 + $0x54] ss:$8 sps:$4 sm:$0xff]   ;;  %v225_v12 = vld [vmem:[%s316_s1 + $0x50] ss:$8 sps:$4 sm:$0xff]  }
   0x5   :  { %v226_v13 = vld [vmem:[%s316_s1 + $0x64] ss:$8 sps:$4 sm:$0xff]   ;;  %v228_v14 = vld [vmem:[%s316_s1 + $0x60] ss:$8 sps:$4 sm:$0xff]   ;;  %v229_v15 = vld [vmem:[%s316_s1 + $0x74] ss:$8 sps:$4 sm:$0xff]  }
   0x6   :  { %v231_v16 = vld [vmem:[%s316_s1 + $0x70] ss:$8 sps:$4 sm:$0xff]   ;;  %v15_v17 = vld [vmem:[%s317_s0] sm:$0xff]  ;;  %v16_v18 = vld [vmem:[%s317_s0 + $0x8] sm:$0xff]  ;;  %v37_v21 = vshrl.u32 %v36_v20, 7 }
   0x7   :  { %129 = vmatpush1.bf16.msra.mxu0 %v213_v4  ;;  %v17_v19 = vpack.c.bf16 %v16_v18, %v15_v17  ;;  %v34_v23 = vld [vmem:[%s318_s2] sm:$0x3] }
   0x8   :  { %130 = vmatprep.subr.bf16.mxu0 %v214_v5  ;;  %v38_v22 = vsub.s32 0, %v37_v21  ;;  %v42_v24 = vsub.s32 1, %v37_v21 }
   0xa   :  { %v39_v25 = vrot.slane %v34_v23, %v38_v22  ;;  %v43_v26 = vrot.slane %v34_v23, %v42_v24 }
   0xb   :  { %131 = vmatpush1.bf16.msra.mxu0 %v216_v6 }
   0xc   :  { %132 = vmatprep.subr.bf16.mxu0 %v217_v7 }
   0xf   :  { %133 = vmatpush1.bf16.msra.mxu0 %v219_v8 }
  0x10   :  { %134 = vmatprep.subr.bf16.mxu0 %v220_v9 }
  0x13   :  { %135 = vmatpush1.bf16.msra.mxu0 %v222_v10 }
  0x14   :  { %136 = vmatprep.subr.bf16.mxu0 %v223_v11 }
  0x17   :  { %137 = vmatpush1.bf16.msra.mxu0 %v225_v12 }
  0x18   :  { %138 = vmatprep.subr.bf16.mxu0 %v226_v13 }
  0x1b   :  { %139 = vmatpush1.bf16.msra.mxu0 %v228_v14 }
  0x1c   :  { %140 = vmatprep.subr.bf16.mxu0 %v229_v15 }
  0x1f   :  { %141 = vmatpush1.bf16.msra.mxu0 %v231_v16 }
  0x22   :  { %159 = vmatmul.mubr.bf16.vlgmr.msra.gmra.mrb[0].mxu0 %v17_v19 }
  0xf5   :  { %v160_v27 = vpop.f32.mrb[0].mxu0 }
  0xf6   :  { %v161_v28 = vadd.f32 %v160_v27, %v39_v25  ;;  %v162_v29 = vpop.f32.mrb[1].mxu0 }
  0xf7   :  { %v163_v30 = vadd.f32 %v162_v29, %v43_v26  ;;  %v164_v31 = vpop.f32.mrb[2].mxu0 }
  0xf8   :  { %v165_v32 = vadd.f32 %v164_v31, %v39_v25  ;;  %v166_v33 = vpop.f32.mrb[3].mxu0 }
  0xf9   :  { %v205_v34 = vpack.c.bf16 %v163_v30, %v161_v28  ;;  %v167_v35 = vadd.f32 %v166_v33, %v43_v26 }
  0xfb   :  { %181 = vst [vmem:[%s319_s3] sm:$0xff] %v205_v34  ;;  %v206_v36 = vpack.c.bf16 %v167_v35, %v165_v32 }
  0xfd   :  { %182 = vst [vmem:[%s319_s3 + $0x8] sm:$0xff] %v206_v36 }

// kernel: ls_transformer_decoder_forward.21
= control target key start
LH: loop header
LB: loop body
LE: loop exit
PB: predicated region body
PF: predicated region fallthrough
CT: control target
= control target key end

     0   :  { %8 = vsyncpa [#allocation3], 0  ;;  %s270_s12 = smov [#allocation2]   ;;  %s364_s0 = inlined_call_operand.vmem [shape: f32[16,128], index: 0, kind: input, shape index: {}]   ;;  %s365_s1 = inlined_call_operand.vmem [shape: bf16[128,256], index: 1, kind: input, shape index: {}]   ;;  %s366_s2 = inlined_call_operand.hbm [shape: f32[1,256], index: 2, kind: input, shape index: {}]   ;;  %s367_s3 = inlined_call_operand.vmem [shape: bf16[16,256], index: 3, kind: output, shape index: {}]  }
   0x1   :  { %s19_s13 = sshll.u32 %s270_s12, 4  ;;  %s246_s16 = scalar_lea.hbm %s366_s2, 32  ;;  %s20_s13 = int_to_ptr.vmem [resolvable:$true] %s19_s13 }
   0x2   :  { %p247_p0 = scmp.ne.s32.totalorder %s366_s2, %s246_s16  ;;  %p250_p1 = scmp.lt.u32.totalorder %s246_s16, %s366_s2 }
   0x4   :  { %p252_p2 = pnand %p250_p1, %p247_p0 }
   0x6   :  { %255 = shalt.err (!%p252_p2)
}
   0x7   :  { %s256_s21 = scalar_lea.vmem %s20_s13, 32  ;;  %p261_p4 = scmp.lt.s32.totalorder %s20_s13, %s20_s13 }
   0x8   :  { %p257_p3 = scmp.ne.s32.totalorder %s20_s13, %s256_s21  ;;  %p262_p5 = scmp.lt.s32.totalorder %s256_s21, %s256_s21 }
   0xa   :  { %p263_p6 = por %p262_p5, %p261_p4 }
   0xc   :  { %p264_p7 = pnand %p263_p6, %p257_p3 }
   0xe   :  { %267 = shalt.err (!%p264_p7)
}
   0xf   :  { %22 = dma.hbm_to_vmem [thread:$0]  %s366_s2, 32, %s20_s13, [#allocation3]  }
  0x10   :  { %268 = dma.done.wait [#allocation3], 32  }
  0x11   :  { %269 = vsyncadd [#allocation3], 4294967264  ;;  %v271_v0 = vmov 0   ;;  %v222_v1 = vld [vmem:[%s365_s1 + $0x4] ss:$8 sps:$4 sm:$0xff]   ;;  %v48_v20 = vlaneseq }
  0x12   :  { %170 = vmatprep.mubr.bf16.mxu0 %v271_v0  ;;  %v224_v2 = vld [vmem:[%s365_s1] ss:$8 sps:$4 sm:$0xff]   ;;  %138 = vmatprep.subr.bf16.mxu0 %v222_v1  ;;  %v225_v3 = vld [vmem:[%s365_s1 + $0x14] ss:$8 sps:$4 sm:$0xff]   ;;  %v227_v4 = vld [vmem:[%s365_s1 + $0x10] ss:$8 sps:$4 sm:$0xff]  }
  0x13   :  { %139 = vmatpush1.bf16.msra.mxu0 %v224_v2  ;;  %v228_v5 = vld [vmem:[%s365_s1 + $0x24] ss:$8 sps:$4 sm:$0xff]   ;;  %v230_v6 = vld [vmem:[%s365_s1 + $0x20] ss:$8 sps:$4 sm:$0xff]   ;;  %v231_v7 = vld [vmem:[%s365_s1 + $0x34] ss:$8 sps:$4 sm:$0xff]  }
  0x14   :  { %140 = vmatprep.subr.bf16.mxu0 %v225_v3  ;;  %v233_v8 = vld [vmem:[%s365_s1 + $0x30] ss:$8 sps:$4 sm:$0xff]   ;;  %v234_v9 = vld [vmem:[%s365_s1 + $0x44] ss:$8 sps:$4 sm:$0xff]   ;;  %v236_v10 = vld [vmem:[%s365_s1 + $0x40] ss:$8 sps:$4 sm:$0xff]  }
  0x15   :  { %v237_v11 = vld [vmem:[%s365_s1 + $0x54] ss:$8 sps:$4 sm:$0xff]   ;;  %v239_v12 = vld [vmem:[%s365_s1 + $0x50] ss:$8 sps:$4 sm:$0xff]   ;;  %v240_v13 = vld [vmem:[%s365_s1 + $0x64] ss:$8 sps:$4 sm:$0xff]  }
  0x16   :  { %v242_v14 = vld [vmem:[%s365_s1 + $0x60] ss:$8 sps:$4 sm:$0xff]   ;;  %v243_v15 = vld [vmem:[%s365_s1 + $0x74] ss:$8 sps:$4 sm:$0xff]   ;;  %v245_v16 = vld [vmem:[%s365_s1 + $0x70] ss:$8 sps:$4 sm:$0xff]  }
  0x17   :  { %141 = vmatpush1.bf16.msra.mxu0 %v227_v4  ;;  %v27_v17 = vld [vmem:[%s364_s0] sm:$0xff]  ;;  %v28_v18 = vld [vmem:[%s364_s0 + $0x8] sm:$0xff]  ;;  %v49_v21 = vshrl.u32 %v48_v20, 7 }
  0x18   :  { %142 = vmatprep.subr.bf16.mxu0 %v228_v5  ;;  %v29_v19 = vpack.c.bf16 %v28_v18, %v27_v17  ;;  %v46_v23 = vld [vmem:[#allocation2] sm:$0x3] }
  0x19   :  { %v50_v22 = vsub.s32 0, %v49_v21  ;;  %v54_v24 = vsub.s32 1, %v49_v21 }
  0x1b   :  { %143 = vmatpush1.bf16.msra.mxu0 %v230_v6  ;;  %v51_v25 = vrot.slane %v46_v23, %v50_v22  ;;  %v55_v26 = vrot.slane %v46_v23, %v54_v24 }
  0x1c   :  { %144 = vmatprep.subr.bf16.mxu0 %v231_v7 }
  0x1f   :  { %145 = vmatpush1.bf16.msra.mxu0 %v233_v8 }
  0x20   :  { %146 = vmatprep.subr.bf16.mxu0 %v234_v9 }
  0x23   :  { %147 = vmatpush1.bf16.msra.mxu0 %v236_v10 }
  0x24   :  { %148 = vmatprep.subr.bf16.mxu0 %v237_v11 }
  0x27   :  { %149 = vmatpush1.bf16.msra.mxu0 %v239_v12 }
  0x28   :  { %150 = vmatprep.subr.bf16.mxu0 %v240_v13 }
  0x2b   :  { %151 = vmatpush1.bf16.msra.mxu0 %v242_v14 }
  0x2c   :  { %152 = vmatprep.subr.bf16.mxu0 %v243_v15 }
  0x2f   :  { %153 = vmatpush1.bf16.msra.mxu0 %v245_v16 }
  0x32   :  { %171 = vmatmul.mubr.bf16.vlgmr.msra.gmra.mrb[0].mxu0 %v29_v19 }
 0x105   :  { %v172_v27 = vpop.f32.mrb[0].mxu0 }
 0x106   :  { %v173_v28 = vadd.f32 %v172_v27, %v51_v25  ;;  %v174_v29 = vpop.f32.mrb[1].mxu0 }
 0x107   :  { %v175_v30 = vadd.f32 %v174_v29, %v55_v26  ;;  %v176_v31 = vpop.f32.mrb[2].mxu0 }
 0x108   :  { %v177_v32 = vadd.f32 %v176_v31, %v51_v25  ;;  %v178_v33 = vpop.f32.mrb[3].mxu0 }
 0x109   :  { %v218_v34 = vpack.c.bf16 %v175_v30, %v173_v28  ;;  %v179_v35 = vadd.f32 %v178_v33, %v55_v26 }
 0x10b   :  { %193 = vst [vmem:[%s367_s3] sm:$0xff] %v218_v34  ;;  %v219_v36 = vpack.c.bf16 %v179_v35, %v177_v32 }
 0x10d   :  { %194 = vst [vmem:[%s367_s3 + $0x8] sm:$0xff] %v219_v36 }
 0x10e   :  { %199 = vsyncpa [#allocation3], 1 }

// kernel: ls_transformer_decoder_forward.17
= control target key start
LH: loop header
LB: loop body
LE: loop exit
PB: predicated region body
PF: predicated region fallthrough
CT: control target
= control target key end

     0   :  { %s882_s18 = smov 0   ;;  %s884_s19 = smov 0   ;;  %s1013_s0 = inlined_call_operand.vmem [shape: f32[16,128], index: 0, kind: input, shape index: {}]   ;;  %s1014_s1 = inlined_call_operand.vmem [shape: f32[1,128], index: 1, kind: input, shape index: {}]   ;;  %s1015_s2 = inlined_call_operand.vmem [shape: f32[1,128], index: 2, kind: input, shape index: {}]   ;;  %s1016_s3 = inlined_call_operand.vmem [shape: bf16[128,384], index: 3, kind: input, shape index: {}]   ;;  %s1017_s4 = inlined_call_operand.vmem [shape: f32[1,384], index: 4, kind: input, shape index: {}]   ;;  %s1018_s5 = inlined_call_operand.vmem [shape: bf16[16,384], index: 5, kind: output, shape index: {}]  }
   0x1   :  { %s886_s20 = smov 0   ;;  %s888_s21 = smov 0  }
   0x2   :  { %s890_s22 = smov 0  }
   0x3 LB: > { %s24_s23 = sadd.s32 1, %s844_s21  ;;  %s692_s24 = sadd.s32 4294967295, %s848_s22   ;;  %s848_s22 = sphi %s890_s22, %s15_s22   ;;  %s844_s21 = sphi %s888_s21, %s1023_s21   ;;  %s840_s20 = sphi %s886_s20, %s1022_s20   ;;  %s836_s19 = sphi %s884_s19, %s1021_s19   ;;  %s832_s18 = sphi %s882_s18, %s1020_s18  }
   0x4   : > { %p25_p0 = scmp.ge.s32.totalorder %s24_s23, 3  ;;  %p109_p1 = scmp.ne.s32.totalorder %s836_s19, %s832_s18 }
   0x5   : > { %p110_p2 = scmp.eq.s32.totalorder %s848_s22, 0  ;;  %p167_p4 = scmp.eq.s32.totalorder %s692_s24, 2 }
   0x6   : > { %s1025_s23 = smov (%p25_p0, %s24_s23), 0  ;;  %s102_s26 = sadd.s32 1, %s836_s19 }
   0x7   : > { %p111_p3 = por %p110_p2, %p109_p1  ;;  %s99_s25 = ssub.s32 %s844_s21, %s1025_s23 }
   0x8   : > { %p100_p5 = scmp.eq.s32.totalorder %s99_s25, 0  ;;  %p917_p6 = por %p167_p4, %p109_p1 }
   0x9   : > { %p696_p7 = scmp.ge.s32.totalorder %s848_s22, 3 }
   0xa   : > { %s922_s28 = scalar_select %p100_p5, %s836_s19, %s102_s26  }
   0xb   : > { %204 = sbr.rel (%p696_p7) target bundleno = 32 (0x20), region = 28 }
  0x12   : > { %207 = sbr.rel (!%p111_p3) target bundleno = 32 (0x20), region = 32  ;;  %s209_s29 = sand.u32 (%p111_p3), 1, %s836_s19  }
  0x13   : > { %s698_s30 = sshll.u32 (%p111_p3), %s844_s21, 2  ;;  %s697_s6 = sshll.u32 (%p111_p3), %s209_s29, 6 }
  0x14   : > { %s930_s9 = scalar_lea.vmem (%p111_p3), %s1016_s3, %s698_s30  ;;  %s211_s10 = scalar_lea.vmem (%p111_p3), [#allocation3], %s697_s6 }
  0x15   : > { %v229_v0 = vld [vmem:[%s930_s9] sm:$0xf] (%p111_p3)  ;;  %v231_v1 = vld [vmem:[%s930_s9 + $0xc] sm:$0xf] (%p111_p3)  ;;  %v233_v2 = vld [vmem:[%s930_s9 + $0x18] sm:$0xf] (%p111_p3) }
  0x16   : > { %230 = vst [vmem:[%s211_s10] sm:$0xf] (%p111_p3), %v229_v0  ;;  %232 = vst [vmem:[%s211_s10 + $0x4] sm:$0xf] (%p111_p3), %v231_v1  ;;  %v235_v3 = vld [vmem:[%s930_s9 + $0x24] sm:$0xf] (%p111_p3) }
  0x17   : > { %v237_v4 = vld [vmem:[%s930_s9 + $0x30] sm:$0xf] (%p111_p3)  ;;  %234 = vst [vmem:[%s211_s10 + $0x8] sm:$0xf] (%p111_p3), %v233_v2  ;;  %236 = vst [vmem:[%s211_s10 + $0xc] sm:$0xf] (%p111_p3), %v235_v3 }
  0x18   : > { %238 = vst [vmem:[%s211_s10 + $0x10] sm:$0xf] (%p111_p3), %v237_v4  ;;  %v239_v5 = vld [vmem:[%s930_s9 + $0x3c] sm:$0xf] (%p111_p3)  ;;  %v241_v6 = vld [vmem:[%s930_s9 + $0x48] sm:$0xf] (%p111_p3) }
  0x19   : > { %v243_v7 = vld [vmem:[%s930_s9 + $0x54] sm:$0xf]  ;;  %240 = vst [vmem:[%s211_s10 + $0x14] sm:$0xf] %v239_v5  ;;  %242 = vst [vmem:[%s211_s10 + $0x18] sm:$0xf] %v241_v6 }
  0x1a   : > { %244 = vst [vmem:[%s211_s10 + $0x1c] sm:$0xf] %v243_v7  ;;  %v245_v8 = vld [vmem:[%s930_s9 + $0x60] sm:$0xf]  ;;  %v247_v9 = vld [vmem:[%s930_s9 + $0x6c] sm:$0xf] }
  0x1b   : > { %v249_v10 = vld [vmem:[%s930_s9 + $0x78] sm:$0xf]  ;;  %246 = vst [vmem:[%s211_s10 + $0x20] sm:$0xf] %v245_v8  ;;  %248 = vst [vmem:[%s211_s10 + $0x24] sm:$0xf] %v247_v9 }
  0x1c   : > { %250 = vst [vmem:[%s211_s10 + $0x28] sm:$0xf] %v249_v10  ;;  %v251_v11 = vld [vmem:[%s930_s9 + $0x84] sm:$0xf]  ;;  %v253_v12 = vld [vmem:[%s930_s9 + $0x90] sm:$0xf] }
  0x1d   : > { %v255_v13 = vld [vmem:[%s930_s9 + $0x9c] sm:$0xf]  ;;  %252 = vst [vmem:[%s211_s10 + $0x2c] sm:$0xf] %v251_v11  ;;  %254 = vst [vmem:[%s211_s10 + $0x30] sm:$0xf] %v253_v12 }
  0x1e   : > { %256 = vst [vmem:[%s211_s10 + $0x34] sm:$0xf] %v255_v13  ;;  %v257_v14 = vld [vmem:[%s930_s9 + $0xa8] sm:$0xf]  ;;  %v259_v15 = vld [vmem:[%s930_s9 + $0xb4] sm:$0xf] }
  0x1f   : > { %258 = vst [vmem:[%s211_s10 + $0x38] sm:$0xf] %v257_v14  ;;  %260 = vst [vmem:[%s211_s10 + $0x3c] sm:$0xf] %v259_v15 }
  0x20 PF: > { %p699_p8 = scmp.ge.s32.totalorder %s848_s22, 1  ;;  %p320_p9 = scmp.lt.s32.totalorder %s848_s22, 4 }
  0x22   : > { %p321_p10 = pnand %p699_p8, %p320_p9 }
  0x23   : > { %s327_s11 = sand.u32 (!%p321_p10), 1, %s832_s18   ;;  %p367_p11 = scmp.lt.s32.totalorder (!%p321_p10), %s840_s20, 2 }
  0x24   : > { %324 = sbr.rel (%p321_p10) target bundleno = 621 (0x26d), region = 77  ;;  %s700_s12 = sshll.u32 (!%p321_p10), %s327_s11, 6 }
  0x25   : > { %s701_s13 = sshll.u32 (!%p321_p10), %s327_s11, 3  ;;  %s959_s24 = scalar_lea.vmem (!%p321_p10), [#allocation3], %s700_s12 }
  0x26   : > { %s961_s25 = scalar_lea.vmem (!%p321_p10), [#allocation4], %s701_s13  ;;  %p702_p12 = scmp.ne.s32.totalorder (!%p321_p10), %s840_s20, 0 }
  0x2b   : > { %s953_s14 = scalar_select %p367_p11, %s840_s20, 2 }
  0x2c   : > { %375 = sbr.rel (%p702_p12) target bundleno = 361 (0x169), region = 85  ;;  %v376_v16 = vld [vmem:[%s1013_s0] sm:$0xff] (!%p702_p12)  ;;  %v377_v17 = vld [vmem:[%s1013_s0 + $0x8] sm:$0xff] (!%p702_p12) }
  0x2d   : > { %s369_s17 = scalar_lea.vmem %s1017_s4, %s953_s14  ;;  %378 = vadd.xlane.f32.xlu0 (!%p702_p12), %v376_v16  ;;  %v703_v33 = vld [vmem:[%s1014_s1] ss:$0 sm:$0xff] (!%p702_p12) }
  0x2e   : > { %v704_v35 = vld [vmem:[%s1015_s2] ss:$0 sm:$0xff] (!%p702_p12) }
  0x31   : > { %380 = vadd.xlane.f32.xlu0 (!%p702_p12), %v377_v17 }
  0xba   : > { %v379_v18 = vpop.xlane.xlu0 %378 }
  0xbb   : > { %v383_v19 = vmul.f32 0.0078125, %v379_v18 }
  0xbd   : > { %v385_v20 = vsub.f32 %v376_v16, %v383_v19 }
  0xbe   : > { %v381_v21 = vpop.xlane.xlu0 %380 }
  0xbf   : > { %v384_v22 = vmul.f32 0.0078125, %v381_v21  ;;  %v387_v23 = vmul.f32 %v385_v20, %v385_v20 }
  0xc1   : > { %v386_v24 = vsub.f32 %v377_v17, %v384_v22  ;;  %389 = vadd.xlane.f32.xlu1 %v387_v23 }
  0xc3   : > { %v388_v25 = vmul.f32 %v386_v24, %v386_v24 }
  0xc5   : > { %391 = vadd.xlane.f32.xlu1 %v388_v25 }
 0x14e   : > { %v390_v26 = vpop.xlane.xlu1 %389 }
 0x14f   : > { %v393_v27 = vmul.f32 0.0078125, %v390_v26 }
 0x151   : > { %v395_v28 = vadd.f32 1e-05, %v393_v27 }
 0x152   : > { %v392_v29 = vpop.xlane.xlu1 %391 }
 0x153   : > { %798 = vrsqrt.f32 %v395_v28  ;;  %v394_v30 = vmul.f32 0.0078125, %v392_v29 }
 0x155   : > { %v396_v31 = vadd.f32 1e-05, %v394_v30 }
 0x157   : > { %800 = vrsqrt.f32 %v396_v31 }
 0x15d   : > { %v799_v32 = vpop.eup %798 }
 0x15e   : > { %v399_v34 = vmul.f32 %v799_v32, %v385_v20 }
 0x160   : > { %v408_v36 = vmul.f32 %v703_v33, %v399_v34 }
 0x161   : > { %v801_v37 = vpop.eup %800 }
 0x162   : > { %v417_v38 = vadd.f32 %v704_v35, %v408_v36  ;;  %v400_v39 = vmul.f32 %v801_v37, %v386_v24 }
 0x164   : > { %419 = vst [vmem:[#allocation2] sm:$0xff] %v417_v38  ;;  %v409_v40 = vmul.f32 %v703_v33, %v400_v39 }
 0x166   : > { %v418_v41 = vadd.f32 %v704_v35, %v409_v40 }
 0x168   : > { %420 = vst [vmem:[#allocation2 + $0x8] sm:$0xff] %v418_v41 }
 0x169 PF: > { %v802_v42 = vld [vmem:[%s959_s24] sm:$0xff]   ;;  %v850_v43 = vmov 0.0   ;;  %v803_v44 = vld [vmem:[%s959_s24 + $0x8] sm:$0xff]   ;;  %vm851_vm0 = vmmov 0   ;;  %v804_v45 = vld [vmem:[%s959_s24 + $0x10] sm:$0xff]   ;;  %s717_s12 = sshll.u32 (%p917_p6), %s840_s20, 2 }
 0x16a   : > { %736 = vmatprep.subr.bf16.mxu0 %v850_v43  ;;  %752 = vmatprep.mubr.msk.bf16.mxu0 %vm851_vm0, %v850_v43  ;;  %v805_v46 = vld [vmem:[%s959_s24 + $0x18] sm:$0xff]   ;;  %v806_v47 = vld [vmem:[%s959_s24 + $0x20] sm:$0xff]   ;;  %v807_v48 = vld [vmem:[%s959_s24 + $0x28] sm:$0xff]   ;;  %s557_s15 = scalar_lea.vmem (%p917_p6), %s1018_s5, %s717_s12 }
 0x16b   : > { %737 = vmatpush3.bf16.msra.mxu0 %v802_v42  ;;  %v808_v49 = vld [vmem:[%s959_s24 + $0x30] sm:$0xff]   ;;  %v809_v50 = vld [vmem:[%s959_s24 + $0x38] sm:$0xff]  }
 0x16c   : > { %738 = vmatprep.subr.bf16.mxu0 %v850_v43  ;;  %v421_v51 = vld [vmem:[#allocation2] sm:$0xff] }
 0x16d   : > { %v705_v54 = vld [vmem:[%s369_s17] ss:$0 sm:$0xff] }
 0x16f   : > { %739 = vmatpush3.bf16.msra.mxu0 %v803_v44  ;;  %v422_v52 = vld [vmem:[#allocation2 + $0x8] sm:$0xff] }
 0x170   : > { %740 = vmatprep.subr.bf16.mxu0 %v850_v43  ;;  %v423_v53 = vpack.c.bf16 %v422_v52, %v421_v51 }
 0x173   : > { %741 = vmatpush3.bf16.msra.mxu0 %v804_v45 }
 0x174   : > { %742 = vmatprep.subr.bf16.mxu0 %v850_v43 }
 0x177   : > { %743 = vmatpush3.bf16.msra.mxu0 %v805_v46 }
 0x178   : > { %744 = vmatprep.subr.bf16.mxu0 %v850_v43 }
 0x17b   : > { %745 = vmatpush3.bf16.msra.mxu0 %v806_v47 }
 0x17c   : > { %746 = vmatprep.subr.bf16.mxu0 %v850_v43 }
 0x17f   : > { %747 = vmatpush3.bf16.msra.mxu0 %v807_v48 }
 0x180   : > { %748 = vmatprep.subr.bf16.mxu0 %v850_v43 }
 0x183   : > { %749 = vmatpush3.bf16.msra.mxu0 %v808_v49 }
 0x184   : > { %750 = vmatprep.subr.bf16.mxu0 %v850_v43 }
 0x187   : > { %751 = vmatpush3.bf16.msra.mxu0 %v809_v50 }
 0x18a   : > { %753 = vmatmul.mubr.bf16.vlgmr.msra.gmra.mrb[0].mxu0 %v423_v53 }
 0x25d   : > { %v529_v55 = vpop.f32.mrb[0].mxu0 }
 0x25e   : > { %v754_v56 = vpop.f32.mrb[1].mxu0  ;;  %v530_v58 = vadd.f32 %v705_v54, %v529_v55  ;;  %552 = sbr.rel (!%p917_p6) target bundleno = 621 (0x26d), region = 89 }
 0x25f   : > { %v532_v57 = vpop.f32.mrb[2].mxu0 }
 0x260   : > { %v533_v59 = vadd.f32 %v705_v54, %v532_v57  ;;  %v755_v60 = vpop.f32.mrb[3].mxu0 }
 0x262   : > { %v725_v61 = vpack.c.bf16 %v533_v59, %v530_v58 }
 0x264   : > { %726 = vst [vmem:[%s961_s25] sm:$0xff] %v725_v61  }
 0x26b   : > { %v573_v62 = vld [vmem:[%s961_s25] sm:$0xf]  ;;  %v575_v63 = vld [vmem:[%s961_s25 + $0x4] sm:$0xf] }
 0x26c   : > { %574 = vst [vmem:[%s557_s15] sm:$0xf] %v573_v62  ;;  %576 = vst [vmem:[%s557_s15 + $0xc] sm:$0xf] %v575_v63 }
 0x26d PF: > { %s15_s22 = sadd.s32 1, %s848_s22   ;;  %s1020_s18 = smov %s836_s19 }
 0x26e   : > { %p12_p13 = scmp.ge.s32.totalorder %s15_s22, 5   ;;  %s1021_s19 = smov %s922_s28 }
 0x26f   : > { %s1022_s20 = smov %s844_s21  ;;  %s1023_s21 = smov %s1025_s23 }
 0x270   :  { %14 = sbr.rel (!%p12_p13) target bundleno = 3 (0x3), region = 167 }

// kernel: ls_transformer_decoder_forward.19
= control target key start
LH: loop header
LB: loop body
LE: loop exit
PB: predicated region body
PF: predicated region fallthrough
CT: control target
= control target key end

     0   :  { %v200_v0 = vmov 0.0   ;;  %vm201_vm0 = vmmov 0   ;;  %s269_s1 = inlined_call_operand.vmem [shape: bf16[128,128], index: 1, kind: input, shape index: {}]   ;;  %s270_s0 = inlined_call_operand.vmem [shape: bf16[16,128], index: 0, kind: input, shape index: {}]   ;;  %s271_s3 = inlined_call_operand.vmem [shape: f32[16,128], index: 3, kind: input, shape index: {}]   ;;  %s272_s2 = inlined_call_operand.vmem [shape: f32[1,128], index: 2, kind: input, shape index: {}]   ;;  %s273_s4 = inlined_call_operand.vmem [shape: f32[16,128], index: 4, kind: output, shape index: {}]  }
   0x1   :  { %169 = vmatprep.subr.bf16.mxu0 %v200_v0  ;;  %v191_v1 = vld [vmem:[%s269_s1] sm:$0xff]   ;;  %185 = vmatprep.mubr.msk.bf16.mxu0 %vm201_vm0, %v200_v0  ;;  %v192_v2 = vld [vmem:[%s269_s1 + $0x8] sm:$0xff]   ;;  %v193_v3 = vld [vmem:[%s269_s1 + $0x10] sm:$0xff]  }
   0x2   :  { %170 = vmatpush3.bf16.msra.mxu0 %v191_v1  ;;  %v194_v4 = vld [vmem:[%s269_s1 + $0x18] sm:$0xff]   ;;  %v195_v5 = vld [vmem:[%s269_s1 + $0x20] sm:$0xff]   ;;  %v196_v6 = vld [vmem:[%s269_s1 + $0x28] sm:$0xff]  }
   0x3   :  { %171 = vmatprep.subr.bf16.mxu0 %v200_v0  ;;  %v197_v7 = vld [vmem:[%s269_s1 + $0x30] sm:$0xff]   ;;  %v198_v8 = vld [vmem:[%s269_s1 + $0x38] sm:$0xff]   ;;  %v199_v9 = vld [vmem:[%s270_s0] sm:$0xff]  }
   0x4   :  { %v131_v10 = vld [vmem:[%s271_s3] sm:$0xff]  ;;  %v132_v13 = vld [vmem:[%s271_s3 + $0x8] sm:$0xff] }
   0x5   :  { %v159_v12 = vld [vmem:[%s272_s2] ss:$0 sm:$0xff] }
   0x6   :  { %172 = vmatpush3.bf16.msra.mxu0 %v192_v2 }
   0x7   :  { %173 = vmatprep.subr.bf16.mxu0 %v200_v0 }
   0xa   :  { %174 = vmatpush3.bf16.msra.mxu0 %v193_v3 }
   0xb   :  { %175 = vmatprep.subr.bf16.mxu0 %v200_v0 }
   0xe   :  { %176 = vmatpush3.bf16.msra.mxu0 %v194_v4 }
   0xf   :  { %177 = vmatprep.subr.bf16.mxu0 %v200_v0 }
  0x12   :  { %178 = vmatpush3.bf16.msra.mxu0 %v195_v5 }
  0x13   :  { %179 = vmatprep.subr.bf16.mxu0 %v200_v0 }
  0x16   :  { %180 = vmatpush3.bf16.msra.mxu0 %v196_v6 }
  0x17   :  { %181 = vmatprep.subr.bf16.mxu0 %v200_v0 }
  0x1a   :  { %182 = vmatpush3.bf16.msra.mxu0 %v197_v7 }
  0x1b   :  { %183 = vmatprep.subr.bf16.mxu0 %v200_v0 }
  0x1e   :  { %184 = vmatpush3.bf16.msra.mxu0 %v198_v8 }
  0x21   :  { %186 = vmatmul.mubr.bf16.vlgmr.msra.gmra.mrb[0].mxu0 %v199_v9 }
  0xf4   :  { %v124_v11 = vpop.f32.mrb[0].mxu0 }
  0xf5   :  { %v133_v14 = vadd.f32 %v131_v10, %v124_v11  ;;  %v187_v15 = vpop.f32.mrb[1].mxu0 }
  0xf6   :  { %v127_v16 = vpop.f32.mrb[2].mxu0 }
  0xf7   :  { %v142_v17 = vadd.f32 %v159_v12, %v133_v14  ;;  %v134_v18 = vadd.f32 %v132_v13, %v127_v16  ;;  %v188_v19 = vpop.f32.mrb[3].mxu0 }
  0xf9   :  { %144 = vst [vmem:[%s273_s4] sm:$0xff] %v142_v17  ;;  %v143_v20 = vadd.f32 %v159_v12, %v134_v18 }
  0xfb   :  { %145 = vst [vmem:[%s273_s4 + $0x8] sm:$0xff] %v143_v20 }

// kernel: ls_transformer_decoder_forward.18
= control target key start
LH: loop header
LB: loop body
LE: loop exit
PB: predicated region body
PF: predicated region fallthrough
CT: control target
= control target key end

     0   :  { %s941_s12 = smov 0   ;;  %s1049_s0 = inlined_call_operand.vmem [shape: bf16[2,8,384], index: 0, kind: input, shape index: {}, may-alias: {0,1,2}]   ;;  %s1050_s1 = inlined_call_operand.vmem [shape: bf16[2,8,384], index: 1, kind: input, shape index: {}, may-alias: {0,1,2}]   ;;  %s1051_s2 = inlined_call_operand.vmem [shape: bf16[2,8,384], index: 2, kind: input, shape index: {}, may-alias: {0,1,2}]   ;;  %s1052_s3 = inlined_call_operand.vmem [shape: bf16[2,8,128], index: 3, kind: output, shape index: {}]  }
   0x1 LB: > { %s787_s13 = sadd.s32 4294967295, %s914_s12   ;;  %p791_p0 = scmp.ge.s32.totalorder %s914_s12, 1  ;;  %s914_s12 = sphi %s941_s12, %s13_s12  }
   0x2   : > { %p159_p1 = scmp.lt.s32.totalorder %s914_s12, 3 }
   0x4   : > { %p160_p2 = pnand %p791_p0, %p159_p1 }
   0x5   : > { %p194_p3 = scmp.lt.s32.totalorder (!%p160_p2), %s787_s13, 1  ;;  %v916_v0 = vmov (!%p160_p2), 0.0   ;;  %vm917_vm0 = vmmov (!%p160_p2), 0   ;;  %vm225_vm1 = vcmask (!%p160_p2), 261120   ;;  %v219_v4 = vlaneseq (!%p160_p2)  ;;  %s918_s21 = smov (!%p160_p2), 96  }
   0x6   : > { %163 = sbr.rel (%p160_p2) target bundleno = 1482 (0x5ca), region = 32  ;;  %827 = vmatprep.subr.bf16.mxu0 (!%p160_p2), %v916_v0  ;;  %829 = vmatprep.mubr.msk.bf16.mxu0 (!%p160_p2), %vm917_vm0, %v916_v0  ;;  %vm274_vm3 = vcmask (!%p160_p2), 64512   ;;  %s919_s22 = smov (!%p160_p2), 64   ;;  %vm290_vm4 = vcmask (!%p160_p2), 1043456   ;;  %vm692_vm5 = vcmask (!%p160_p2), 523264   ;;  %vm694_vm6 = vcmask (!%p160_p2), 785408  }
   0x7   : > { %833 = vmatprep.subr.bf16.mxu1 (!%p160_p2), %v916_v0  ;;  %835 = vmatprep.mubr.msk.bf16.mxu1 (!%p160_p2), %vm917_vm0, %v916_v0  ;;  %v220_v5 = vshrl.u32 (!%p160_p2), %v219_v4, 7  ;;  %v222_v6 = vand.u32 (!%p160_p2), 127, %v219_v4  ;;  %s920_s23 = smov (!%p160_p2), 32  }
   0x9   : > { %vm223_vm2 = vcmp.gt.s32.totalorder (!%p160_p2), %v222_v6, %v220_v5 }
   0xa   : > { %v974_v8 = vsel (!%p160_p2), %vm223_vm2, -1e+30, %v916_v0 }
   0xd   : > { %s1054_s13 = smov (!%p194_p3, %s787_s13), 1 }
   0xe   : > { %s958_s14 = smul.u32 12, %s1054_s13  ;;  %s795_s27 = sshll.u32 %s1054_s13, 2 }
   0xf   : > { %s214_s30 = scalar_lea.vmem %s1052_s3, %s795_s27 }
  0x10   : > { %s743_s17 = scalar_lea.vmem %s1050_s1, %s958_s14  ;;  %s198_s20 = scalar_lea.vmem %s1049_s0, %s958_s14 }
  0x11   : > { %v796_v1 = vld [vmem:[%s743_s17 + $0x4] sm:$0xf]  ;;  %v216_v3 = vld [vmem:[%s198_s20] sm:$0xf]  ;;  %s747_s26 = scalar_lea.vmem %s1051_s2, %s958_s14 }
  0x12   : > { %v230_v2 = vsel %vm225_vm1, %v796_v1, 0  ;;  %v801_v15 = vcombine.low %v796_v1, %v796_v1  ;;  %v800_v16 = vcombine.low %v216_v3, %v216_v3  ;;  %v988_v22 = vld [vmem:[%s747_s26 + $0x8] sm:$0xf] }
  0x13   : > { %828 = vmatpush3.bf16.xpose.msra.mxu0 %v230_v2  ;;  %v292_v23 = vsel %vm290_vm4, %v988_v22, 0 }
  0x14   : > { %845 = vmatprep.subr.bf16.mxu0 %v916_v0  ;;  %342 = vrot.lane.b32.xlu1 %v801_v15, %s918_s21 }
  0x15   : > { %834 = vmatpush3.bf16.msra.mxu1 %v292_v23 }
  0x16   : > { %839 = vmatprep.subr.bf16.mxu1 %v916_v0 }
  0x18   : > { %337 = vrot.lane.b32.xlu1 %v800_v16, %s918_s21 }
  0x1a   : > { %830 = vmatmul.mubr.msk.bf16.vlgmr.msra.gmra.mrb[0].mxu0 %vm225_vm1, %v216_v3 }
  0x1b   : > { %847 = vmatprep.mubr.msk.bf16.mxu0 %vm917_vm0, %v916_v0 }
  0x1c   : > { %455 = vrot.lane.b32.xlu1 %v800_v16, %s919_s22 }
  0x20   : > { %569 = vrot.lane.b32.xlu1 %v801_v15, %s920_s23 }
  0x24   : > { %567 = vrot.lane.b32.xlu1 %v800_v16, %s920_s23 }
  0x86   : > { %v343_v26 = vpop.permute.xlu1 %342 }
  0x87   : > { %v348_v28 = vsel %vm225_vm1, %v343_v26, 0 }
  0x8a   : > { %v338_v30 = vpop.permute.xlu1 %337 }
  0x8e   : > { %v456_v32 = vpop.permute.xlu1 %455 }
  0x92   : > { %v570_v34 = vpop.permute.xlu1 %569 }
  0x93   : > { %v575_v35 = vsel %vm225_vm1, %v570_v34, 0 }
  0x96   : > { %v568_v36 = vpop.permute.xlu1 %567 }
  0xed   : > { %v266_v7 = vpop.f32.mrb[0].mxu0 }
  0xee   : > { %v272_v9 = vmul.f32 0.17677669, %v266_v7  ;;  %v831_v10 = vpop.f32.mrb[1].mxu0 }
  0xef   : > { %v269_v11 = vpop.f32.mrb[2].mxu0 }
  0xf0   : > { %v832_v12 = vpop.f32.mrb[3].mxu0  ;;  %v273_v13 = vadd.f32 %v272_v9, %v974_v8 }
  0xf2   : > { %v275_v14 = vsel %vm274_vm3, %v273_v13, -inf }
  0xf3   : > { %276 = vmax.xlane.f32.xlu0 %v275_v14 }
 0x180   : > { %v277_v17 = vpop.xlane.xlu0 %276 }
 0x181   : > { %v278_v18 = vsub.f32 %v273_v13, %v277_v17 }
 0x183   : > { %v279_v19 = vmul.f32 1.442695, %v278_v18 }
 0x185   : > { %892 = vpow2.f32 %v279_v19 }
 0x18f   : > { %v893_v20 = vpop.eup %892 }
 0x190   : > { %v281_v21 = vsel %vm274_vm3, %v893_v20, 0.0 }
 0x191   : > { %282 = vadd.xlane.f32.xlu0 %v281_v21 }
 0x1a7   : > { %457 = vrot.lane.b32.xlu0 %v801_v15, %s919_s22 }
 0x21e   : > { %v283_v24 = vpop.xlane.xlu0 %282 }
 0x21f   : > { %894 = vrcp.f32 %v283_v24 }
 0x222   : > { %v458_v31 = vpop.permute.xlu0 %457 }
 0x223   : > { %v463_v33 = vsel %vm225_vm1, %v458_v31, 0 }
 0x229   : > { %v895_v25 = vpop.eup %894 }
 0x22a   : > { %v285_v27 = vmul.f32 %v895_v25, %v893_v20 }
 0x22c   : > { %v286_v29 = vpack.c.bf16 %v285_v27, %v285_v27 }
 0x22e   : > { %836 = vmatmul.mubr.msk.bf16.vlgmr.msra.gmra.mrb[0].mxu1 %vm274_vm3, %v286_v29 }
 0x22f   : > { %840 = vmatpush3.bf16.xpose.msra.mxu1 %v348_v28  ;;  %841 = vmatprep.mubr.msk.bf16.mxu1 %vm917_vm0, %v916_v0 }
 0x230   : > { %851 = vmatprep.subr.bf16.mxu1 %v916_v0 }
 0x236   : > { %842 = vmatmul.mubr.msk.bf16.vlgmr.msra.gmra.mrb[4].mxu1 %vm225_vm1, %v338_v30 }
 0x237   : > { %852 = vmatpush3.bf16.xpose.msra.mxu1 %v463_v33  ;;  %853 = vmatprep.mubr.msk.bf16.mxu1 %vm917_vm0, %v916_v0 }
 0x238   : > { %863 = vmatprep.subr.bf16.mxu1 %v916_v0 }
 0x23e   : > { %854 = vmatmul.mubr.msk.bf16.vlgmr.msra.gmra.mrb[8].mxu1 %vm225_vm1, %v456_v32 }
 0x23f   : > { %864 = vmatpush3.bf16.xpose.msra.mxu1 %v575_v35  ;;  %865 = vmatprep.mubr.msk.bf16.mxu1 %vm917_vm0, %v916_v0 }
 0x246   : > { %866 = vmatmul.mubr.msk.bf16.vlgmr.msra.gmra.mrb[12].mxu1 %vm225_vm1, %v568_v36 }
 0x301   : > { %v1009_v37 = vpop.f32.mrb[0].mxu1 }
 0x302   : > { %v837_v38 = vpop.f32.mrb[1].mxu1 }
 0x303   : > { %v331_v39 = vpop.f32.mrb[2].mxu1 }
 0x304   : > { %v838_v40 = vpop.f32.mrb[3].mxu1 }
 0x309   : > { %v384_v41 = vpop.f32.mrb[4].mxu1 }
 0x30a   : > { %v390_v42 = vmul.f32 0.17677669, %v384_v41  ;;  %v843_v43 = vpop.f32.mrb[5].mxu1 }
 0x30b   : > { %v387_v44 = vpop.f32.mrb[6].mxu1 }
 0x30c   : > { %v844_v45 = vpop.f32.mrb[7].mxu1  ;;  %v391_v46 = vadd.f32 %v390_v42, %v974_v8 }
 0x30e   : > { %v392_v47 = vsel %vm274_vm3, %v391_v46, -inf }
 0x30f   : > { %393 = vmax.xlane.f32.xlu1 %v392_v47 }
 0x311   : > { %v499_v48 = vpop.f32.mrb[8].mxu1 }
 0x312   : > { %v505_v49 = vmul.f32 0.17677669, %v499_v48  ;;  %v855_v50 = vpop.f32.mrb[9].mxu1 }
 0x313   : > { %v502_v51 = vpop.f32.mrb[10].mxu1 }
 0x314   : > { %v506_v52 = vadd.f32 %v505_v49, %v974_v8  ;;  %v856_v53 = vpop.f32.mrb[11].mxu1 }
 0x316   : > { %v507_v54 = vsel %vm274_vm3, %v506_v52, -inf }
 0x317   : > { %508 = vmax.xlane.f32.xlu0 %v507_v54 }
 0x319   : > { %v611_v55 = vpop.f32.mrb[12].mxu1 }
 0x31a   : > { %v617_v56 = vmul.f32 0.17677669, %v611_v55  ;;  %v867_v57 = vpop.f32.mrb[13].mxu1 }
 0x31b   : > { %v614_v58 = vpop.f32.mrb[14].mxu1 }
 0x31c   : > { %v618_v59 = vadd.f32 %v617_v56, %v974_v8  ;;  %v868_v60 = vpop.f32.mrb[15].mxu1  ;;  %v803_v8 = vcombine.low %v988_v22, %v988_v22 }
 0x31e   : > { %v619_v61 = vsel %vm274_vm3, %v618_v59, -inf }
 0x31f   : > { %620 = vmax.xlane.f32.xlu1 %v619_v61 }
 0x39c   : > { %v394_v62 = vpop.xlane.xlu1 %393 }
 0x39d   : > { %v395_v63 = vsub.f32 %v391_v46, %v394_v62 }
 0x39f   : > { %v396_v1 = vmul.f32 1.442695, %v395_v63 }
 0x3a1   : > { %896 = vpow2.f32 %v396_v1 }
 0x3a4   : > { %v509_v2 = vpop.xlane.xlu0 %508 }
 0x3a5   : > { %v510_v3 = vsub.f32 %v506_v52, %v509_v2 }
 0x3a7   : > { %v511_v4 = vmul.f32 1.442695, %v510_v3 }
 0x3a9   : > { %898 = vpow2.f32 %v511_v4 }
 0x3ab   : > { %v897_v5 = vpop.eup %896 }
 0x3ac   : > { %v398_v6 = vsel %vm274_vm3, %v897_v5, 0.0  ;;  %v621_v10 = vpop.xlane.xlu1 %620 }
 0x3ad   : > { %399 = vadd.xlane.f32.xlu1 %v398_v6  ;;  %v622_v11 = vsub.f32 %v618_v59, %v621_v10 }
 0x3af   : > { %v623_v12 = vmul.f32 1.442695, %v622_v11 }
 0x3b1   : > { %900 = vpow2.f32 %v623_v12 }
 0x3b3   : > { %v899_v7 = vpop.eup %898 }
 0x3b4   : > { %v513_v9 = vsel %vm274_vm3, %v899_v7, 0.0 }
 0x3b5   : > { %514 = vadd.xlane.f32.xlu0 %v513_v9 }
 0x3bb   : > { %v901_v13 = vpop.eup %900 }
 0x3bc   : > { %v625_v14 = vsel %vm274_vm3, %v901_v13, 0.0 }
 0x3be   : > { %519 = vrot.lane.b32.xlu1 %v803_v8, %s919_s22 }
 0x3cb   : > { %407 = vrot.lane.b32.xlu0 %v803_v8, %s918_s21 }
 0x3e2   : > { %626 = vadd.xlane.f32.xlu1 %v625_v14 }
 0x3f3   : > { %631 = vrot.lane.b32.xlu1 %v803_v8, %s920_s23 }
 0x43a   : > { %v400_v15 = vpop.xlane.xlu1 %399 }
 0x43b   : > { %902 = vrcp.f32 %v400_v15 }
 0x43e   : > { %v520_v21 = vpop.permute.xlu1 %519 }
 0x43f   : > { %v525_v23 = vsel %vm290_vm4, %v520_v21, 0 }
 0x442   : > { %v515_v16 = vpop.xlane.xlu0 %514 }
 0x443   : > { %904 = vrcp.f32 %v515_v16 }
 0x445   : > { %v903_v17 = vpop.eup %902 }
 0x446   : > { %v402_v18 = vmul.f32 %v903_v17, %v897_v5  ;;  %v408_v19 = vpop.permute.xlu0 %407 }
 0x447   : > { %v413_v20 = vsel %vm290_vm4, %v408_v19, 0 }
 0x448   : > { %846 = vmatpush3.bf16.msra.mxu0 %v413_v20  ;;  %v403_v22 = vpack.c.bf16 %v402_v18, %v402_v18 }
 0x449   : > { %857 = vmatprep.subr.bf16.mxu0 %v916_v0 }
 0x44b   : > { %848 = vmatmul.mubr.msk.bf16.vlgmr.msra.gmra.mrb[4].mxu0 %vm274_vm3, %v403_v22 }
 0x44c   : > { %858 = vmatpush3.bf16.msra.mxu0 %v525_v23  ;;  %859 = vmatprep.mubr.msk.bf16.mxu0 %vm917_vm0, %v916_v0 }
 0x44d   : > { %v905_v24 = vpop.eup %904  ;;  %869 = vmatprep.subr.bf16.mxu0 %v916_v0 }
 0x44e   : > { %v517_v25 = vmul.f32 %v905_v24, %v899_v7 }
 0x450   : > { %v518_v26 = vpack.c.bf16 %v517_v25, %v517_v25 }
 0x453   : > { %860 = vmatmul.mubr.msk.bf16.vlgmr.msra.gmra.mrb[8].mxu0 %vm274_vm3, %v518_v26 }
 0x454   : > { %871 = vmatprep.mubr.msk.bf16.mxu0 %vm917_vm0, %v916_v0 }
 0x46f   : > { %v627_v27 = vpop.xlane.xlu1 %626 }
 0x470   : > { %906 = vrcp.f32 %v627_v27 }
 0x473   : > { %v632_v28 = vpop.permute.xlu1 %631 }
 0x474   : > { %v637_v29 = vsel %vm290_vm4, %v632_v28, 0 }
 0x475   : > { %870 = vmatpush3.bf16.msra.mxu0 %v637_v29 }
 0x47a   : > { %v907_v30 = vpop.eup %906 }
 0x47b   : > { %v629_v31 = vmul.f32 %v907_v30, %v901_v13 }
 0x47d   : > { %v630_v32 = vpack.c.bf16 %v629_v31, %v629_v31 }
 0x47f   : > { %872 = vmatmul.mubr.msk.bf16.vlgmr.msra.gmra.mrb[12].mxu0 %vm274_vm3, %v630_v32 }
 0x51e   : > { %v449_v33 = vpop.f32.mrb[4].mxu0 }
 0x51f   : > { %680 = vrot.lane.b32.xlu0 %v449_v33, %s920_s23  ;;  %v849_v34 = vpop.f32.mrb[5].mxu0 }
 0x520   : > { %v452_v35 = vpop.f32.mrb[6].mxu0 }
 0x521   : > { %v850_v36 = vpop.f32.mrb[7].mxu0 }
 0x526   : > { %v561_v38 = vpop.f32.mrb[8].mxu0 }
 0x527   : > { %684 = vrot.lane.b32.xlu1 %v561_v38, %s919_s22  ;;  %v861_v0 = vpop.f32.mrb[9].mxu0 }
 0x528   : > { %v564_v39 = vpop.f32.mrb[10].mxu0 }
 0x529   : > { %v862_v40 = vpop.f32.mrb[11].mxu0 }
 0x552   : > { %v673_v41 = vpop.f32.mrb[12].mxu0 }
 0x553   : > { %688 = vrot.lane.b32.xlu0 %v673_v41, %s918_s21  ;;  %v873_v42 = vpop.f32.mrb[13].mxu0 }
 0x554   : > { %v676_v43 = vpop.f32.mrb[14].mxu0 }
 0x555   : > { %v874_v44 = vpop.f32.mrb[15].mxu0 }
 0x591   : > { %v681_v45 = vpop.permute.xlu0 %680 }
 0x592   : > { %v691_v47 = vsel %vm225_vm1, %v1009_v37, %v681_v45 }
 0x599   : > { %v685_v46 = vpop.permute.xlu1 %684 }
 0x59a   : > { %v693_v48 = vsel %vm692_vm5, %v691_v47, %v685_v46 }
 0x5c5   : > { %v689_v49 = vpop.permute.xlu0 %688 }
 0x5c6   : > { %v695_v50 = vsel %vm694_vm6, %v693_v48, %v689_v49 }
 0x5c7   : > { %v696_v51 = vpack.c.bf16 %v695_v50, %v695_v50 }
 0x5c9   : > { %697 = vst [vmem:[%s214_s30] sm:$0xf] %v696_v51 }
 0x5ca PF: > { %s13_s12 = sadd.s32 1, %s914_s12  }
 0x5cb   : > { %p10_p4 = scmp.ge.s32.totalorder %s13_s12, 4  }
 0x5cd   :  { %12 = sbr.rel (!%p10_p4) target bundleno = 1 (0x1), region = 68 }

// kernel: ls_transformer_decoder_forward.20
= control target key start
LH: loop header
LB: loop body
LE: loop exit
PB: predicated region body
PF: predicated region fallthrough
CT: control target
= control target key end

     0   :  { %v262_v2 = vmov 0.0   ;;  %vm263_vm0 = vmmov 0   ;;  %s336_s0 = inlined_call_operand.vmem [shape: f32[16,128], index: 0, kind: input, shape index: {}]   ;;  %s337_s3 = inlined_call_operand.vmem [shape: bf16[128,128], index: 3, kind: input, shape index: {}]   ;;  %s338_s1 = inlined_call_operand.vmem [shape: f32[1,128], index: 1, kind: input, shape index: {}]   ;;  %s339_s2 = inlined_call_operand.vmem [shape: f32[1,128], index: 2, kind: input, shape index: {}]   ;;  %s340_s4 = inlined_call_operand.vmem [shape: f32[1,128], index: 4, kind: input, shape index: {}]   ;;  %s341_s5 = inlined_call_operand.vmem [shape: bf16[16,128], index: 5, kind: output, shape index: {}]  }
   0x1   :  { %v25_v0 = vld [vmem:[%s336_s0] sm:$0xff]  ;;  %v26_v1 = vld [vmem:[%s336_s0 + $0x8] sm:$0xff]  ;;  %228 = vmatprep.subr.bf16.mxu0 %v262_v2  ;;  %v252_v13 = vld [vmem:[%s337_s3 + $0x10] sm:$0xff]   ;;  %244 = vmatprep.mubr.msk.bf16.mxu0 %vm263_vm0, %v262_v2 }
   0x2   :  { %27 = vadd.xlane.f32.xlu0 %v25_v0  ;;  %v250_v3 = vld [vmem:[%s337_s3] sm:$0xff]   ;;  %v251_v12 = vld [vmem:[%s337_s3 + $0x8] sm:$0xff]   ;;  %v253_v14 = vld [vmem:[%s337_s3 + $0x18] sm:$0xff]  }
   0x3   :  { %229 = vmatpush3.bf16.msra.mxu0 %v250_v3  ;;  %v254_v15 = vld [vmem:[%s337_s3 + $0x20] sm:$0xff]   ;;  %v255_v16 = vld [vmem:[%s337_s3 + $0x28] sm:$0xff]   ;;  %v256_v17 = vld [vmem:[%s337_s3 + $0x30] sm:$0xff]  }
   0x4   :  { %230 = vmatprep.subr.bf16.mxu0 %v262_v2  ;;  %v257_v18 = vld [vmem:[%s337_s3 + $0x38] sm:$0xff]   ;;  %v199_v27 = vld [vmem:[%s338_s1] ss:$0 sm:$0xff] }
   0x5   :  { %v200_v31 = vld [vmem:[%s339_s2] ss:$0 sm:$0xff] }
   0x6   :  { %29 = vadd.xlane.f32.xlu0 %v26_v1  ;;  %v201_v36 = vld [vmem:[%s340_s4] ss:$0 sm:$0xff] }
   0x7   :  { %231 = vmatpush3.bf16.msra.mxu0 %v251_v12 }
   0x8   :  { %232 = vmatprep.subr.bf16.mxu0 %v262_v2 }
   0xb   :  { %233 = vmatpush3.bf16.msra.mxu0 %v252_v13 }
   0xc   :  { %234 = vmatprep.subr.bf16.mxu0 %v262_v2 }
   0xf   :  { %235 = vmatpush3.bf16.msra.mxu0 %v253_v14 }
  0x10   :  { %236 = vmatprep.subr.bf16.mxu0 %v262_v2 }
  0x13   :  { %237 = vmatpush3.bf16.msra.mxu0 %v254_v15 }
  0x14   :  { %238 = vmatprep.subr.bf16.mxu0 %v262_v2 }
  0x17   :  { %239 = vmatpush3.bf16.msra.mxu0 %v255_v16 }
  0x18   :  { %240 = vmatprep.subr.bf16.mxu0 %v262_v2 }
  0x1b   :  { %241 = vmatpush3.bf16.msra.mxu0 %v256_v17 }
  0x1c   :  { %242 = vmatprep.subr.bf16.mxu0 %v262_v2 }
  0x1f   :  { %243 = vmatpush3.bf16.msra.mxu0 %v257_v18 }
  0x8f   :  { %v28_v4 = vpop.xlane.xlu0 %27 }
  0x90   :  { %v32_v5 = vmul.f32 0.0078125, %v28_v4 }
  0x92   :  { %v34_v6 = vsub.f32 %v25_v0, %v32_v5 }
  0x93   :  { %v30_v7 = vpop.xlane.xlu0 %29 }
  0x94   :  { %v33_v8 = vmul.f32 0.0078125, %v30_v7  ;;  %v36_v9 = vmul.f32 %v34_v6, %v34_v6 }
  0x96   :  { %v35_v10 = vsub.f32 %v26_v1, %v33_v8  ;;  %38 = vadd.xlane.f32.xlu1 %v36_v9 }
  0x98   :  { %v37_v11 = vmul.f32 %v35_v10, %v35_v10 }
  0x9a   :  { %40 = vadd.xlane.f32.xlu1 %v37_v11 }
 0x123   :  { %v39_v19 = vpop.xlane.xlu1 %38 }
 0x124   :  { %v42_v20 = vmul.f32 0.0078125, %v39_v19 }
 0x126   :  { %v44_v21 = vadd.f32 1e-05, %v42_v20 }
 0x127   :  { %v41_v22 = vpop.xlane.xlu1 %40 }
 0x128   :  { %258 = vrsqrt.f32 %v44_v21  ;;  %v43_v23 = vmul.f32 0.0078125, %v41_v22 }
 0x12a   :  { %v45_v24 = vadd.f32 1e-05, %v43_v23 }
 0x12c   :  { %260 = vrsqrt.f32 %v45_v24 }
 0x132   :  { %v259_v25 = vpop.eup %258 }
 0x133   :  { %v48_v26 = vmul.f32 %v259_v25, %v34_v6 }
 0x135   :  { %v57_v30 = vmul.f32 %v199_v27, %v48_v26 }
 0x136   :  { %v261_v28 = vpop.eup %260 }
 0x137   :  { %v49_v29 = vmul.f32 %v261_v28, %v35_v10  ;;  %v66_v33 = vadd.f32 %v200_v31, %v57_v30 }
 0x139   :  { %v58_v32 = vmul.f32 %v199_v27, %v49_v29 }
 0x13b   :  { %v67_v34 = vadd.f32 %v200_v31, %v58_v32 }
 0x13d   :  { %v72_v35 = vpack.c.bf16 %v67_v34, %v66_v33 }
 0x13f   :  { %245 = vmatmul.mubr.bf16.vlgmr.msra.gmra.mrb[0].mxu0 %v72_v35 }
 0x212   :  { %v178_v37 = vpop.f32.mrb[0].mxu0 }
 0x213   :  { %v246_v38 = vpop.f32.mrb[1].mxu0  ;;  %v179_v40 = vadd.f32 %v201_v36, %v178_v37 }
 0x214   :  { %v181_v39 = vpop.f32.mrb[2].mxu0 }
 0x215   :  { %v182_v41 = vadd.f32 %v201_v36, %v181_v39  ;;  %v247_v42 = vpop.f32.mrb[3].mxu0 }
 0x217   :  { %v217_v43 = vpack.c.bf16 %v182_v41, %v179_v40 }
 0x219   :  { %218 = vst [vmem:[%s341_s5] sm:$0xff] %v217_v43  }

// kernel: ls_transformer_decoder_forward.22
= control target key start
LH: loop header
LB: loop body
LE: loop exit
PB: predicated region body
PF: predicated region fallthrough
CT: control target
= control target key end

     0   :  { %s921_s12 = smov 0   ;;  %s1025_s0 = inlined_call_operand.vmem [shape: bf16[2,8,128], index: 0, kind: input, shape index: {}]   ;;  %s1026_s1 = inlined_call_operand.vmem [shape: bf16[2,8,256], index: 1, kind: input, shape index: {}, may-alias: {1,2}]   ;;  %s1027_s2 = inlined_call_operand.vmem [shape: bf16[2,8,256], index: 2, kind: input, shape index: {}, may-alias: {1,2}]   ;;  %s1028_s3 = inlined_call_operand.vmem [shape: bf16[2,8,128], index: 3, kind: output, shape index: {}]  }
   0x1 LB: > { %s765_s13 = sadd.s32 4294967295, %s894_s12   ;;  %p769_p0 = scmp.ge.s32.totalorder %s894_s12, 1  ;;  %s894_s12 = sphi %s921_s12, %s13_s12  }
   0x2   : > { %p157_p1 = scmp.lt.s32.totalorder %s894_s12, 3 }
   0x4   : > { %p158_p2 = pnand %p769_p0, %p157_p1 }
   0x5   : > { %p190_p3 = scmp.lt.s32.totalorder (!%p158_p2), %s765_s13, 1  ;;  %v896_v0 = vmov (!%p158_p2), 0.0   ;;  %vm897_vm0 = vmmov (!%p158_p2), 0   ;;  %vm213_vm1 = vcmask (!%p158_p2), 261120   ;;  %vm261_vm2 = vcmask (!%p158_p2), 64512   ;;  %s898_s22 = smov (!%p158_p2), 96  }
   0x6   : > { %161 = sbr.rel (%p158_p2) target bundleno = 1477 (0x5c5), region = 32  ;;  %808 = vmatprep.subr.bf16.mxu0 (!%p158_p2), %v896_v0  ;;  %810 = vmatprep.mubr.msk.bf16.mxu0 (!%p158_p2), %vm897_vm0, %v896_v0  ;;  %s899_s23 = smov (!%p158_p2), 64   ;;  %vm277_vm3 = vcmask (!%p158_p2), 1043456   ;;  %vm676_vm4 = vcmask (!%p158_p2), 523264   ;;  %vm678_vm5 = vcmask (!%p158_p2), 785408  }
   0x7   : > { %814 = vmatprep.subr.bf16.mxu1 (!%p158_p2), %v896_v0  ;;  %816 = vmatprep.mubr.msk.bf16.mxu1 (!%p158_p2), %vm897_vm0, %v896_v0  ;;  %s900_s24 = smov (!%p158_p2), 32  }
   0xd   : > { %s1030_s13 = smov (!%p190_p3, %s765_s13), 1 }
   0xe   : > { %s790_s14 = sshll.u32 %s1030_s13, 3  ;;  %s770_s18 = sshll.u32 %s1030_s13, 2 }
   0xf   : > { %s198_s17 = scalar_lea.vmem %s1026_s1, %s790_s14  ;;  %s193_s21 = scalar_lea.vmem %s1025_s0, %s770_s18 }
  0x10   : > { %v211_v1 = vld [vmem:[%s198_s17] sm:$0xf]  ;;  %s725_s27 = scalar_lea.vmem %s1027_s2, %s790_s14  ;;  %s208_s30 = scalar_lea.vmem %s1028_s3, %s770_s18 }
  0x11   : > { %v218_v2 = vsel %vm213_vm1, %v211_v1, 0  ;;  %v210_v3 = vld [vmem:[%s193_s21] sm:$0xf]  ;;  %v780_v10 = vcombine.low %v211_v1, %v211_v1  ;;  %v966_v17 = vld [vmem:[%s725_s27 + $0x4] sm:$0xf] }
  0x12   : > { %809 = vmatpush3.bf16.xpose.msra.mxu0 %v218_v2  ;;  %v779_v11 = vcombine.low %v210_v3, %v210_v3  ;;  %v279_v18 = vsel %vm277_vm3, %v966_v17, 0  ;;  %v782_v1 = vcombine.low %v966_v17, %v966_v17 }
  0x13   : > { %826 = vmatprep.subr.bf16.mxu0 %v896_v0  ;;  %329 = vrot.lane.b32.xlu1 %v780_v10, %s898_s22 }
  0x14   : > { %815 = vmatpush3.bf16.msra.mxu1 %v279_v18 }
  0x15   : > { %820 = vmatprep.subr.bf16.mxu1 %v896_v0 }
  0x17   : > { %324 = vrot.lane.b32.xlu1 %v779_v11, %s898_s22 }
  0x19   : > { %811 = vmatmul.mubr.msk.bf16.vlgmr.msra.gmra.mrb[0].mxu0 %vm213_vm1, %v210_v3 }
  0x1a   : > { %828 = vmatprep.mubr.msk.bf16.mxu0 %vm897_vm0, %v896_v0 }
  0x1b   : > { %441 = vrot.lane.b32.xlu1 %v779_v11, %s899_s23 }
  0x1f   : > { %554 = vrot.lane.b32.xlu1 %v780_v10, %s900_s24 }
  0x23   : > { %552 = vrot.lane.b32.xlu1 %v779_v11, %s900_s24 }
  0x85   : > { %v330_v21 = vpop.permute.xlu1 %329 }
  0x86   : > { %v335_v23 = vsel %vm213_vm1, %v330_v21, 0 }
  0x89   : > { %v325_v25 = vpop.permute.xlu1 %324 }
  0x8d   : > { %v442_v27 = vpop.permute.xlu1 %441 }
  0x91   : > { %v555_v29 = vpop.permute.xlu1 %554 }
  0x92   : > { %v560_v30 = vsel %vm213_vm1, %v555_v29, 0 }
  0x95   : > { %v553_v31 = vpop.permute.xlu1 %552 }
  0xec   : > { %v254_v4 = vpop.f32.mrb[0].mxu0 }
  0xed   : > { %v260_v5 = vmul.f32 0.17677669, %v254_v4  ;;  %v812_v6 = vpop.f32.mrb[1].mxu0 }
  0xee   : > { %v257_v7 = vpop.f32.mrb[2].mxu0 }
  0xef   : > { %v813_v8 = vpop.f32.mrb[3].mxu0  ;;  %v262_v9 = vsel %vm261_vm2, %v260_v5, -inf }
  0xf0   : > { %263 = vmax.xlane.f32.xlu0 %v262_v9 }
 0x17d   : > { %v264_v12 = vpop.xlane.xlu0 %263 }
 0x17e   : > { %v265_v13 = vsub.f32 %v260_v5, %v264_v12 }
 0x180   : > { %v266_v14 = vmul.f32 1.442695, %v265_v13 }
 0x182   : > { %872 = vpow2.f32 %v266_v14 }
 0x18c   : > { %v873_v15 = vpop.eup %872 }
 0x18d   : > { %v268_v16 = vsel %vm261_vm2, %v873_v15, 0.0 }
 0x18e   : > { %269 = vadd.xlane.f32.xlu0 %v268_v16 }
 0x1a4   : > { %443 = vrot.lane.b32.xlu0 %v780_v10, %s899_s23 }
 0x21b   : > { %v270_v19 = vpop.xlane.xlu0 %269 }
 0x21c   : > { %874 = vrcp.f32 %v270_v19 }
 0x21f   : > { %v444_v26 = vpop.permute.xlu0 %443 }
 0x220   : > { %v449_v28 = vsel %vm213_vm1, %v444_v26, 0 }
 0x226   : > { %v875_v20 = vpop.eup %874 }
 0x227   : > { %v272_v22 = vmul.f32 %v875_v20, %v873_v15 }
 0x229   : > { %v273_v24 = vpack.c.bf16 %v272_v22, %v272_v22 }
 0x22b   : > { %817 = vmatmul.mubr.msk.bf16.vlgmr.msra.gmra.mrb[0].mxu1 %vm261_vm2, %v273_v24 }
 0x22c   : > { %821 = vmatpush3.bf16.xpose.msra.mxu1 %v335_v23  ;;  %822 = vmatprep.mubr.msk.bf16.mxu1 %vm897_vm0, %v896_v0 }
 0x22d   : > { %832 = vmatprep.subr.bf16.mxu1 %v896_v0 }
 0x233   : > { %823 = vmatmul.mubr.msk.bf16.vlgmr.msra.gmra.mrb[4].mxu1 %vm213_vm1, %v325_v25 }
 0x234   : > { %833 = vmatpush3.bf16.xpose.msra.mxu1 %v449_v28  ;;  %834 = vmatprep.mubr.msk.bf16.mxu1 %vm897_vm0, %v896_v0 }
 0x235   : > { %844 = vmatprep.subr.bf16.mxu1 %v896_v0 }
 0x23b   : > { %835 = vmatmul.mubr.msk.bf16.vlgmr.msra.gmra.mrb[8].mxu1 %vm213_vm1, %v442_v27 }
 0x23c   : > { %845 = vmatpush3.bf16.xpose.msra.mxu1 %v560_v30  ;;  %846 = vmatprep.mubr.msk.bf16.mxu1 %vm897_vm0, %v896_v0 }
 0x243   : > { %847 = vmatmul.mubr.msk.bf16.vlgmr.msra.gmra.mrb[12].mxu1 %vm213_vm1, %v553_v31 }
 0x2fe   : > { %v987_v32 = vpop.f32.mrb[0].mxu1 }
 0x2ff   : > { %v818_v33 = vpop.f32.mrb[1].mxu1 }
 0x300   : > { %v318_v34 = vpop.f32.mrb[2].mxu1 }
 0x301   : > { %v819_v35 = vpop.f32.mrb[3].mxu1 }
 0x306   : > { %v371_v36 = vpop.f32.mrb[4].mxu1 }
 0x307   : > { %v377_v37 = vmul.f32 0.17677669, %v371_v36  ;;  %v824_v38 = vpop.f32.mrb[5].mxu1 }
 0x308   : > { %v374_v39 = vpop.f32.mrb[6].mxu1 }
 0x309   : > { %v825_v40 = vpop.f32.mrb[7].mxu1  ;;  %v378_v41 = vsel %vm261_vm2, %v377_v37, -inf }
 0x30a   : > { %379 = vmax.xlane.f32.xlu1 %v378_v41 }
 0x30e   : > { %v485_v42 = vpop.f32.mrb[8].mxu1 }
 0x30f   : > { %v491_v43 = vmul.f32 0.17677669, %v485_v42  ;;  %v836_v44 = vpop.f32.mrb[9].mxu1 }
 0x310   : > { %v488_v45 = vpop.f32.mrb[10].mxu1 }
 0x311   : > { %v492_v46 = vsel %vm261_vm2, %v491_v43, -inf  ;;  %v837_v47 = vpop.f32.mrb[11].mxu1 }
 0x312   : > { %493 = vmax.xlane.f32.xlu0 %v492_v46 }
 0x316   : > { %v596_v48 = vpop.f32.mrb[12].mxu1 }
 0x317   : > { %v602_v49 = vmul.f32 0.17677669, %v596_v48  ;;  %v848_v50 = vpop.f32.mrb[13].mxu1 }
 0x318   : > { %v599_v51 = vpop.f32.mrb[14].mxu1 }
 0x319   : > { %v603_v52 = vsel %vm261_vm2, %v602_v49, -inf  ;;  %v849_v53 = vpop.f32.mrb[15].mxu1 }
 0x31a   : > { %604 = vmax.xlane.f32.xlu1 %v603_v52 }
 0x397   : > { %v380_v54 = vpop.xlane.xlu1 %379 }
 0x398   : > { %v381_v55 = vsub.f32 %v377_v37, %v380_v54 }
 0x39a   : > { %v382_v56 = vmul.f32 1.442695, %v381_v55 }
 0x39c   : > { %876 = vpow2.f32 %v382_v56 }
 0x39f   : > { %v494_v57 = vpop.xlane.xlu0 %493 }
 0x3a0   : > { %v495_v58 = vsub.f32 %v491_v43, %v494_v57 }
 0x3a2   : > { %v496_v59 = vmul.f32 1.442695, %v495_v58 }
 0x3a4   : > { %878 = vpow2.f32 %v496_v59 }
 0x3a6   : > { %v877_v60 = vpop.eup %876 }
 0x3a7   : > { %v384_v61 = vsel %vm261_vm2, %v877_v60, 0.0  ;;  %v605_v2 = vpop.xlane.xlu1 %604 }
 0x3a8   : > { %385 = vadd.xlane.f32.xlu1 %v384_v61  ;;  %v606_v3 = vsub.f32 %v602_v49, %v605_v2 }
 0x3aa   : > { %v607_v4 = vmul.f32 1.442695, %v606_v3 }
 0x3ac   : > { %880 = vpow2.f32 %v607_v4 }
 0x3ae   : > { %v879_v62 = vpop.eup %878 }
 0x3af   : > { %v498_v63 = vsel %vm261_vm2, %v879_v62, 0.0 }
 0x3b0   : > { %499 = vadd.xlane.f32.xlu0 %v498_v63 }
 0x3b6   : > { %v881_v5 = vpop.eup %880 }
 0x3b7   : > { %v609_v6 = vsel %vm261_vm2, %v881_v5, 0.0 }
 0x3b9   : > { %504 = vrot.lane.b32.xlu1 %v782_v1, %s899_s23 }
 0x3c6   : > { %393 = vrot.lane.b32.xlu0 %v782_v1, %s898_s22 }
 0x3dd   : > { %610 = vadd.xlane.f32.xlu1 %v609_v6 }
 0x3ee   : > { %615 = vrot.lane.b32.xlu1 %v782_v1, %s900_s24 }
 0x435   : > { %v386_v7 = vpop.xlane.xlu1 %385 }
 0x436   : > { %882 = vrcp.f32 %v386_v7 }
 0x439   : > { %v505_v13 = vpop.permute.xlu1 %504 }
 0x43a   : > { %v510_v15 = vsel %vm277_vm3, %v505_v13, 0 }
 0x43d   : > { %v500_v8 = vpop.xlane.xlu0 %499 }
 0x43e   : > { %884 = vrcp.f32 %v500_v8 }
 0x440   : > { %v883_v9 = vpop.eup %882 }
 0x441   : > { %v388_v10 = vmul.f32 %v883_v9, %v877_v60  ;;  %v394_v11 = vpop.permute.xlu0 %393 }
 0x442   : > { %v399_v12 = vsel %vm277_vm3, %v394_v11, 0 }
 0x443   : > { %827 = vmatpush3.bf16.msra.mxu0 %v399_v12  ;;  %v389_v14 = vpack.c.bf16 %v388_v10, %v388_v10 }
 0x444   : > { %838 = vmatprep.subr.bf16.mxu0 %v896_v0 }
 0x446   : > { %829 = vmatmul.mubr.msk.bf16.vlgmr.msra.gmra.mrb[4].mxu0 %vm261_vm2, %v389_v14 }
 0x447   : > { %839 = vmatpush3.bf16.msra.mxu0 %v510_v15  ;;  %840 = vmatprep.mubr.msk.bf16.mxu0 %vm897_vm0, %v896_v0 }
 0x448   : > { %v885_v16 = vpop.eup %884  ;;  %850 = vmatprep.subr.bf16.mxu0 %v896_v0 }
 0x449   : > { %v502_v17 = vmul.f32 %v885_v16, %v879_v62 }
 0x44b   : > { %v503_v18 = vpack.c.bf16 %v502_v17, %v502_v17 }
 0x44e   : > { %841 = vmatmul.mubr.msk.bf16.vlgmr.msra.gmra.mrb[8].mxu0 %vm261_vm2, %v503_v18 }
 0x44f   : > { %852 = vmatprep.mubr.msk.bf16.mxu0 %vm897_vm0, %v896_v0 }
 0x46a   : > { %v611_v19 = vpop.xlane.xlu1 %610 }
 0x46b   : > { %886 = vrcp.f32 %v611_v19 }
 0x46e   : > { %v616_v20 = vpop.permute.xlu1 %615 }
 0x46f   : > { %v621_v21 = vsel %vm277_vm3, %v616_v20, 0 }
 0x470   : > { %851 = vmatpush3.bf16.msra.mxu0 %v621_v21 }
 0x475   : > { %v887_v22 = vpop.eup %886 }
 0x476   : > { %v613_v23 = vmul.f32 %v887_v22, %v881_v5 }
 0x478   : > { %v614_v24 = vpack.c.bf16 %v613_v23, %v613_v23 }
 0x47a   : > { %853 = vmatmul.mubr.msk.bf16.vlgmr.msra.gmra.mrb[12].mxu0 %vm261_vm2, %v614_v24 }
 0x519   : > { %v435_v25 = vpop.f32.mrb[4].mxu0 }
 0x51a   : > { %664 = vrot.lane.b32.xlu0 %v435_v25, %s900_s24  ;;  %v830_v26 = vpop.f32.mrb[5].mxu0 }
 0x51b   : > { %v438_v27 = vpop.f32.mrb[6].mxu0 }
 0x51c   : > { %v831_v28 = vpop.f32.mrb[7].mxu0 }
 0x521   : > { %v546_v29 = vpop.f32.mrb[8].mxu0 }
 0x522   : > { %668 = vrot.lane.b32.xlu1 %v546_v29, %s899_s23  ;;  %v842_v0 = vpop.f32.mrb[9].mxu0 }
 0x523   : > { %v549_v30 = vpop.f32.mrb[10].mxu0 }
 0x524   : > { %v843_v31 = vpop.f32.mrb[11].mxu0 }
 0x54d   : > { %v657_v33 = vpop.f32.mrb[12].mxu0 }
 0x54e   : > { %672 = vrot.lane.b32.xlu0 %v657_v33, %s898_s22  ;;  %v854_v34 = vpop.f32.mrb[13].mxu0 }
 0x54f   : > { %v660_v35 = vpop.f32.mrb[14].mxu0 }
 0x550   : > { %v855_v36 = vpop.f32.mrb[15].mxu0 }
 0x58c   : > { %v665_v37 = vpop.permute.xlu0 %664 }
 0x58d   : > { %v675_v39 = vsel %vm213_vm1, %v987_v32, %v665_v37 }
 0x594   : > { %v669_v38 = vpop.permute.xlu1 %668 }
 0x595   : > { %v677_v40 = vsel %vm676_vm4, %v675_v39, %v669_v38 }
 0x5c0   : > { %v673_v41 = vpop.permute.xlu0 %672 }
 0x5c1   : > { %v679_v42 = vsel %vm678_vm5, %v677_v40, %v673_v41 }
 0x5c2   : > { %v680_v43 = vpack.c.bf16 %v679_v42, %v679_v42 }
 0x5c4   : > { %681 = vst [vmem:[%s208_s30] sm:$0xf] %v680_v43 }
 0x5c5 PF: > { %s13_s12 = sadd.s32 1, %s894_s12  }
 0x5c6   : > { %p10_p4 = scmp.ge.s32.totalorder %s13_s12, 4  }
 0x5c8   :  { %12 = sbr.rel (!%p10_p4) target bundleno = 1 (0x1), region = 68 }

// kernel: ls_transformer_decoder_forward.33
= control target key start
LH: loop header
LB: loop body
LE: loop exit
PB: predicated region body
PF: predicated region fallthrough
CT: control target
= control target key end

     0   :  { %s679_s0 = inlined_call_operand.vmem [shape: f32[16,128], index: 0, kind: input, shape index: {}]   ;;  %s680_s1 = inlined_call_operand.vmem [shape: f32[1,128], index: 1, kind: input, shape index: {}]   ;;  %s681_s2 = inlined_call_operand.vmem [shape: f32[1,128], index: 2, kind: input, shape index: {}]   ;;  %s682_s3 = inlined_call_operand.vmem [shape: bf16[128,512], index: 3, kind: input, shape index: {}]   ;;  %s683_s4 = inlined_call_operand.vmem [shape: f32[1,512], index: 4, kind: input, shape index: {}]   ;;  %s684_s5 = inlined_call_operand.hbm [shape: f32[16,512], index: 5, kind: output, shape index: {}]  }
   0x1   :  { %v26_v0 = vld [vmem:[%s679_s0] sm:$0xff]  ;;  %v27_v1 = vld [vmem:[%s679_s0 + $0x8] sm:$0xff] }
   0x2   :  { %28 = vadd.xlane.f32.xlu0 %v26_v0 }
   0x6   :  { %30 = vadd.xlane.f32.xlu0 %v27_v1 }
   0x7   :  { %10 = vsyncpa [#allocation4], 0  ;;  %v436_v2 = vld [vmem:[%s682_s3 + $0x4] ss:$16 sps:$4 sm:$0xff]   ;;  %v438_v3 = vld [vmem:[%s682_s3 + $0xc] ss:$16 sps:$4 sm:$0xff]   ;;  %v108_v60 = vlaneseq }
   0x8   :  { %v440_v4 = vld [vmem:[%s682_s3] ss:$16 sps:$4 sm:$0xff]   ;;  %v441_v5 = vld [vmem:[%s682_s3 + $0x8] ss:$16 sps:$4 sm:$0xff]   ;;  %v442_v6 = vld [vmem:[%s682_s3 + $0x24] ss:$16 sps:$4 sm:$0xff]   ;;  %288 = vmatprep.subr.bf16.mxu0 %v436_v2  ;;  %331 = vmatprep.subr.bf16.mxu1 %v438_v3 }
   0x9   :  { %v444_v7 = vld [vmem:[%s682_s3 + $0x2c] ss:$16 sps:$4 sm:$0xff]   ;;  %289 = vmatpush1.bf16.msra.mxu0 %v440_v4  ;;  %332 = vmatpush1.bf16.msra.mxu1 %v441_v5  ;;  %v446_v16 = vld [vmem:[%s682_s3 + $0x20] ss:$16 sps:$4 sm:$0xff]   ;;  %v447_v17 = vld [vmem:[%s682_s3 + $0x28] ss:$16 sps:$4 sm:$0xff]  }
   0xa   :  { %290 = vmatprep.subr.bf16.mxu0 %v442_v6  ;;  %333 = vmatprep.subr.bf16.mxu1 %v444_v7  ;;  %v448_v18 = vld [vmem:[%s682_s3 + $0x44] ss:$16 sps:$4 sm:$0xff]   ;;  %v450_v19 = vld [vmem:[%s682_s3 + $0x4c] ss:$16 sps:$4 sm:$0xff]   ;;  %v452_v20 = vld [vmem:[%s682_s3 + $0x40] ss:$16 sps:$4 sm:$0xff]  }
   0xb   :  { %v453_v21 = vld [vmem:[%s682_s3 + $0x48] ss:$16 sps:$4 sm:$0xff]   ;;  %v454_v22 = vld [vmem:[%s682_s3 + $0x64] ss:$16 sps:$4 sm:$0xff]   ;;  %v456_v23 = vld [vmem:[%s682_s3 + $0x6c] ss:$16 sps:$4 sm:$0xff]  }
   0xc   :  { %v458_v24 = vld [vmem:[%s682_s3 + $0x60] ss:$16 sps:$4 sm:$0xff]   ;;  %v459_v25 = vld [vmem:[%s682_s3 + $0x68] ss:$16 sps:$4 sm:$0xff]   ;;  %v460_v26 = vld [vmem:[%s682_s3 + $0x84] ss:$16 sps:$4 sm:$0xff]  }
   0xd   :  { %291 = vmatpush1.bf16.msra.mxu0 %v446_v16  ;;  %334 = vmatpush1.bf16.msra.mxu1 %v447_v17  ;;  %v462_v27 = vld [vmem:[%s682_s3 + $0x8c] ss:$16 sps:$4 sm:$0xff]   ;;  %v464_v28 = vld [vmem:[%s682_s3 + $0x80] ss:$16 sps:$4 sm:$0xff]   ;;  %v465_v29 = vld [vmem:[%s682_s3 + $0x88] ss:$16 sps:$4 sm:$0xff]  }
   0xe   :  { %292 = vmatprep.subr.bf16.mxu0 %v448_v18  ;;  %335 = vmatprep.subr.bf16.mxu1 %v450_v19  ;;  %v466_v30 = vld [vmem:[%s682_s3 + $0xa4] ss:$16 sps:$4 sm:$0xff]   ;;  %v468_v31 = vld [vmem:[%s682_s3 + $0xac] ss:$16 sps:$4 sm:$0xff]   ;;  %v470_v32 = vld [vmem:[%s682_s3 + $0xa0] ss:$16 sps:$4 sm:$0xff]  }
   0xf   :  { %v471_v33 = vld [vmem:[%s682_s3 + $0xa8] ss:$16 sps:$4 sm:$0xff]   ;;  %v472_v34 = vld [vmem:[%s682_s3 + $0xc4] ss:$16 sps:$4 sm:$0xff]   ;;  %v474_v35 = vld [vmem:[%s682_s3 + $0xcc] ss:$16 sps:$4 sm:$0xff]  }
  0x10   :  { %v512_v36 = vmov 0   ;;  %v476_v37 = vld [vmem:[%s682_s3 + $0xc0] ss:$16 sps:$4 sm:$0xff]   ;;  %v477_v38 = vld [vmem:[%s682_s3 + $0xc8] ss:$16 sps:$4 sm:$0xff]   ;;  %v109_v61 = vshrl.u32 %v108_v60, 7 }
  0x11   :  { %293 = vmatpush1.bf16.msra.mxu0 %v452_v20  ;;  %336 = vmatpush1.bf16.msra.mxu1 %v453_v21  ;;  %v478_v39 = vld [vmem:[%s682_s3 + $0xe4] ss:$16 sps:$4 sm:$0xff]   ;;  %v480_v40 = vld [vmem:[%s682_s3 + $0xec] ss:$16 sps:$4 sm:$0xff]   ;;  %v482_v41 = vld [vmem:[%s682_s3 + $0xe0] ss:$16 sps:$4 sm:$0xff]  }
  0x12   :  { %294 = vmatprep.subr.bf16.mxu0 %v454_v22  ;;  %337 = vmatprep.subr.bf16.mxu1 %v456_v23  ;;  %v483_v42 = vld [vmem:[%s682_s3 + $0xe8] ss:$16 sps:$4 sm:$0xff]   ;;  %v398_v51 = vld [vmem:[%s680_s1] ss:$0 sm:$0xff]  ;;  %v110_v62 = vsub.s32 0, %v109_v61  ;;  %v118_v63 = vsub.s32 2, %v109_v61 }
  0x13   :  { %320 = vmatprep.mubr.bf16.mxu0 %v512_v36  ;;  %363 = vmatprep.mubr.bf16.mxu1 %v512_v36  ;;  %v399_v55 = vld [vmem:[%s681_s2] ss:$0 sm:$0xff]  ;;  %v122_v2 = vsub.s32 3, %v109_v61  ;;  %s513_s2 = smov [#allocation3]  }
  0x14   :  { %s387_s12 = sshll.u32 %s513_s2, 4  ;;  %s388_s12 = int_to_ptr.vmem [resolvable:$true] %s387_s12 }
  0x15   :  { %295 = vmatpush1.bf16.msra.mxu0 %v458_v24  ;;  %338 = vmatpush1.bf16.msra.mxu1 %v459_v25  ;;  %p493_p1 = scmp.lt.s32.totalorder %s388_s12, %s388_s12 }
  0x16   :  { %296 = vmatprep.subr.bf16.mxu0 %v460_v26  ;;  %339 = vmatprep.subr.bf16.mxu1 %v462_v27 }
  0x19   :  { %297 = vmatpush1.bf16.msra.mxu0 %v464_v28  ;;  %340 = vmatpush1.bf16.msra.mxu1 %v465_v29 }
  0x1a   :  { %298 = vmatprep.subr.bf16.mxu0 %v466_v30  ;;  %341 = vmatprep.subr.bf16.mxu1 %v468_v31 }
  0x1d   :  { %299 = vmatpush1.bf16.msra.mxu0 %v470_v32  ;;  %342 = vmatpush1.bf16.msra.mxu1 %v471_v33 }
  0x1e   :  { %300 = vmatprep.subr.bf16.mxu0 %v472_v34  ;;  %343 = vmatprep.subr.bf16.mxu1 %v474_v35 }
  0x21   :  { %301 = vmatpush1.bf16.msra.mxu0 %v476_v37  ;;  %344 = vmatpush1.bf16.msra.mxu1 %v477_v38 }
  0x22   :  { %302 = vmatprep.subr.bf16.mxu0 %v478_v39  ;;  %345 = vmatprep.subr.bf16.mxu1 %v480_v40 }
  0x25   :  { %303 = vmatpush1.bf16.msra.mxu0 %v482_v41  ;;  %346 = vmatpush1.bf16.msra.mxu1 %v483_v42 }
  0x8f   :  { %v29_v8 = vpop.xlane.xlu0 %28 }
  0x90   :  { %v33_v9 = vmul.f32 0.0078125, %v29_v8 }
  0x92   :  { %v570_v10 = vsub.f32 %v26_v0, %v33_v9  ;;  %v106_v0 = vld [vmem:[%s683_s4] sm:$0xf]  ;;  %s488_s4 = scalar_lea.vmem %s388_s12, 1024 }
  0x93   :  { %v31_v11 = vpop.xlane.xlu0 %30  ;;  %v111_v3 = vrot.slane %v106_v0, %v110_v62  ;;  %v119_v4 = vrot.slane %v106_v0, %v118_v63  ;;  %v123_v6 = vrot.slane %v106_v0, %v122_v2  ;;  %p489_p0 = scmp.ne.s32.totalorder %s388_s12, %s488_s4  ;;  %p494_p2 = scmp.lt.s32.totalorder %s488_s4, %s488_s4 }
  0x94   :  { %v34_v12 = vmul.f32 0.0078125, %v31_v11  ;;  %v37_v13 = vmul.f32 %v570_v10, %v570_v10 }
  0x95   :  { %p495_p3 = por %p494_p2, %p493_p1 }
  0x96   :  { %v574_v14 = vsub.f32 %v27_v1, %v34_v12  ;;  %39 = vadd.xlane.f32.xlu1 %v37_v13  ;;  %v114_v1 = vsub.s32 1, %v109_v61 }
  0x97   :  { %p496_p4 = pnand %p495_p3, %p489_p0 }
  0x98   :  { %v38_v15 = vmul.f32 %v574_v14, %v574_v14  ;;  %v115_v5 = vrot.slane %v106_v0, %v114_v1 }
  0x9a   :  { %41 = vadd.xlane.f32.xlu1 %v38_v15 }
 0x123   :  { %v40_v43 = vpop.xlane.xlu1 %39 }
 0x124   :  { %v43_v44 = vmul.f32 0.0078125, %v40_v43 }
 0x126   :  { %v45_v45 = vadd.f32 1e-05, %v43_v44 }
 0x127   :  { %v42_v46 = vpop.xlane.xlu1 %41 }
 0x128   :  { %484 = vrsqrt.f32 %v45_v45  ;;  %v44_v47 = vmul.f32 0.0078125, %v42_v46 }
 0x12a   :  { %v46_v48 = vadd.f32 1e-05, %v44_v47 }
 0x12c   :  { %486 = vrsqrt.f32 %v46_v48 }
 0x132   :  { %v485_v49 = vpop.eup %484 }
 0x133   :  { %v49_v50 = vmul.f32 %v485_v49, %v570_v10 }
 0x135   :  { %v58_v54 = vmul.f32 %v398_v51, %v49_v50 }
 0x136   :  { %v487_v52 = vpop.eup %486 }
 0x137   :  { %v50_v53 = vmul.f32 %v487_v52, %v574_v14  ;;  %v67_v57 = vadd.f32 %v399_v55, %v58_v54 }
 0x139   :  { %v59_v56 = vmul.f32 %v398_v51, %v50_v53 }
 0x13b   :  { %v68_v58 = vadd.f32 %v399_v55, %v59_v56 }
 0x13d   :  { %v73_v59 = vpack.c.bf16 %v68_v58, %v67_v57 }
 0x13f   :  { %321 = vmatmul.mubr.bf16.vlgmr.msra.gmra.mrb[0].mxu0 %v73_v59  ;;  %364 = vmatmul.mubr.bf16.vlgmr.msra.gmra.mrb[0].mxu1 %v73_v59 }
 0x212   :  { %v322_v7 = vpop.f32.mrb[0].mxu0  ;;  %v365_v8 = vpop.f32.mrb[0].mxu1 }
 0x213   :  { %v323_v9 = vadd.f32 %v322_v7, %v111_v3  ;;  %v366_v10 = vadd.f32 %v365_v8, %v119_v4  ;;  %v324_v11 = vpop.f32.mrb[1].mxu0  ;;  %v367_v12 = vpop.f32.mrb[1].mxu1 }
 0x214   :  { %v325_v13 = vadd.f32 %v324_v11, %v115_v5  ;;  %v368_v14 = vadd.f32 %v367_v12, %v123_v6  ;;  %v326_v15 = vpop.f32.mrb[2].mxu0  ;;  %v369_v16 = vpop.f32.mrb[2].mxu1 }
 0x215   :  { %374 = vst [vmem:[#allocation3] sm:$0xff] %v323_v9  ;;  %376 = vst [vmem:[#allocation3 + $0x10] sm:$0xff] %v366_v10  ;;  %v327_v17 = vadd.f32 %v326_v15, %v111_v3  ;;  %v370_v18 = vadd.f32 %v369_v16, %v119_v4  ;;  %v328_v19 = vpop.f32.mrb[3].mxu0  ;;  %v371_v20 = vpop.f32.mrb[3].mxu1 }
 0x216   :  { %375 = vst [vmem:[#allocation3 + $0x8] sm:$0xff] %v325_v13  ;;  %377 = vst [vmem:[#allocation3 + $0x18] sm:$0xff] %v368_v14  ;;  %v329_v21 = vadd.f32 %v328_v19, %v115_v5  ;;  %v372_v22 = vadd.f32 %v371_v20, %v123_v6 }
 0x217   :  { %378 = vst [vmem:[#allocation3 + $0x20] sm:$0xff] %v327_v17  ;;  %380 = vst [vmem:[#allocation3 + $0x30] sm:$0xff] %v370_v18 }
 0x218   :  { %379 = vst [vmem:[#allocation3 + $0x28] sm:$0xff] %v329_v21  ;;  %381 = vst [vmem:[#allocation3 + $0x38] sm:$0xff] %v372_v22 }
 0x219   :  { %499 = shalt.err (!%p496_p4)
}
 0x21a   :  { %s500_s15 = scalar_lea.hbm %s684_s5, 1024 }
 0x21b   :  { %p501_p5 = scmp.ne.s32.totalorder %s684_s5, %s500_s15  ;;  %p504_p6 = scmp.lt.u32.totalorder %s500_s15, %s684_s5 }
 0x21d   :  { %p506_p7 = pnand %p504_p6, %p501_p5 }
 0x21f   :  { %509 = shalt.err (!%p506_p7)
}
 0x220   :  { %s514_s20 = smov 512   ;;  %s515_s21 = smov 32  }
 0x221   :  { %393 = dma.vmem_to_hbm [thread:$0]  %s388_s12, 1024, %s684_s5, [#allocation4], %s514_s20, %s514_s20, %s515_s21  }
 0x222   :  { %510 = dma.done.wait [#allocation4], 1024  }
 0x223   :  { %511 = vsyncadd [#allocation4], 4294966272 }
 0x224   :  { %397 = vsyncpa [#allocation4], 1 }

// kernel: ls_transformer_decoder_forward.24
= control target key start
LH: loop header
LB: loop body
LE: loop exit
PB: predicated region body
PF: predicated region fallthrough
CT: control target
= control target key end

     0   :  { %v539_v21 = vmov 0   ;;  %v99_v60 = vlaneseq  ;;  %s720_s0 = inlined_call_operand.vmem [shape: f32[16,128], index: 0, kind: input, shape index: {}]   ;;  %s721_s3 = inlined_call_operand.vmem [shape: bf16[128,256], index: 3, kind: input, shape index: {}]   ;;  %s722_s5 = inlined_call_operand.vmem [shape: bf16[256,128], index: 5, kind: input, shape index: {}]   ;;  %s723_s1 = inlined_call_operand.vmem [shape: f32[1,128], index: 1, kind: input, shape index: {}]   ;;  %s724_s2 = inlined_call_operand.vmem [shape: f32[1,128], index: 2, kind: input, shape index: {}]   ;;  %s725_s4 = inlined_call_operand.vmem [shape: f32[1,256], index: 4, kind: input, shape index: {}]   ;;  %s726_s6 = inlined_call_operand.vmem [shape: f32[1,128], index: 6, kind: input, shape index: {}]   ;;  %s727_s7 = inlined_call_operand.vmem [shape: f32[16,128], index: 7, kind: output, shape index: {}]  }
   0x1   :  { %v583_v0 = vld [vmem:[%s720_s0] sm:$0xff]  ;;  %v589_v1 = vld [vmem:[%s720_s0 + $0x8] sm:$0xff]  ;;  %v498_v4 = vld [vmem:[%s721_s3 + $0x14] ss:$8 sps:$4 sm:$0xff]   ;;  %221 = vmatprep.mubr.bf16.mxu0 %v539_v21 }
   0x2   :  { %33 = vadd.xlane.f32.xlu0 %v583_v0  ;;  %v495_v2 = vld [vmem:[%s721_s3 + $0x4] ss:$8 sps:$4 sm:$0xff]   ;;  %v497_v3 = vld [vmem:[%s721_s3] ss:$8 sps:$4 sm:$0xff]   ;;  %v500_v13 = vld [vmem:[%s721_s3 + $0x10] ss:$8 sps:$4 sm:$0xff]  }
   0x3   :  { %189 = vmatprep.subr.bf16.mxu0 %v495_v2  ;;  %v501_v14 = vld [vmem:[%s721_s3 + $0x24] ss:$8 sps:$4 sm:$0xff]   ;;  %v503_v15 = vld [vmem:[%s721_s3 + $0x20] ss:$8 sps:$4 sm:$0xff]   ;;  %v504_v16 = vld [vmem:[%s721_s3 + $0x34] ss:$8 sps:$4 sm:$0xff]  }
   0x4   :  { %190 = vmatpush1.bf16.msra.mxu0 %v497_v3  ;;  %v506_v17 = vld [vmem:[%s721_s3 + $0x30] ss:$8 sps:$4 sm:$0xff]   ;;  %v507_v18 = vld [vmem:[%s721_s3 + $0x44] ss:$8 sps:$4 sm:$0xff]   ;;  %v509_v19 = vld [vmem:[%s721_s3 + $0x40] ss:$8 sps:$4 sm:$0xff]  }
   0x5   :  { %191 = vmatprep.subr.bf16.mxu0 %v498_v4  ;;  %v510_v20 = vld [vmem:[%s721_s3 + $0x54] ss:$8 sps:$4 sm:$0xff]   ;;  %v512_v22 = vld [vmem:[%s721_s3 + $0x50] ss:$8 sps:$4 sm:$0xff]   ;;  %v513_v23 = vld [vmem:[%s721_s3 + $0x64] ss:$8 sps:$4 sm:$0xff]  }
   0x6   :  { %35 = vadd.xlane.f32.xlu0 %v589_v1  ;;  %v515_v24 = vld [vmem:[%s721_s3 + $0x60] ss:$8 sps:$4 sm:$0xff]   ;;  %v516_v25 = vld [vmem:[%s721_s3 + $0x74] ss:$8 sps:$4 sm:$0xff]   ;;  %v518_v26 = vld [vmem:[%s721_s3 + $0x70] ss:$8 sps:$4 sm:$0xff]  }
   0x7   :  { %v519_v27 = vld [vmem:[%s722_s5 + $0x40] sm:$0xff]   ;;  %v521_v29 = vld [vmem:[%s722_s5 + $0x48] sm:$0xff]   ;;  %v523_v31 = vld [vmem:[%s722_s5 + $0x50] sm:$0xff]   ;;  %v100_v61 = vshrl.u32 %v99_v60, 7 }
   0x8   :  { %192 = vmatpush1.bf16.msra.mxu0 %v500_v13  ;;  %v520_v28 = vld [vmem:[%s722_s5] sm:$0xff]   ;;  %472 = vmatprep.subr.bf16.mxu1 %v519_v27  ;;  %v522_v30 = vld [vmem:[%s722_s5 + $0x8] sm:$0xff]   ;;  %v524_v32 = vld [vmem:[%s722_s5 + $0x10] sm:$0xff]  }
   0x9   :  { %193 = vmatprep.subr.bf16.mxu0 %v501_v14  ;;  %473 = vmatpush3.bf16.msra.mxu1 %v520_v28  ;;  %v525_v33 = vld [vmem:[%s722_s5 + $0x58] sm:$0xff]   ;;  %v527_v35 = vld [vmem:[%s722_s5 + $0x60] sm:$0xff]   ;;  %v529_v37 = vld [vmem:[%s722_s5 + $0x68] sm:$0xff]   ;;  %v101_v62 = vsub.s32 0, %v100_v61  ;;  %v105_v2 = vsub.s32 1, %v100_v61 }
   0xa   :  { %474 = vmatprep.subr.bf16.mxu1 %v521_v29  ;;  %v526_v34 = vld [vmem:[%s722_s5 + $0x18] sm:$0xff]   ;;  %v528_v36 = vld [vmem:[%s722_s5 + $0x20] sm:$0xff]   ;;  %v530_v55 = vld [vmem:[%s722_s5 + $0x28] sm:$0xff]  }
   0xb   :  { %v437_v46 = vld [vmem:[%s723_s1] ss:$0 sm:$0xff]  ;;  %v531_v56 = vld [vmem:[%s722_s5 + $0x70] sm:$0xff]   ;;  %v533_v58 = vld [vmem:[%s722_s5 + $0x78] sm:$0xff]  }
   0xc   :  { %194 = vmatpush1.bf16.msra.mxu0 %v503_v15  ;;  %v438_v50 = vld [vmem:[%s724_s2] ss:$0 sm:$0xff]  ;;  %v532_v57 = vld [vmem:[%s722_s5 + $0x30] sm:$0xff]   ;;  %v534_v59 = vld [vmem:[%s722_s5 + $0x38] sm:$0xff]  }
   0xd   :  { %195 = vmatprep.subr.bf16.mxu0 %v504_v16  ;;  %475 = vmatpush3.bf16.msra.mxu1 %v522_v30  ;;  %v97_v63 = vld [vmem:[%s725_s4] sm:$0x3] }
   0xe   :  { %476 = vmatprep.subr.bf16.mxu1 %v523_v31  ;;  %v102_v3 = vrot.slane %v97_v63, %v101_v62  ;;  %v106_v4 = vrot.slane %v97_v63, %v105_v2 }
  0x10   :  { %196 = vmatpush1.bf16.msra.mxu0 %v506_v17 }
  0x11   :  { %197 = vmatprep.subr.bf16.mxu0 %v507_v18  ;;  %477 = vmatpush3.bf16.msra.mxu1 %v524_v32 }
  0x12   :  { %478 = vmatprep.subr.bf16.mxu1 %v525_v33 }
  0x14   :  { %198 = vmatpush1.bf16.msra.mxu0 %v509_v19 }
  0x15   :  { %199 = vmatprep.subr.bf16.mxu0 %v510_v20  ;;  %479 = vmatpush3.bf16.msra.mxu1 %v526_v34 }
  0x16   :  { %480 = vmatprep.subr.bf16.mxu1 %v527_v35 }
  0x18   :  { %200 = vmatpush1.bf16.msra.mxu0 %v512_v22 }
  0x19   :  { %201 = vmatprep.subr.bf16.mxu0 %v513_v23  ;;  %481 = vmatpush3.bf16.msra.mxu1 %v528_v36  ;;  %v471_v23 = vld [vmem:[%s726_s6] ss:$0 sm:$0xff] }
  0x1a   :  { %482 = vmatprep.subr.bf16.mxu1 %v529_v37 }
  0x1c   :  { %202 = vmatpush1.bf16.msra.mxu0 %v515_v24 }
  0x1d   :  { %203 = vmatprep.subr.bf16.mxu0 %v516_v25  ;;  %483 = vmatpush3.bf16.msra.mxu1 %v530_v55 }
  0x1e   :  { %484 = vmatprep.subr.bf16.mxu1 %v531_v56 }
  0x20   :  { %204 = vmatpush1.bf16.msra.mxu0 %v518_v26 }
  0x21   :  { %485 = vmatpush3.bf16.msra.mxu1 %v532_v57 }
  0x22   :  { %486 = vmatprep.subr.bf16.mxu1 %v533_v58 }
  0x25   :  { %487 = vmatpush3.bf16.msra.mxu1 %v534_v59 }
  0x8f   :  { %v34_v5 = vpop.xlane.xlu0 %33 }
  0x90   :  { %v38_v6 = vmul.f32 0.0078125, %v34_v5 }
  0x92   :  { %v602_v7 = vsub.f32 %v583_v0, %v38_v6 }
  0x93   :  { %v36_v8 = vpop.xlane.xlu0 %35 }
  0x94   :  { %v39_v9 = vmul.f32 0.0078125, %v36_v8  ;;  %v42_v10 = vmul.f32 %v602_v7, %v602_v7 }
  0x96   :  { %v607_v11 = vsub.f32 %v589_v1, %v39_v9  ;;  %44 = vadd.xlane.f32.xlu1 %v42_v10 }
  0x98   :  { %v43_v12 = vmul.f32 %v607_v11, %v607_v11 }
  0x9a   :  { %46 = vadd.xlane.f32.xlu1 %v43_v12 }
 0x123   :  { %v45_v38 = vpop.xlane.xlu1 %44 }
 0x124   :  { %v48_v39 = vmul.f32 0.0078125, %v45_v38 }
 0x126   :  { %v50_v40 = vadd.f32 1e-05, %v48_v39 }
 0x127   :  { %v47_v41 = vpop.xlane.xlu1 %46 }
 0x128   :  { %535 = vrsqrt.f32 %v50_v40  ;;  %v49_v42 = vmul.f32 0.0078125, %v47_v41 }
 0x12a   :  { %v51_v43 = vadd.f32 1e-05, %v49_v42 }
 0x12c   :  { %537 = vrsqrt.f32 %v51_v43 }
 0x132   :  { %v536_v44 = vpop.eup %535 }
 0x133   :  { %v54_v45 = vmul.f32 %v536_v44, %v602_v7 }
 0x135   :  { %v63_v49 = vmul.f32 %v437_v46, %v54_v45 }
 0x136   :  { %v538_v47 = vpop.eup %537 }
 0x137   :  { %v55_v48 = vmul.f32 %v538_v47, %v607_v11  ;;  %v72_v52 = vadd.f32 %v438_v50, %v63_v49 }
 0x139   :  { %v64_v51 = vmul.f32 %v437_v46, %v55_v48 }
 0x13b   :  { %v73_v53 = vadd.f32 %v438_v50, %v64_v51 }
 0x13d   :  { %v80_v54 = vpack.c.bf16 %v73_v53, %v72_v52 }
 0x13f   :  { %222 = vmatmul.mubr.bf16.vlgmr.msra.gmra.mrb[0].mxu0 %v80_v54 }
 0x212   :  { %v223_v5 = vpop.f32.mrb[0].mxu0 }
 0x213   :  { %v224_v6 = vadd.f32 %v223_v5, %v102_v3  ;;  %v225_v7 = vpop.f32.mrb[1].mxu0 }
 0x214   :  { %v226_v8 = vadd.f32 %v225_v7, %v106_v4  ;;  %v227_v9 = vpop.f32.mrb[2].mxu0 }
 0x215   :  { %v228_v10 = vadd.f32 %v227_v9, %v102_v3  ;;  %v229_v11 = vpop.f32.mrb[3].mxu0  ;;  %v232_v13 = vmax.f32 %v224_v6, 0.0 }
 0x216   :  { %v230_v12 = vadd.f32 %v229_v11, %v106_v4  ;;  %v233_v15 = vmax.f32 %v226_v8, 0.0 }
 0x217   :  { %v234_v14 = vmax.f32 %v228_v10, 0.0 }
 0x218   :  { %v235_v16 = vmax.f32 %v230_v12, 0.0 }
 0x219   :  { %v238_v17 = vpack.c.bf16 %v234_v14, %v232_v13 }
 0x21a   :  { %v239_v18 = vpack.c.bf16 %v235_v16, %v233_v15 }
 0x21c   :  { %400 = vmatprep.mubr.bf16.mxu1 %v239_v18 }
 0x21d   :  { %401 = vmatmul.mubr.bf16.vlgmr.msra.gmra.mrb[0].mxu1 %v238_v17 }
 0x2f0   :  { %v488_v19 = vpop.f32.mrb[0].mxu1 }
 0x2f1   :  { %v489_v20 = vpop.f32.mrb[1].mxu1 }
 0x2f2   :  { %v490_v21 = vadd.f32 %v489_v20, %v488_v19  ;;  %v491_v22 = vpop.f32.mrb[2].mxu1 }
 0x2f3   :  { %v492_v24 = vpop.f32.mrb[3].mxu1 }
 0x2f4   :  { %v420_v25 = vadd.f32 %v490_v21, %v583_v0  ;;  %v493_v26 = vadd.f32 %v492_v24, %v491_v22 }
 0x2f6   :  { %v429_v27 = vadd.f32 %v471_v23, %v420_v25  ;;  %v421_v28 = vadd.f32 %v493_v26, %v589_v1 }
 0x2f8   :  { %431 = vst [vmem:[%s727_s7] sm:$0xff] %v429_v27  ;;  %v430_v29 = vadd.f32 %v471_v23, %v421_v28 }
 0x2fa   :  { %432 = vst [vmem:[%s727_s7 + $0x8] sm:$0xff] %v430_v29 }

</bundles_post_ra>
